<compile_context>
chip_gen: v7x
topology: tpu7x:2x2x1
jax: 0.10.0
libtpu: 0.0.40
codegen_flags: <defaults>
</compile_context>

<pallas_src>
import functools
import numpy as np
import jax
import jax.numpy as jnp
from jax.experimental import pallas as pl
from jax.experimental.pallas import tpu as pltpu


# ----------------------------------------------------------------------------
# Fused direct-convolution Pallas kernel (stride 1, arbitrary dilation)
# ----------------------------------------------------------------------------
def _dconv_kernel(*refs, taps, KW, dh, dw, TH, act, fuse, has_bias):
    it = iter(refs)
    x_ref = next(it)                                 # (1, Hp, Wp, Cin)  bf16
    w_ref = next(it)                                 # (taps, Cin, Cout) bf16
    b_ref = next(it) if has_bias else None           # (1, Cout)         f32
    z_ref = next(it) if fuse != "none" else None     # (1, TH, Wout, Cout)
    o_ref = next(it)                                 # (1, TH, Wout, Cout)

    _, _, Wout, Cout = o_ref.shape
    Cin = x_ref.shape[-1]
    h0 = pl.program_id(1) * TH

    acc = jnp.zeros((TH * Wout, Cout), jnp.float32)
    for t in range(taps):                            # unrolled tap loop (<= 9)
        ky, kx = t // KW, t % KW
        patch = x_ref[0, pl.ds(h0 + ky * dh, TH), pl.ds(kx * dw, Wout), :]
        acc = acc + jnp.dot(patch.reshape(TH * Wout, Cin), w_ref[t],
                            preferred_element_type=jnp.float32)
    if has_bias:
        acc = acc + b_ref[...]
    if act == "leaky":
        acc = jnp.where(acc >= 0, acc, 0.2 * acc)
    elif act == "relu":
        acc = jnp.maximum(acc, 0.0)
    elif act == "sigmoid":
        acc = jax.nn.sigmoid(acc)

    out = acc.reshape(TH, Wout, Cout)
    if fuse == "mul":                                # sigmoid-mask * x
        out = out * z_ref[0].astype(jnp.float32)
    elif fuse == "add_leaky":                        # residual add + LeakyReLU
        s = out + z_ref[0].astype(jnp.float32)
        out = jnp.where(s >= 0, s, 0.2 * s)
    elif fuse == "add_clamp01":                      # final skip add + clamp
        out = jnp.clip(out + z_ref[0].astype(jnp.float32), 0.0, 1.0)
    o_ref[0] = out.astype(o_ref.dtype)


_DCONV_CACHE = {}


def _pick_th(Hout, Wout):
    """Largest divisor of Hout keeping the M tile (TH*Wout rows) bounded."""
    budget = max(1, 2048 // max(Wout, 1))
    th = 1
    for d in range(1, Hout + 1):
        if Hout % d == 0 and d <= budget:
            th = d
    return th


def direct_conv(xp, w_taps, bias, *, KH, KW, dh, dw, Hout, Wout,
                act="none", fuse="none", z=None, out_dtype=jnp.bfloat16):
    """xp: (N,Hp,Wp,Cin) padded NHWC bf16.  w_taps: (KH*KW,Cin,Cout) bf16."""
    del KH  # implied by taps/KW
    N, Hp, Wp, Cin = xp.shape
    taps, _, Cout = w_taps.shape
    has_bias = bias is not None
    TH = _pick_th(Hout, Wout)
    key = (N, Hp, Wp, Cin, taps, KW, Cout, dh, dw, Hout, Wout, TH, act, fuse,
           has_bias, None if z is None else (tuple(z.shape), str(z.dtype)),
           jnp.dtype(out_dtype).name)
    if key not in _DCONV_CACHE:
        in_specs = [
            pl.BlockSpec((1, Hp, Wp, Cin), lambda n, h: (n, 0, 0, 0)),
            pl.BlockSpec((taps, Cin, Cout), lambda n, h: (0, 0, 0)),
        ]
        if has_bias:
            in_specs.append(pl.BlockSpec((1, Cout), lambda n, h: (0, 0)))
        if fuse != "none":
            in_specs.append(
                pl.BlockSpec((1, TH, Wout, Cout), lambda n, h: (n, h, 0, 0)))
        _DCONV_CACHE[key] = jax.jit(pl.pallas_call(
            functools.partial(_dconv_kernel, taps=taps, KW=KW, dh=dh, dw=dw,
                              TH=TH, act=act, fuse=fuse, has_bias=has_bias),
            out_shape=jax.ShapeDtypeStruct((N, Hout, Wout, Cout), out_dtype),
            grid_spec=pltpu.PrefetchScalarGridSpec(
                num_scalar_prefetch=0,
                grid=(N, Hout // TH),
                in_specs=in_specs,
                out_specs=pl.BlockSpec((1, TH, Wout, Cout),
                                       lambda n, h: (n, h, 0, 0)),
            ),
            compiler_params=pltpu.CompilerParams(
                dimension_semantics=("parallel", "parallel")),
        ))
    args = [xp, w_taps]
    if has_bias:
        args.append(bias)
    if fuse != "none":
        args.append(z)
    return _DCONV_CACHE[key](*args)


# ----------------------------------------------------------------------------
# Conv wrappers (layout/pad glue in JAX, compute in the Pallas kernel)
# ----------------------------------------------------------------------------
def conv_p(x, p, *, padding=0, dilation=1, act="none", fuse="none", z=None,
           out_dtype=jnp.bfloat16):
    """Stride-1 Conv2d (PyTorch OIHW weights) on an NHWC tensor via Pallas."""
    w, b = p["w"], p["b"]
    Cout, Cin, KH, KW = w.shape
    ph, pw = padding if isinstance(padding, tuple) else (padding, padding)
    dh, dw = dilation if isinstance(dilation, tuple) else (dilation, dilation)
    N, H, W_, _ = x.shape
    Hout = H + 2 * ph - dh * (KH - 1)
    Wout = W_ + 2 * pw - dw * (KW - 1)
    xp = jnp.pad(x.astype(jnp.bfloat16), ((0, 0), (ph, ph), (pw, pw), (0, 0)))
    w_taps = jnp.transpose(w, (2, 3, 1, 0)).reshape(KH * KW, Cin, Cout)
    w_taps = w_taps.astype(jnp.bfloat16)
    bias = None if b is None else b.reshape(1, Cout).astype(jnp.float32)
    # Pad tiny input-channel counts (en1: Cin=3) to 8 lanes.
    if Cin < 8:
        cpi = 8 - Cin
        xp = jnp.pad(xp, ((0, 0), (0, 0), (0, 0), (0, cpi)))
        w_taps = jnp.pad(w_taps, ((0, 0), (0, cpi), (0, 0)))
    # Lane-dense output padding for tiny Cout (final 3-channel layer).
    cpad = 0
    if Cout < 8:
        cpad = 128 - Cout
        w_taps = jnp.pad(w_taps, ((0, 0), (0, 0), (0, cpad)))
        if bias is not None:
            bias = jnp.pad(bias, ((0, 0), (0, cpad)))
        if z is not None:
            z = jnp.pad(z, ((0, 0), (0, 0), (0, 0), (0, cpad)))
    out = direct_conv(xp, w_taps, bias, KH=KH, KW=KW, dh=dh, dw=dw,
                      Hout=Hout, Wout=Wout, act=act, fuse=fuse, z=z,
                      out_dtype=out_dtype)
    if cpad:
        out = out[..., :Cout]
    return out


def conv_s2_p(x, p, *, padding=1, act="none", out_dtype=jnp.bfloat16):
    """3x3 / stride-2 Conv2d via space-to-depth + the stride-1 Pallas kernel."""
    w, b = p["w"], p["b"]
    Cout, Cin, KH, KW = w.shape
    N, H, W_, _ = x.shape
    ph = pw = padding
    Hout = (H + 2 * ph - KH) // 2 + 1
    Wout = (W_ + 2 * pw - KW) // 2 + 1
    xp = jnp.pad(x.astype(jnp.bfloat16), ((0, 0), (ph, ph), (pw, pw), (0, 0)))
    tgt_h, tgt_w = 2 * (Hout + 1), 2 * (Wout + 1)
    xp = xp[:, :min(xp.shape[1], tgt_h), :min(xp.shape[2], tgt_w), :]
    xp = jnp.pad(xp, ((0, 0), (0, tgt_h - xp.shape[1]),
                      (0, tgt_w - xp.shape[2]), (0, 0)))
    Hs, Ws = tgt_h // 2, tgt_w // 2
    s = xp.reshape(N, Hs, 2, Ws, 2, Cin).transpose(0, 1, 3, 2, 4, 5)
    s = s.reshape(N, Hs, Ws, 4 * Cin)
    # 2x2 kernel over the space-to-depth input (taps beyond K are zero).
    wt = jnp.transpose(w, (2, 3, 1, 0))                     # (KH,KW,Cin,Cout)
    w2 = jnp.zeros((2, 2, 2, 2, Cin, Cout), jnp.float32)
    for dy in range(2):
        for dx in range(2):
            for py in range(2):
                for px in range(2):
                    ky, kx = 2 * dy + py, 2 * dx + px
                    if ky < KH and kx < KW:
                        w2 = w2.at[dy, dx, py, px].set(wt[ky, kx])
    w_taps = w2.reshape(4, 4 * Cin, Cout).astype(jnp.bfloat16)
    bias = None if b is None else b.reshape(1, Cout).astype(jnp.float32)
    return direct_conv(s, w_taps, bias, KH=2, KW=2, dh=1, dw=1,
                       Hout=Hout, Wout=Wout, act=act, out_dtype=out_dtype)


def conv_transpose_p(x, p, *, act="none", out_dtype=jnp.bfloat16):
    """4x4 / stride-2 / pad-1 ConvTranspose2d via 4 phase convs (2x2, stride-1)."""
    w, b = p["w"], p["b"]                                   # (Cin,Cout,4,4)
    Cin, Cout, K, _ = w.shape
    N, H, W_, _ = x.shape
    wf = jnp.transpose(jnp.flip(w, axis=(2, 3)), (2, 3, 0, 1))  # (K,K,Cin,Cout)
    bias = None if b is None else b.reshape(1, Cout).astype(jnp.float32)
    xb = x.astype(jnp.bfloat16)
    phase_rows = []
    for a in range(2):
        row = []
        for c in range(2):
            w_taps = jnp.stack([wf[2 * dy + a, 2 * dx + c]
                                for dy in range(2) for dx in range(2)],
                               axis=0).astype(jnp.bfloat16)     # (4,Cin,Cout)
            xpad = jnp.pad(xb, ((0, 0), (1 - a, a), (1 - c, c), (0, 0)))
            row.append(direct_conv(xpad, w_taps, bias, KH=2, KW=2, dh=1, dw=1,
                                   Hout=H, Wout=W_, act=act,
                                   out_dtype=out_dtype))
        phase_rows.append(jnp.stack(row, axis=0))
    ph = jnp.stack(phase_rows, axis=0)                      # (2,2,N,H,W,Cout)
    return jnp.transpose(ph, (2, 3, 0, 4, 1, 5)).reshape(N, 2 * H, 2 * W_, Cout)


def conv_xla(x, p, *, padding=0, dilation=1):
    """Tiny pooled-branch convs: left to XLA (sub-128-row matmuls would be
    pure launch overhead as individual Pallas kernels)."""
    w, b = p["w"], p["b"]
    ph, pw = padding if isinstance(padding, tuple) else (padding, padding)
    dh, dw = dilation if isinstance(dilation, tuple) else (dilation, dilation)
    out = jax.lax.conv_general_dilated(
        x.astype(jnp.float32), w.astype(jnp.float32),
        window_strides=(1, 1), padding=((ph, ph), (pw, pw)),
        rhs_dilation=(dh, dw),
        dimension_numbers=("NHWC", "OIHW", "NHWC"))
    if b is not None:
        out = out + b.reshape(1, 1, 1, -1)
    return out


# ----------------------------------------------------------------------------
# Adaptive average pooling / nearest interpolation (PyTorch-semantics glue)
# ----------------------------------------------------------------------------
def adaptive_pool_axis(x, out_size, axis):
    in_size = x.shape[axis]
    pieces = []
    for k in range(out_size):
        s = (k * in_size) // out_size
        e = int(np.ceil((k + 1) * in_size / out_size))
        idx = [slice(None)] * x.ndim
        idx[axis] = slice(s, e)
        pieces.append(jnp.mean(x[tuple(idx)], axis=axis, keepdims=True))
    return pieces[0] if out_size == 1 else jnp.concatenate(pieces, axis=axis)


def interp_nearest(x, out_h, out_w):
    N, H, W, C = x.shape
    hi = (np.arange(out_h) * H) // out_h
    wi = (np.arange(out_w) * W) // out_w
    return x[:, hi][:, :, wi]


# ----------------------------------------------------------------------------
# Parameter initialization (deterministic, synthetic)
# ----------------------------------------------------------------------------
class PInit:
    def __init__(self, seed=0):
        self._key = jax.random.PRNGKey(seed)

    def _next(self):
        self._key, k = jax.random.split(self._key)
        return k

    def conv(self, cout, cin, kh, kw, bias=True):
        fan_in = cin * kh * kw
        w = jax.random.normal(self._next(), (cout, cin, kh, kw), jnp.float32) * (0.5 / np.sqrt(fan_in))
        b = (jax.random.normal(self._next(), (cout,), jnp.float32) * 0.01) if bias else None
        return {"w": w, "b": b}

    def convT(self, cin, cout, kh, kw, bias=True):
        fan_in = cin * kh * kw
        w = jax.random.normal(self._next(), (cin, cout, kh, kw), jnp.float32) * (0.5 / np.sqrt(fan_in))
        b = (jax.random.normal(self._next(), (cout,), jnp.float32) * 0.01) if bias else None
        return {"w": w, "b": b}


def init_ba(pi, inpl, outpl):
    mid = outpl // 2
    return {
        "conv_1_h": pi.conv(mid, inpl, 3, 1, bias=False),
        "conv_1_w": pi.conv(mid, inpl, 1, 3, bias=False),
        "conv_3_h": pi.conv(mid, inpl, 3, 3, bias=False),
        "conv_3_w": pi.conv(mid, inpl, 3, 3, bias=False),
        "conv_5_h": pi.conv(mid, inpl, 3, 3, bias=False),
        "conv_5_w": pi.conv(mid, inpl, 3, 3, bias=False),
        "conv_7_h": pi.conv(mid, inpl, 3, 3, bias=False),
        "conv_7_w": pi.conv(mid, inpl, 3, 3, bias=False),
        "fuse_conv": pi.conv(mid, mid * 4, 3, 3, bias=False),
        "conv_final": pi.conv(outpl, mid, 1, 1, bias=True),
        "mask_conv_1": pi.conv(outpl, outpl, 3, 3, bias=True),
        "mask_conv_2": pi.conv(outpl, outpl, 3, 3, bias=True),
    }


def init_bam(pi, in_ch, ch):
    dch = ch // 2
    p = {"shortcut": in_ch != ch}
    if in_ch != ch:
        p["shortcut_conv"] = pi.conv(ch, in_ch, 1, 1, bias=False)
    p["input_conv"] = pi.conv(ch, ch, 3, 3)
    p["content_conv_d1"] = pi.conv(dch, ch, 3, 3)
    p["content_conv_d3"] = pi.conv(dch, ch, 3, 3)
    p["content_conv_d5"] = pi.conv(dch, ch, 3, 3)
    p["content_conv_d1_2"] = pi.conv(dch, ch, 3, 3)
    p["content_conv_d3_2"] = pi.conv(dch, ch, 3, 3)
    p["content_conv_d5_2"] = pi.conv(dch, ch, 3, 3)
    p["fuse_conv_1"] = pi.conv(ch, 3 * dch, 3, 3)
    p["final_conv"] = pi.conv(ch, 5 * dch, 3, 3)
    p["ba"] = init_ba(pi, ch, ch)
    return p


def init_banet(seed=0, in_ch=3, out_ch=3):
    pi = PInit(seed)
    return {
        "en1": pi.conv(64, in_ch, 3, 3),
        "en2": pi.conv(128, 64, 3, 3),
        "bams": [init_bam(pi, 128, 256)] + [init_bam(pi, 256, 256) for _ in range(9)],
        "de1": pi.convT(256, 128, 4, 4),
        "de2": pi.conv(64, 128 + 64, 3, 3),
        "de3": pi.conv(out_ch, 64, 3, 3),
    }


# ----------------------------------------------------------------------------
# Forward passes
# ----------------------------------------------------------------------------
def ba_forward(x, p):
    N, H, W_, C = x.shape
    xf = x.astype(jnp.float32)
    x_1_h = conv_xla(adaptive_pool_axis(xf, 1, axis=2), p["conv_1_h"], padding=(1, 0))
    x_1_h = jnp.broadcast_to(x_1_h, (N, H, W_, x_1_h.shape[-1]))
    x_1_w = conv_xla(adaptive_pool_axis(xf, 1, axis=1), p["conv_1_w"], padding=(0, 1))
    x_1_w = jnp.broadcast_to(x_1_w, (N, H, W_, x_1_w.shape[-1]))

    x_3_h = interp_nearest(conv_xla(adaptive_pool_axis(xf, 3, axis=2), p["conv_3_h"], padding=1), H, W_)
    x_3_w = interp_nearest(conv_xla(adaptive_pool_axis(xf, 3, axis=1), p["conv_3_w"], padding=1), H, W_)
    x_5_h = interp_nearest(conv_xla(adaptive_pool_axis(xf, 5, axis=2), p["conv_5_h"], padding=1), H, W_)
    x_5_w = interp_nearest(conv_xla(adaptive_pool_axis(xf, 5, axis=1), p["conv_5_w"], padding=1), H, W_)
    x_7_h = interp_nearest(conv_xla(adaptive_pool_axis(xf, 7, axis=2), p["conv_7_h"], padding=1), H, W_)
    x_7_w = interp_nearest(conv_xla(adaptive_pool_axis(xf, 7, axis=1), p["conv_7_w"], padding=1), H, W_)

    cat = jnp.concatenate([x_1_h + x_1_w, x_3_h + x_3_w,
                           x_5_h + x_5_w, x_7_h + x_7_w], axis=-1)
    hx = conv_p(cat, p["fuse_conv"], padding=1, act="relu")
    # conv_final + sigmoid + (x * mask_1) fused into one Pallas kernel
    out1 = conv_p(hx, p["conv_final"], padding=0, act="sigmoid", fuse="mul", z=x)
    hx = conv_p(out1, p["mask_conv_1"], padding=1, act="relu")
    # mask_conv_2 + sigmoid + (out1 * mask_2) fused
    return conv_p(hx, p["mask_conv_2"], padding=1, act="sigmoid", fuse="mul", z=out1)


def bam_forward(x, p):
    if p["shortcut"]:
        x = conv_p(x, p["shortcut_conv"], padding=0)
    in_feature = conv_p(x, p["input_conv"], padding=1, act="leaky")
    ba_out = ba_forward(in_feature, p["ba"])
    d1 = conv_p(in_feature, p["content_conv_d1"], padding=1, dilation=1)
    d3 = conv_p(in_feature, p["content_conv_d3"], padding=3, dilation=3)
    d5 = conv_p(in_feature, p["content_conv_d5"], padding=5, dilation=5)
    fusion = conv_p(jnp.concatenate([d1, d3, d5], axis=-1), p["fuse_conv_1"],
                    padding=1, act="leaky")
    d1_2 = conv_p(fusion, p["content_conv_d1_2"], padding=1, dilation=1)
    d3_2 = conv_p(fusion, p["content_conv_d3_2"], padding=3, dilation=3)
    d5_2 = conv_p(fusion, p["content_conv_d5_2"], padding=5, dilation=5)
    cat = jnp.concatenate([d1_2, d3_2, d5_2, ba_out], axis=-1)
    # final_conv + residual add + LeakyReLU(0.2) fused
    return conv_p(cat, p["final_conv"], padding=1, fuse="add_leaky", z=x)


def banet_forward(x_nchw, p):
    x = jnp.transpose(x_nchw, (0, 2, 3, 1)).astype(jnp.float32)   # NCHW -> NHWC
    hx = conv_p(x, p["en1"], padding=1, act="leaky")
    residual = hx
    hx = conv_s2_p(hx, p["en2"], padding=1, act="leaky")
    for bp in p["bams"]:
        hx = bam_forward(hx, bp)
    hx = conv_transpose_p(hx, p["de1"], act="leaky")
    hx = conv_p(jnp.concatenate([hx, residual], axis=-1), p["de2"],
                padding=1, act="leaky")
    # TODO(synk): nets.utils.clamp_class forward assumed to be clamp(x, 0, 1).
    out = conv_p(hx, p["de3"], padding=1, fuse="add_clamp01", z=x,
                 out_dtype=jnp.float32)
    return jnp.transpose(out, (0, 3, 1, 2))                        # NHWC -> NCHW


# ----------------------------------------------------------------------------
if __name__ == "__main__":
    key = jax.random.PRNGKey(0)
    x = jax.random.uniform(key, (2, 3, 16, 16), jnp.float32)  # NCHW like PyTorch
    params = init_banet(seed=0, in_ch=3, out_ch=3)
    out = banet_forward(x, params)
    out = jax.block_until_ready(out)
    assert out.shape == (2, 3, 16, 16)
    assert bool(jnp.all(jnp.isfinite(out)))
    print("KERNEL_OK")
</pallas_src>

<mosaic_0001>
module attributes {stable_mosaic.version = 11 : i64} {
  func.func @_dconv_kernel(%arg0: i32, %arg1: i32, %arg2: memref<1x18x18x8xbf16, #tpu.memory_space<vmem>>, %arg3: memref<9x8x64xbf16, #tpu.memory_space<vmem>>, %arg4: memref<1x64xf32, #tpu.memory_space<vmem>>, %arg5: memref<1x16x16x64xbf16, #tpu.memory_space<vmem>>) attributes {dimension_semantics = [#tpu.dimension_semantics<parallel>, #tpu.dimension_semantics<parallel>], iteration_bounds = array<i64: 2, 1>, scalar_prefetch = 0 : i64, scratch_operands = 0 : i64, tpu.core_type = #tpu.core_type<tc>, window_params = [{transform_indices = @transform_0, window_bounds = array<i64: 1, 18, 18, 8>}, {pipeline_mode = #tpu.pipeline_mode<synchronous>, transform_indices = @transform_1, window_bounds = array<i64: 9, 8, 64>}, {pipeline_mode = #tpu.pipeline_mode<synchronous>, transform_indices = @transform_2, window_bounds = array<i64: 1, 64>}, {transform_indices = @transform_3, window_bounds = array<i64: 1, 16, 16, 64>}]} {
    %c16_i32 = arith.constant 16 : i32
    %0 = arith.muli %arg1, %c16_i32 : i32
    %cst = arith.constant 0.000000e+00 : f32
    %1 = vector.broadcast %cst : f32 to vector<256x64xf32>
    %c0_i32 = arith.constant 0 : i32
    %2 = arith.addi %0, %c0_i32 : i32
    %c0 = arith.constant 0 : index
    %3 = arith.index_cast %2 : i32 to index
    %c0_0 = arith.constant 0 : index
    %c0_1 = arith.constant 0 : index
    %4 = vector.load %arg2[%c0, %3, %c0_0, %c0_1] : memref<1x18x18x8xbf16, #tpu.memory_space<vmem>>, vector<1x16x16x8xbf16>
    %5 = vector.shape_cast %4 : vector<1x16x16x8xbf16> to vector<16x16x8xbf16>
    %6 = vector.shape_cast %5 : vector<16x16x8xbf16> to vector<256x8xbf16>
    %c0_2 = arith.constant 0 : index
    %c0_3 = arith.constant 0 : index
    %c0_4 = arith.constant 0 : index
    %7 = vector.load %arg3[%c0_2, %c0_3, %c0_4] : memref<9x8x64xbf16, #tpu.memory_space<vmem>>, vector<1x8x64xbf16>
    %8 = vector.shape_cast %7 : vector<1x8x64xbf16> to vector<8x64xbf16>
    %cst_5 = arith.constant dense<0.000000e+00> : vector<256x64xf32>
    %9 = tpu.matmul %6, %8, %cst_5 {dimension_numbers = #tpu.dot_dimension_numbers<[1], [0], [0], [1], [0, 0, 1, 1], [], []>} : vector<256x8xbf16>, vector<8x64xbf16>, vector<256x64xf32> -> vector<256x64xf32>
    %10 = arith.addf %1, %9 : vector<256x64xf32>
    %c0_i32_6 = arith.constant 0 : i32
    %11 = arith.addi %0, %c0_i32_6 : i32
    %c0_7 = arith.constant 0 : index
    %12 = arith.index_cast %11 : i32 to index
    %c1 = arith.constant 1 : index
    %c0_8 = arith.constant 0 : index
    %13 = vector.load %arg2[%c0_7, %12, %c1, %c0_8] : memref<1x18x18x8xbf16, #tpu.memory_space<vmem>>, vector<1x16x16x8xbf16>
    %14 = vector.shape_cast %13 : vector<1x16x16x8xbf16> to vector<16x16x8xbf16>
    %15 = vector.shape_cast %14 : vector<16x16x8xbf16> to vector<256x8xbf16>
    %c1_9 = arith.constant 1 : index
    %c0_10 = arith.constant 0 : index
    %c0_11 = arith.constant 0 : index
    %16 = vector.load %arg3[%c1_9, %c0_10, %c0_11] : memref<9x8x64xbf16, #tpu.memory_space<vmem>>, vector<1x8x64xbf16>
    %17 = vector.shape_cast %16 : vector<1x8x64xbf16> to vector<8x64xbf16>
    %cst_12 = arith.constant dense<0.000000e+00> : vector<256x64xf32>
    %18 = tpu.matmul %15, %17, %cst_12 {dimension_numbers = #tpu.dot_dimension_numbers<[1], [0], [0], [1], [0, 0, 1, 1], [], []>} : vector<256x8xbf16>, vector<8x64xbf16>, vector<256x64xf32> -> vector<256x64xf32>
    %19 = arith.addf %10, %18 : vector<256x64xf32>
    %c0_i32_13 = arith.constant 0 : i32
    %20 = arith.addi %0, %c0_i32_13 : i32
    %c0_14 = arith.constant 0 : index
    %21 = arith.index_cast %20 : i32 to index
    %c2 = arith.constant 2 : index
    %c0_15 = arith.constant 0 : index
    %22 = vector.load %arg2[%c0_14, %21, %c2, %c0_15] : memref<1x18x18x8xbf16, #tpu.memory_space<vmem>>, vector<1x16x16x8xbf16>
    %23 = vector.shape_cast %22 : vector<1x16x16x8xbf16> to vector<16x16x8xbf16>
    %24 = vector.shape_cast %23 : vector<16x16x8xbf16> to vector<256x8xbf16>
    %c2_16 = arith.constant 2 : index
    %c0_17 = arith.constant 0 : index
    %c0_18 = arith.constant 0 : index
    %25 = vector.load %arg3[%c2_16, %c0_17, %c0_18] : memref<9x8x64xbf16, #tpu.memory_space<vmem>>, vector<1x8x64xbf16>
    %26 = vector.shape_cast %25 : vector<1x8x64xbf16> to vector<8x64xbf16>
    %cst_19 = arith.constant dense<0.000000e+00> : vector<256x64xf32>
    %27 = tpu.matmul %24, %26, %cst_19 {dimension_numbers = #tpu.dot_dimension_numbers<[1], [0], [0], [1], [0, 0, 1, 1], [], []>} : vector<256x8xbf16>, vector<8x64xbf16>, vector<256x64xf32> -> vector<256x64xf32>
    %28 = arith.addf %19, %27 : vector<256x64xf32>
    %c1_i32 = arith.constant 1 : i32
    %29 = arith.addi %0, %c1_i32 : i32
    %c0_20 = arith.constant 0 : index
    %30 = arith.index_cast %29 : i32 to index
    %c0_21 = arith.constant 0 : index
    %c0_22 = arith.constant 0 : index
    %31 = vector.load %arg2[%c0_20, %30, %c0_21, %c0_22] : memref<1x18x18x8xbf16, #tpu.memory_space<vmem>>, vector<1x16x16x8xbf16>
    %32 = vector.shape_cast %31 : vector<1x16x16x8xbf16> to vector<16x16x8xbf16>
    %33 = vector.shape_cast %32 : vector<16x16x8xbf16> to vector<256x8xbf16>
    %c3 = arith.constant 3 : index
    %c0_23 = arith.constant 0 : index
    %c0_24 = arith.constant 0 : index
    %34 = vector.load %arg3[%c3, %c0_23, %c0_24] : memref<9x8x64xbf16, #tpu.memory_space<vmem>>, vector<1x8x64xbf16>
    %35 = vector.shape_cast %34 : vector<1x8x64xbf16> to vector<8x64xbf16>
    %cst_25 = arith.constant dense<0.000000e+00> : vector<256x64xf32>
    %36 = tpu.matmul %33, %35, %cst_25 {dimension_numbers = #tpu.dot_dimension_numbers<[1], [0], [0], [1], [0, 0, 1, 1], [], []>} : vector<256x8xbf16>, vector<8x64xbf16>, vector<256x64xf32> -> vector<256x64xf32>
    %37 = arith.addf %28, %36 : vector<256x64xf32>
    %c1_i32_26 = arith.constant 1 : i32
    %38 = arith.addi %0, %c1_i32_26 : i32
    %c0_27 = arith.constant 0 : index
    %39 = arith.index_cast %38 : i32 to index
    %c1_28 = arith.constant 1 : index
    %c0_29 = arith.constant 0 : index
    %40 = vector.load %arg2[%c0_27, %39, %c1_28, %c0_29] : memref<1x18x18x8xbf16, #tpu.memory_space<vmem>>, vector<1x16x16x8xbf16>
    %41 = vector.shape_cast %40 : vector<1x16x16x8xbf16> to vector<16x16x8xbf16>
    %42 = vector.shape_cast %41 : vector<16x16x8xbf16> to vector<256x8xbf16>
    %c4 = arith.constant 4 : index
    %c0_30 = arith.constant 0 : index
    %c0_31 = arith.constant 0 : index
    %43 = vector.load %arg3[%c4, %c0_30, %c0_31] : memref<9x8x64xbf16, #tpu.memory_space<vmem>>, vector<1x8x64xbf16>
    %44 = vector.shape_cast %43 : vector<1x8x64xbf16> to vector<8x64xbf16>
    %cst_32 = arith.constant dense<0.000000e+00> : vector<256x64xf32>
    %45 = tpu.matmul %42, %44, %cst_32 {dimension_numbers = #tpu.dot_dimension_numbers<[1], [0], [0], [1], [0, 0, 1, 1], [], []>} : vector<256x8xbf16>, vector<8x64xbf16>, vector<256x64xf32> -> vector<256x64xf32>
    %46 = arith.addf %37, %45 : vector<256x64xf32>
    %c1_i32_33 = arith.constant 1 : i32
    %47 = arith.addi %0, %c1_i32_33 : i32
    %c0_34 = arith.constant 0 : index
    %48 = arith.index_cast %47 : i32 to index
    %c2_35 = arith.constant 2 : index
    %c0_36 = arith.constant 0 : index
    %49 = vector.load %arg2[%c0_34, %48, %c2_35, %c0_36] : memref<1x18x18x8xbf16, #tpu.memory_space<vmem>>, vector<1x16x16x8xbf16>
    %50 = vector.shape_cast %49 : vector<1x16x16x8xbf16> to vector<16x16x8xbf16>
    %51 = vector.shape_cast %50 : vector<16x16x8xbf16> to vector<256x8xbf16>
    %c5 = arith.constant 5 : index
    %c0_37 = arith.constant 0 : index
    %c0_38 = arith.constant 0 : index
    %52 = vector.load %arg3[%c5, %c0_37, %c0_38] : memref<9x8x64xbf16, #tpu.memory_space<vmem>>, vector<1x8x64xbf16>
    %53 = vector.shape_cast %52 : vector<1x8x64xbf16> to vector<8x64xbf16>
    %cst_39 = arith.constant dense<0.000000e+00> : vector<256x64xf32>
    %54 = tpu.matmul %51, %53, %cst_39 {dimension_numbers = #tpu.dot_dimension_numbers<[1], [0], [0], [1], [0, 0, 1, 1], [], []>} : vector<256x8xbf16>, vector<8x64xbf16>, vector<256x64xf32> -> vector<256x64xf32>
    %55 = arith.addf %46, %54 : vector<256x64xf32>
    %c2_i32 = arith.constant 2 : i32
    %56 = arith.addi %0, %c2_i32 : i32
    %c0_40 = arith.constant 0 : index
    %57 = arith.index_cast %56 : i32 to index
    %c0_41 = arith.constant 0 : index
    %c0_42 = arith.constant 0 : index
    %58 = vector.load %arg2[%c0_40, %57, %c0_41, %c0_42] : memref<1x18x18x8xbf16, #tpu.memory_space<vmem>>, vector<1x16x16x8xbf16>
    %59 = vector.shape_cast %58 : vector<1x16x16x8xbf16> to vector<16x16x8xbf16>
    %60 = vector.shape_cast %59 : vector<16x16x8xbf16> to vector<256x8xbf16>
    %c6 = arith.constant 6 : index
    %c0_43 = arith.constant 0 : index
    %c0_44 = arith.constant 0 : index
    %61 = vector.load %arg3[%c6, %c0_43, %c0_44] : memref<9x8x64xbf16, #tpu.memory_space<vmem>>, vector<1x8x64xbf16>
    %62 = vector.shape_cast %61 : vector<1x8x64xbf16> to vector<8x64xbf16>
    %cst_45 = arith.constant dense<0.000000e+00> : vector<256x64xf32>
    %63 = tpu.matmul %60, %62, %cst_45 {dimension_numbers = #tpu.dot_dimension_numbers<[1], [0], [0], [1], [0, 0, 1, 1], [], []>} : vector<256x8xbf16>, vector<8x64xbf16>, vector<256x64xf32> -> vector<256x64xf32>
    %64 = arith.addf %55, %63 : vector<256x64xf32>
    %c2_i32_46 = arith.constant 2 : i32
    %65 = arith.addi %0, %c2_i32_46 : i32
    %c0_47 = arith.constant 0 : index
    %66 = arith.index_cast %65 : i32 to index
    %c1_48 = arith.constant 1 : index
    %c0_49 = arith.constant 0 : index
    %67 = vector.load %arg2[%c0_47, %66, %c1_48, %c0_49] : memref<1x18x18x8xbf16, #tpu.memory_space<vmem>>, vector<1x16x16x8xbf16>
    %68 = vector.shape_cast %67 : vector<1x16x16x8xbf16> to vector<16x16x8xbf16>
    %69 = vector.shape_cast %68 : vector<16x16x8xbf16> to vector<256x8xbf16>
    %c7 = arith.constant 7 : index
    %c0_50 = arith.constant 0 : index
    %c0_51 = arith.constant 0 : index
    %70 = vector.load %arg3[%c7, %c0_50, %c0_51] : memref<9x8x64xbf16, #tpu.memory_space<vmem>>, vector<1x8x64xbf16>
    %71 = vector.shape_cast %70 : vector<1x8x64xbf16> to vector<8x64xbf16>
    %cst_52 = arith.constant dense<0.000000e+00> : vector<256x64xf32>
    %72 = tpu.matmul %69, %71, %cst_52 {dimension_numbers = #tpu.dot_dimension_numbers<[1], [0], [0], [1], [0, 0, 1, 1], [], []>} : vector<256x8xbf16>, vector<8x64xbf16>, vector<256x64xf32> -> vector<256x64xf32>
    %73 = arith.addf %64, %72 : vector<256x64xf32>
    %c2_i32_53 = arith.constant 2 : i32
    %74 = arith.addi %0, %c2_i32_53 : i32
    %c0_54 = arith.constant 0 : index
    %75 = arith.index_cast %74 : i32 to index
    %c2_55 = arith.constant 2 : index
    %c0_56 = arith.constant 0 : index
    %76 = vector.load %arg2[%c0_54, %75, %c2_55, %c0_56] : memref<1x18x18x8xbf16, #tpu.memory_space<vmem>>, vector<1x16x16x8xbf16>
    %77 = vector.shape_cast %76 : vector<1x16x16x8xbf16> to vector<16x16x8xbf16>
    %78 = vector.shape_cast %77 : vector<16x16x8xbf16> to vector<256x8xbf16>
    %c8 = arith.constant 8 : index
    %c0_57 = arith.constant 0 : index
    %c0_58 = arith.constant 0 : index
    %79 = vector.load %arg3[%c8, %c0_57, %c0_58] : memref<9x8x64xbf16, #tpu.memory_space<vmem>>, vector<1x8x64xbf16>
    %80 = vector.shape_cast %79 : vector<1x8x64xbf16> to vector<8x64xbf16>
    %cst_59 = arith.constant dense<0.000000e+00> : vector<256x64xf32>
    %81 = tpu.matmul %78, %80, %cst_59 {dimension_numbers = #tpu.dot_dimension_numbers<[1], [0], [0], [1], [0, 0, 1, 1], [], []>} : vector<256x8xbf16>, vector<8x64xbf16>, vector<256x64xf32> -> vector<256x64xf32>
    %82 = arith.addf %73, %81 : vector<256x64xf32>
    %c0_60 = arith.constant 0 : index
    %c0_61 = arith.constant 0 : index
    %83 = vector.load %arg4[%c0_60, %c0_61] : memref<1x64xf32, #tpu.memory_space<vmem>>, vector<1x64xf32>
    %84 = vector.broadcast %83 : vector<1x64xf32> to vector<256x64xf32>
    %85 = arith.addf %82, %84 : vector<256x64xf32>
    %cst_62 = arith.constant 0.000000e+00 : f32
    %86 = vector.broadcast %cst_62 : f32 to vector<256x64xf32>
    %87 = arith.cmpf oge, %85, %86 : vector<256x64xf32>
    %cst_63 = arith.constant 2.000000e-01 : f32
    %88 = vector.broadcast %cst_63 : f32 to vector<256x64xf32>
    %89 = arith.mulf %88, %85 : vector<256x64xf32>
    %90 = arith.select %87, %85, %89 : vector<256x64xi1>, vector<256x64xf32>
    %91 = vector.shape_cast %90 : vector<256x64xf32> to vector<16x16x64xf32>
    %92 = arith.truncf %91 : vector<16x16x64xf32> to vector<16x16x64xbf16>
    %c0_64 = arith.constant 0 : index
    %c0_65 = arith.constant 0 : index
    %c0_66 = arith.constant 0 : index
    %c0_67 = arith.constant 0 : index
    %93 = vector.load %arg5[%c0_64, %c0_65, %c0_66, %c0_67] : memref<1x16x16x64xbf16, #tpu.memory_space<vmem>>, vector<1x16x16x64xbf16>
    %94 = vector.shape_cast %93 : vector<1x16x16x64xbf16> to vector<16x16x64xbf16>
    %95 = vector.shape_cast %92 : vector<16x16x64xbf16> to vector<1x16x16x64xbf16>
    tpu.vector_store %arg5[%c0_64, %c0_65, %c0_66, %c0_67], %95 {strides = array<i32>} : memref<1x16x16x64xbf16, #tpu.memory_space<vmem>>, vector<1x16x16x64xbf16>,
    return
  }
  func.func @transform_0(%arg0: i32, %arg1: i32) -> (i32, i32, i32, i32) {
    %c0_i32 = arith.constant 0 : i32
    %c0_i32_0 = arith.constant 0 : i32
    %c0_i32_1 = arith.constant 0 : i32
    %c0_i32_2 = arith.constant 0 : i32
    return %arg0, %c0_i32, %c0_i32_0, %c0_i32_1 : i32, i32, i32, i32
  }
  func.func @transform_1(%arg0: i32, %arg1: i32) -> (i32, i32, i32) {
    %c0_i32 = arith.constant 0 : i32
    %c0_i32_0 = arith.constant 0 : i32
    %c0_i32_1 = arith.constant 0 : i32
    %c0_i32_2 = arith.constant 0 : i32
    return %c0_i32, %c0_i32_0, %c0_i32_1 : i32, i32, i32
  }
  func.func @transform_2(%arg0: i32, %arg1: i32) -> (i32, i32) {
    %c0_i32 = arith.constant 0 : i32
    %c0_i32_0 = arith.constant 0 : i32
    %c0_i32_1 = arith.constant 0 : i32
    return %c0_i32, %c0_i32_0 : i32, i32
  }
  func.func @transform_3(%arg0: i32, %arg1: i32) -> (i32, i32, i32, i32) {
    %c0_i32 = arith.constant 0 : i32
    %c0_i32_0 = arith.constant 0 : i32
    %c0_i32_1 = arith.constant 0 : i32
    return %arg0, %arg1, %c0_i32, %c0_i32_0 : i32, i32, i32, i32
  }
}

</mosaic_0001>

<bundles_post_ra>
// kernel: tpu_custom_call.1
= control target key start
LH: loop header
LB: loop body
LE: loop exit
PB: predicated region body
PF: predicated region fallthrough
CT: control target
= control target key end

     0   :  { %8 = vsyncpa [#allocation3], 0  ;;  %s8701_s0 = inlined_call_operand.vmem [shape: bf16[2,18,18,8], index: 0, kind: input, shape index: {}]   ;;  %s8702_s1 = inlined_call_operand.vmem [shape: bf16[9,8,64], index: 1, kind: input, shape index: {}]   ;;  %s8703_s2 = inlined_call_operand.vmem [shape: f32[1,64], index: 2, kind: input, shape index: {}]   ;;  %s8704_s3 = inlined_call_operand.hbm [shape: bf16[2,16,16,64], index: 3, kind: output, shape index: {}]  }
   0x1   :  { %10 = vsyncpa [#allocation3 + $0x1], 0  ;;  %s6757_s12 = smov 0   ;;  %s6759_s13 = smov 0  }
   0x2   :  { %s6761_s14 = smov 0   ;;  %s6763_s15 = smov 0  }
   0x3   :  { %s6765_s16 = smov 0   ;;  %s6767_s17 = smov 0  }
   0x4 LB: > { %s5150_s18 = sadd.s32 4294967295, %s6732_s17   ;;  %s5151_s19 = sadd.s32 4294967294, %s6732_s17   ;;  %s6732_s17 = sphi %s6767_s17, %s16_s17   ;;  %s6728_s16 = sphi %s6765_s16, %s8778_s16   ;;  %s6724_s15 = sphi %s6763_s15, %s8777_s15   ;;  %s6720_s14 = sphi %s6761_s14, %s8776_s14   ;;  %s6716_s13 = sphi %s6759_s13, %s8775_s13   ;;  %s6712_s12 = sphi %s6757_s12, %s8774_s12  }
   0x5   : > { %s28_s20 = sadd.s32 1, %s6728_s16  ;;  %s105_s21 = sadd.s32 1, %s6720_s14 }
   0x6   : > { %p30_p0 = scmp.ge.s32.totalorder %s28_s20, 2  ;;  %p115_p1 = scmp.ne.s32.totalorder %s6720_s14, %s6716_s13 }
   0x7   : > { %p116_p2 = scmp.eq.s32.totalorder %s5150_s18, 1  ;;  %p121_p3 = scmp.ne.s32.totalorder %s6716_s13, %s6712_s12 }
   0x8   : > { %s8780_s20 = smov (%p30_p0, %s28_s20), 0  ;;  %p122_p5 = scmp.eq.s32.totalorder %s5151_s19, 1 }
   0x9   : > { %p6797_p4 = por %p116_p2, %p115_p1  ;;  %s100_s23 = ssub.s32 %s6728_s16, %s8780_s20 }
   0xa   : > { %p5154_p6 = scmp.ge.s32.totalorder %s6732_s17, 1  ;;  %p103_p7 = scmp.eq.s32.totalorder %s100_s23, 0 }
   0xb   : > { %p6804_p8 = por %p122_p5, %p121_p3  ;;  %p154_p9 = scmp.lt.s32.totalorder %s6732_s17, 3 }
   0xc   : > { %s6810_s25 = scalar_select %p103_p7, %s6720_s14, %s105_s21  }
   0xd   : > { %p155_p10 = pnand %p5154_p6, %p154_p9 }
   0xf   : > { %158 = sbr.rel (%p155_p10) target bundleno = 614 (0x266), region = 32 }
  0x16   : > { %v5157_v0 = vld [vmem:[%s8702_s1 + $0x4] sm:$0xf]  ;;  %vm724_vm0 = vcmask 1043456   ;;  %v5384_v1 = vld [vmem:[%s8702_s1 + $0x10] sm:$0xf]  ;;  %p178_p11 = scmp.lt.s32.totalorder %s6724_s15, 1 }
  0x17   : > { %6481 = vmatprep.subr.msk.bf16.mxu1 %vm724_vm0, %v5157_v0  ;;  %6485 = vmatprep.subr.msk.bf16.mxu0 %vm724_vm0, %v5384_v1  ;;  %v726_v2 = vsel %vm724_vm0, %v5157_v0, 0  ;;  %v6823_v3 = vsel %vm724_vm0, %v5384_v1, 0  ;;  %v221_v4 = vld [vmem:[%s8702_s1] sm:$0xf]  ;;  %v5449_v5 = vld [vmem:[%s8702_s1 + $0x14] sm:$0xf] }
  0x18   : > { %8720 = vst [vmem:[#allocation5_spill] sm:$0xff] %v6823_v3  ;;  %5918 = vmatpush3.bf16.msra.mxu1 %v726_v2  ;;  %6054 = vmatpush3.bf16.msra.mxu0 %v6823_v3  ;;  %s179_s30 = scalar_select %p178_p11, %s6724_s15, 1  ;;  %vm238_vm1 = vsmask.f32 3328  ;;  %vm239_vm2 = vsmask.f32 7440 }
  0x19   : > { %6482 = vmatprep.subr.msk.bf16.mxu1 %vm724_vm0, %v221_v4  ;;  %6487 = vmatprep.subr.msk.bf16.mxu0 %vm724_vm0, %v5449_v5  ;;  %vm675_vm3 = vcmask 64512   ;;  %v6851_v17 = vsel %vm724_vm0, %v221_v4, 0  ;;  %v6857_v26 = vld [vmem:[%s8702_s1 + $0x18] sm:$0xf]  ;;  %vm6864_vm4 = vmor %vm238_vm1, %vm239_vm2  ;;  %v6870_v37 = vsel %vm724_vm0, %v5449_v5, 0  ;;  %vm1229_vm5 = vcmask 1042432  }
  0x1a   : > { %s6491_s8 = smul.u32 216, %s179_s30  ;;  %v6874_v41 = vsel %vm724_vm0, %v6857_v26, 0  ;;  %vm1230_vm6 = vcmask 1046532   ;;  %vm5017_vm10 = vcmask 519168   ;;  %s5763_s21 = sshll.u32 %s6724_s15, 11 }
  0x1b   : > { %vm7090_vm7 = vmor %vm1229_vm5, %vm1230_vm6  ;;  %s8643_s28 = scalar_lea.hbm %s8704_s3, %s5763_s21  ;;  %s6734_s30 = smov [#allocation2]  }
  0x1c   : > { %s6838_s11 = scalar_lea.vmem %s8701_s0, %s6491_s8  ;;  %s6658_s4 = sshll.u32 %s6734_s30, 4  ;;  %s6659_s4 = int_to_ptr.vmem [resolvable:$false] %s6658_s4 }
  0x1d   : > { %v189_v6 = vld [vmem:[%s6838_s11] sm:$0xf]  ;;  %v190_v7 = vld [vmem:[%s6838_s11 + $0x4] sm:$0xf]  ;;  %v222_v8 = vld [vmem:[%s6838_s11 + $0x8] sm:$0x1] }
  0x1e   : > { %v242_v9 = vshrl.u32 %v189_v6, 16  ;;  %v245_v10 = vshll.u32 %v189_v6, 16  ;;  %v251_v11 = vshll.u32 %v190_v7, 16  ;;  %v255_v12 = vshrl.u32 %v190_v7, 16  ;;  %v5336_v13 = vld [vmem:[%s6838_s11 + $0xc] sm:$0xf] }
  0x1f   : > { %v261_v14 = vshll.u32 %v222_v8, 16  ;;  %v6845_v15 = vld [vmem:[%s6838_s11 + $0x10] sm:$0xf]  ;;  %v6848_v16 = vld [vmem:[%s6838_s11 + $0x14] sm:$0x1]  ;;  %v2049_v23 = vshrl.u32 %v5336_v13, 16 }
  0x20   : > { %v244_v18 = vrot.slane %v242_v9, 4  ;;  %v247_v19 = vrot.slane %v245_v10, 5  ;;  %v253_v20 = vrot.slane %v251_v11, 5  ;;  %v257_v21 = vrot.slane %v255_v12, 4  ;;  %v191_v31 = vld [vmem:[%s6838_s11 + $0xc] sm:$0xf] }
  0x21   : > { %v263_v22 = vrot.slane %v261_v14, 5  ;;  %v2052_v24 = vshll.u32 %v5336_v13, 16  ;;  %v2058_v25 = vshll.u32 %v6845_v15, 16  ;;  %v2062_v29 = vshrl.u32 %v6845_v15, 16  ;;  %v192_v36 = vld [vmem:[%s6838_s11 + $0x10] sm:$0xf] }
  0x22   : > { %v248_v27 = vor.u32 %v247_v19, %v244_v18  ;;  %v258_v28 = vor.u32 %v257_v21, %v253_v20  ;;  %v2068_v30 = vshll.u32 %v6848_v16, 16  ;;  %v2051_v33 = vrot.slane %v2049_v23, 4  ;;  %v223_v44 = vld [vmem:[%s6838_s11 + $0x14] sm:$0x1]  ;;  %v5339_v55 = vld [vmem:[%s6838_s11 + $0x18] sm:$0xf] }
  0x23   : > { %v2054_v34 = vrot.slane %v2052_v24, 5  ;;  %v2060_v35 = vrot.slane %v2058_v25, 5  ;;  %v2064_v40 = vrot.slane %v2062_v29, 4  ;;  %v266_v45 = vshrl.u32 %v191_v31, 16  ;;  %v6883_v60 = vld [vmem:[%s6838_s11 + $0x1c] sm:$0xf] }
  0x24   : > { %v249_v38 = vrot.slane %v248_v27, 4  ;;  %v259_v39 = vrot.slane %v258_v28, 4  ;;  %v2070_v43 = vrot.slane %v2068_v30, 5  ;;  %v269_v46 = vshll.u32 %v191_v31, 16  ;;  %v6891_v1 = vld [vmem:[%s6838_s11 + $0x20] sm:$0x1] }
  0x25   : > { %v2055_v42 = vor.u32 %v2054_v34, %v2051_v33  ;;  %v2065_v49 = vor.u32 %v2064_v40, %v2060_v35  ;;  %v275_v50 = vshll.u32 %v192_v36, 16  ;;  %v268_v53 = vrot.slane %v266_v45, 4  ;;  %v193_v18 = vld [vmem:[%s6838_s11 + $0x18] sm:$0xf]  ;;  %v194_v23 = vld [vmem:[%s6838_s11 + $0x1c] sm:$0xf] }
  0x26   : > { %v254_v47 = vsel %vm6864_vm4, %v249_v38, %v253_v20  ;;  %v264_v48 = vsel %vm6864_vm4, %v259_v39, %v263_v22  ;;  %v271_v54 = vrot.slane %v269_v46, 5  ;;  %v279_v58 = vshrl.u32 %v192_v36, 16  ;;  %v224_v31 = vld [vmem:[%s6838_s11 + $0x20] sm:$0x1]  ;;  %v5342_v40 = vld [vmem:[%s6838_s11 + $0x24] sm:$0xf] }
  0x27   : > { %v5158_v51 = vcombine.low %v254_v47, %v264_v48  ;;  %v2056_v52 = vrot.slane %v2055_v42, 4  ;;  %v2066_v56 = vrot.slane %v2065_v49, 4  ;;  %v277_v57 = vrot.slane %v275_v50, 5  ;;  %v6914_v46 = vld [vmem:[%s6838_s11 + $0x28] sm:$0xf]  ;;  %s6660_s5 = scalar_lea.vmem %s6659_s4, 4096 }
  0x28   : > { %v285_v59 = vshll.u32 %v223_v44, 16  ;;  %v2792_v62 = vrot.slane %v6845_v15, 5  ;;  %v2795_v63 = vrot.slane %v6848_v16, 5  ;;  %v272_v0 = vor.u32 %v271_v54, %v268_v53  ;;  %v6923_v54 = vld [vmem:[%s6838_s11 + $0x2c] sm:$0x1] }
  0x29   : > { %5919 = vmatprep.mubr.msk.bf16.mxu1 %vm675_vm3, %v5158_v51  ;;  %v2061_v61 = vsel %vm6864_vm4, %v2056_v52, %v2060_v35  ;;  %v2071_v2 = vsel %vm6864_vm4, %v2066_v56, %v2070_v43  ;;  %v281_v4 = vrot.slane %v279_v58, 4  ;;  %v2073_v6 = vshrl.u32 %v5339_v55, 16  ;;  %v5238_v51 = vld [vmem:[%s8702_s1 + $0x8] sm:$0xf]  ;;  %v7123_v16 = vld [vmem:[%s6838_s11 + $0x7c] sm:$0xf] }
  0x2a   : > { %v287_v5 = vrot.slane %v285_v59, 5  ;;  %v5385_v7 = vcombine.low %v2061_v61, %v2071_v2  ;;  %v273_v8 = vrot.slane %v272_v0, 4  ;;  %v2076_v9 = vshll.u32 %v5339_v55, 16  ;;  %v195_v0 = vld [vmem:[%s6838_s11 + $0x24] sm:$0xf] }
  0x2b   : > { %v2082_v10 = vshll.u32 %v6883_v60, 16  ;;  %v282_v11 = vor.u32 %v281_v4, %v277_v57  ;;  %v2075_v12 = vrot.slane %v2073_v6, 4  ;;  %v2086_v13 = vshrl.u32 %v6883_v60, 16 }
  0x2c   : > { %v2092_v14 = vshll.u32 %v6891_v1, 16  ;;  %6055 = vmatprep.mubr.msk.bf16.mxu0 %vm675_vm3, %v5385_v7  ;;  %v278_v19 = vsel %vm6864_vm4, %v273_v8, %v277_v57  ;;  %v2078_v20 = vrot.slane %v2076_v9, 5  ;;  %v2799_v22 = vrot.slane %v6883_v60, 5  ;;  %v196_v7 = vld [vmem:[%s6838_s11 + $0x28] sm:$0xf] }
  0x2d   : > { %v2084_v21 = vrot.slane %v2082_v10, 5  ;;  %v283_v24 = vrot.slane %v282_v11, 4  ;;  %v2088_v25 = vrot.slane %v2086_v13, 4  ;;  %v2802_v28 = vrot.slane %v6891_v1, 5  ;;  %v225_v13 = vld [vmem:[%s6838_s11 + $0x2c] sm:$0x1] }
  0x2e   : > { %v2094_v27 = vrot.slane %v2092_v14, 5  ;;  %v2079_v29 = vor.u32 %v2078_v20, %v2075_v12  ;;  %v6907_v30 = vrot.slane %v2799_v22, 4  ;;  %v290_v33 = vshrl.u32 %v193_v18, 16 }
  0x2f   : > { %v293_v34 = vshll.u32 %v193_v18, 16  ;;  %v288_v35 = vsel %vm6864_vm4, %v283_v24, %v287_v5  ;;  %v2089_v36 = vor.u32 %v2088_v25, %v2084_v21  ;;  %v299_v38 = vshll.u32 %v194_v23, 16  ;;  %v5345_v24 = vld [vmem:[%s6838_s11 + $0x30] sm:$0xf] }
  0x30   : > { %v303_v39 = vshrl.u32 %v194_v23, 16  ;;  %v5159_v42 = vcombine.low %v278_v19, %v288_v35  ;;  %v2080_v43 = vrot.slane %v2079_v29, 4  ;;  %v292_v44 = vrot.slane %v290_v33, 4  ;;  %v6943_v33 = vld [vmem:[%s6838_s11 + $0x34] sm:$0xf] }
  0x31   : > { %v295_v45 = vrot.slane %v293_v34, 5  ;;  %v2090_v47 = vrot.slane %v2089_v36, 4  ;;  %v301_v48 = vrot.slane %v299_v38, 5  ;;  %v309_v50 = vshll.u32 %v224_v31, 16 }
  0x32   : > { %v305_v49 = vrot.slane %v303_v39, 4  ;;  %5920 = vmatmul.mubr.msk.bf16.vlgmr.msra.gmra.mrb[0].mxu1 %vm675_vm3, %v5159_v42  ;;  %v2085_v52 = vsel %vm6864_vm4, %v2080_v43, %v2084_v21  ;;  %v2097_v55 = vshrl.u32 %v5342_v40, 16  ;;  %v2100_v56 = vshll.u32 %v5342_v40, 16  ;;  %v6951_v40 = vld [vmem:[%s6838_s11 + $0x38] sm:$0x1] }
  0x33   : > { %v296_v53 = vor.u32 %v295_v45, %v292_v44  ;;  %5952 = vmatpush3.bf16.msra.mxu1 %v6851_v17  ;;  %v2095_v57 = vsel %vm6864_vm4, %v2090_v47, %v2094_v27  ;;  %v311_v59 = vrot.slane %v309_v50, 5  ;;  %v2106_v61 = vshll.u32 %v6914_v46, 16 }
  0x34   : > { %v306_v58 = vor.u32 %v305_v49, %v301_v48  ;;  %v5386_v2 = vcombine.low %v2085_v52, %v2095_v57  ;;  %v2099_v5 = vrot.slane %v2097_v55, 4  ;;  %v2102_v6 = vrot.slane %v2100_v56, 5  ;;  %6483 = vmatprep.subr.msk.bf16.mxu1 %vm724_vm0, %v5238_v51  ;;  %v197_v52 = vld [vmem:[%s6838_s11 + $0x30] sm:$0xf] }
  0x35   : > { %v297_v4 = vrot.slane %v296_v53, 4  ;;  %v2108_v9 = vrot.slane %v2106_v61, 5  ;;  %v2110_v17 = vshrl.u32 %v6914_v46, 16  ;;  %v2116_v10 = vshll.u32 %v6923_v54, 16 }
  0x36   : > { %v307_v8 = vrot.slane %v306_v58, 4  ;;  %6056 = vmatmul.mubr.msk.bf16.vlgmr.msra.gmra.mrb[0].mxu0 %vm675_vm3, %v5386_v2  ;;  %v2103_v12 = vor.u32 %v2102_v6, %v2099_v5  ;;  %v314_v14 = vshrl.u32 %v195_v0, 16  ;;  %v317_v18 = vshll.u32 %v195_v0, 16  ;;  %v198_v58 = vld [vmem:[%s6838_s11 + $0x34] sm:$0xf] }
  0x37   : > { %v302_v11 = vsel %vm6864_vm4, %v297_v4, %v301_v48  ;;  %6088 = vmatpush3.bf16.msra.mxu0 %v6870_v37  ;;  %v2112_v20 = vrot.slane %v2110_v17, 4  ;;  %v2118_v21 = vrot.slane %v2116_v10, 5  ;;  %v323_v23 = vshll.u32 %v196_v7, 16  ;;  %v226_v4 = vld [vmem:[%s6838_s11 + $0x38] sm:$0x1] }
  0x38   : > { %v312_v19 = vsel %vm6864_vm4, %v307_v8, %v311_v59  ;;  %v2104_v27 = vrot.slane %v2103_v12, 4  ;;  %v316_v29 = vrot.slane %v314_v14, 4  ;;  %v319_v31 = vrot.slane %v317_v18, 5  ;;  %6488 = vmatprep.subr.msk.bf16.mxu0 %vm724_vm0, %v6857_v26  ;;  %v5348_v12 = vld [vmem:[%s6838_s11 + $0x3c] sm:$0xf] }
  0x39   : > { %v5160_v25 = vcombine.low %v302_v11, %v312_v19  ;;  %v2113_v34 = vor.u32 %v2112_v20, %v2108_v9  ;;  %v325_v35 = vrot.slane %v323_v23, 5  ;;  %v327_v37 = vshrl.u32 %v196_v7, 16  ;;  %v6968_v20 = vld [vmem:[%s6838_s11 + $0x40] sm:$0xf] }
  0x3a   : > { %v333_v36 = vshll.u32 %v225_v13, 16  ;;  %v2109_v38 = vsel %vm6864_vm4, %v2104_v27, %v2108_v9  ;;  %v320_v39 = vor.u32 %v319_v31, %v316_v29  ;;  %v2121_v42 = vshrl.u32 %v5345_v24, 16 }
  0x3b   : > { %5923 = vmatprep.mubr.msk.bf16.mxu1 %vm675_vm3, %v5160_v25  ;;  %v2124_v43 = vshll.u32 %v5345_v24, 16  ;;  %v2114_v44 = vrot.slane %v2113_v34, 4  ;;  %v329_v45 = vrot.slane %v327_v37, 4  ;;  %v2130_v26 = vshll.u32 %v6943_v33, 16  ;;  %v6973_v34 = vld [vmem:[%s6838_s11 + $0x44] sm:$0x1] }
  0x3c   : > { %v335_v47 = vrot.slane %v333_v36, 5  ;;  %v321_v48 = vrot.slane %v320_v39, 4  ;;  %v2123_v49 = vrot.slane %v2121_v42, 4  ;;  %v2134_v51 = vshrl.u32 %v6943_v33, 16  ;;  %v199_v42 = vld [vmem:[%s6838_s11 + $0x3c] sm:$0xf] }
  0x3d   : > { %v2126_v50 = vrot.slane %v2124_v43, 5  ;;  %v2119_v53 = vsel %vm6864_vm4, %v2114_v44, %v2118_v21  ;;  %v330_v55 = vor.u32 %v329_v45, %v325_v35  ;;  %v2132_v56 = vrot.slane %v2130_v26, 5  ;;  %v200_v26 = vld [vmem:[%s6838_s11 + $0x40] sm:$0xf] }
  0x3e   : > { %v2140_v57 = vshll.u32 %v6951_v40, 16  ;;  %v5387_v59 = vcombine.low %v2109_v38, %v2119_v53  ;;  %v326_v61 = vsel %vm6864_vm4, %v321_v48, %v325_v35  ;;  %v2136_v2 = vrot.slane %v2134_v51, 4 }
  0x3f   : > { %v2127_v0 = vor.u32 %v2126_v50, %v2123_v49  ;;  %v331_v5 = vrot.slane %v330_v55, 4  ;;  %v338_v7 = vshrl.u32 %v197_v52, 16  ;;  %v341_v8 = vshll.u32 %v197_v52, 16 }
  0x40   : > { %v2142_v6 = vrot.slane %v2140_v57, 5  ;;  %6059 = vmatprep.mubr.msk.bf16.mxu0 %vm675_vm3, %v5387_v59  ;;  %v2137_v17 = vor.u32 %v2136_v2, %v2132_v56  ;;  %v347_v10 = vshll.u32 %v198_v58, 16  ;;  %v351_v11 = vshrl.u32 %v198_v58, 16  ;;  %v5351_v2 = vld [vmem:[%s6838_s11 + $0x48] sm:$0xf] }
  0x41   : > { %v2128_v9 = vrot.slane %v2127_v0, 4  ;;  %v336_v13 = vsel %vm6864_vm4, %v331_v5, %v335_v47  ;;  %v340_v14 = vrot.slane %v338_v7, 4  ;;  %v343_v18 = vrot.slane %v341_v8, 5  ;;  %v6991_v8 = vld [vmem:[%s6838_s11 + $0x4c] sm:$0xf] }
  0x42   : > { %v357_v19 = vshll.u32 %v226_v4, 16  ;;  %v5161_v21 = vcombine.low %v326_v61, %v336_v13  ;;  %v2138_v24 = vrot.slane %v2137_v17, 4  ;;  %v349_v25 = vrot.slane %v347_v10, 5  ;;  %v227_v61 = vld [vmem:[%s6838_s11 + $0x44] sm:$0x1] }
  0x43   : > { %v2133_v23 = vsel %vm6864_vm4, %v2128_v9, %v2132_v56  ;;  %v344_v27 = vor.u32 %v343_v18, %v340_v14  ;;  %v353_v29 = vrot.slane %v351_v11, 4  ;;  %v2145_v35 = vshrl.u32 %v5348_v12, 16 }
  0x44   : > { %v359_v31 = vrot.slane %v357_v19, 5  ;;  %5924 = vmatmul.mubr.msk.bf16.gmra.mrb[4].mxu1 %vm675_vm3, %v5161_v21  ;;  %v2143_v37 = vsel %vm6864_vm4, %v2138_v24, %v2142_v6  ;;  %v2148_v36 = vshll.u32 %v5348_v12, 16  ;;  %v2154_v38 = vshll.u32 %v6968_v20, 16 }
  0x45   : > { %v2158_v39 = vshrl.u32 %v6968_v20, 16  ;;  %v5388_v43 = vcombine.low %v2133_v23, %v2143_v37  ;;  %v345_v44 = vrot.slane %v344_v27, 4  ;;  %v354_v45 = vor.u32 %v353_v29, %v349_v25  ;;  %v6999_v23 = vld [vmem:[%s6838_s11 + $0x50] sm:$0x1]  ;;  %v7003_v27 = vld [vmem:[%s6838_s11 + $0x48] sm:$0xf] }
  0x46   : > { %v2147_v47 = vrot.slane %v2145_v35, 4  ;;  %v2150_v48 = vrot.slane %v2148_v36, 5  ;;  %v2156_v49 = vrot.slane %v2154_v38, 5  ;;  %v2164_v51 = vshll.u32 %v6973_v34, 16  ;;  %v7006_v36 = vld [vmem:[%s6838_s11 + $0x4c] sm:$0xf] }
  0x47   : > { %v2160_v50 = vrot.slane %v2158_v39, 4  ;;  %6060 = vmatmul.mubr.msk.bf16.gmra.mrb[4].mxu0 %vm675_vm3, %v5388_v43  ;;  %v350_v52 = vsel %vm6864_vm4, %v345_v44, %v349_v25  ;;  %v355_v53 = vrot.slane %v354_v45, 4  ;;  %v362_v55 = vshrl.u32 %v199_v42, 16 }
  0x48   : > { %v365_v56 = vshll.u32 %v199_v42, 16  ;;  %v2151_v57 = vor.u32 %v2150_v48, %v2147_v47  ;;  %v2166_v59 = vrot.slane %v2164_v51, 5  ;;  %v371_v0 = vshll.u32 %v200_v26, 16 }
  0x49   : > { %v2161_v58 = vor.u32 %v2160_v50, %v2156_v49  ;;  %v360_v4 = vsel %vm6864_vm4, %v355_v53, %v359_v31  ;;  %v364_v5 = vrot.slane %v362_v55, 4  ;;  %v375_v7 = vshrl.u32 %v200_v26, 16  ;;  %v228_v26 = vld [vmem:[%s6838_s11 + $0x50] sm:$0x1]  ;;  %v5354_v53 = vld [vmem:[%s6838_s11 + $0x54] sm:$0xf] }
  0x4a   : > { %v367_v6 = vrot.slane %v365_v56, 5  ;;  %v5162_v9 = vcombine.low %v350_v52, %v360_v4  ;;  %v2152_v17 = vrot.slane %v2151_v57, 4  ;;  %v373_v11 = vrot.slane %v371_v0, 5  ;;  %v7022_v4 = vld [vmem:[%s6838_s11 + $0x58] sm:$0xf] }
  0x4b   : > { %v2162_v10 = vrot.slane %v2161_v58, 4  ;;  %v377_v13 = vrot.slane %v375_v7, 4  ;;  %v381_v14 = vshll.u32 %v227_v61, 16  ;;  %v2169_v18 = vshrl.u32 %v5351_v2, 16 }
  0x4c   : > { %v368_v12 = vor.u32 %v367_v6, %v364_v5  ;;  %5927 = vmatprep.mubr.msk.bf16.mxu1 %vm675_vm3, %v5162_v9  ;;  %v2157_v19 = vsel %vm6864_vm4, %v2152_v17, %v2156_v49  ;;  %v2172_v24 = vshll.u32 %v5351_v2, 16  ;;  %v2178_v25 = vshll.u32 %v6991_v8, 16 }
  0x4d   : > { %v2167_v21 = vsel %vm6864_vm4, %v2162_v10, %v2166_v59  ;;  %v378_v35 = vor.u32 %v377_v13, %v373_v11  ;;  %v383_v37 = vrot.slane %v381_v14, 5  ;;  %v2171_v38 = vrot.slane %v2169_v18, 4 }
  0x4e   : > { %v5389_v29 = vcombine.low %v2157_v19, %v2167_v21  ;;  %v369_v31 = vrot.slane %v368_v12, 4  ;;  %v2174_v39 = vrot.slane %v2172_v24, 5  ;;  %v2180_v42 = vrot.slane %v2178_v25, 5  ;;  %v7028_v12 = vld [vmem:[%s6838_s11 + $0x5c] sm:$0x1] }
  0x4f   : > { %v2182_v43 = vshrl.u32 %v6991_v8, 16  ;;  %v379_v45 = vrot.slane %v378_v35, 4  ;;  %v2188_v47 = vshll.u32 %v6999_v23, 16  ;;  %v386_v48 = vshrl.u32 %v7003_v27, 16  ;;  %v7032_v24 = vld [vmem:[%s6838_s11 + $0x54] sm:$0xf] }
  0x50   : > { %6063 = vmatprep.mubr.msk.bf16.mxu0 %vm675_vm3, %v5389_v29  ;;  %v374_v44 = vsel %vm6864_vm4, %v369_v31, %v373_v11  ;;  %v2175_v49 = vor.u32 %v2174_v39, %v2171_v38  ;;  %v389_v51 = vshll.u32 %v7003_v27, 16  ;;  %v395_v52 = vshll.u32 %v7006_v36, 16 }
  0x51   : > { %v2184_v50 = vrot.slane %v2182_v43, 4  ;;  %v384_v55 = vsel %vm6864_vm4, %v379_v45, %v383_v37  ;;  %v2190_v56 = vrot.slane %v2188_v47, 5  ;;  %v388_v57 = vrot.slane %v386_v48, 4  ;;  %v7038_v37 = vld [vmem:[%s6838_s11 + $0x58] sm:$0xf] }
  0x52   : > { %v399_v58 = vshrl.u32 %v7006_v36, 16  ;;  %v5163_v59 = vcombine.low %v374_v44, %v384_v55  ;;  %v2176_v61 = vrot.slane %v2175_v49, 4  ;;  %v391_v2 = vrot.slane %v389_v51, 5 }
  0x53   : > { %v2185_v0 = vor.u32 %v2184_v50, %v2180_v42  ;;  %v397_v5 = vrot.slane %v395_v52, 5  ;;  %v405_v7 = vshll.u32 %v228_v26, 16  ;;  %v2193_v9 = vshrl.u32 %v5354_v53, 16  ;;  %v229_v26 = vld [vmem:[%s6838_s11 + $0x5c] sm:$0x1] }
  0x54   : > { %v401_v6 = vrot.slane %v399_v58, 4  ;;  %5928 = vmatmul.mubr.msk.bf16.gmra.mrb[8].mxu1 %vm675_vm3, %v5163_v59  ;;  %v2181_v17 = vsel %vm6864_vm4, %v2176_v61, %v2180_v42  ;;  %v392_v11 = vor.u32 %v391_v2, %v388_v57  ;;  %v2196_v13 = vshll.u32 %v5354_v53, 16  ;;  %v5357_v53 = vld [vmem:[%s6838_s11 + $0x60] sm:$0xf]  ;;  %v7052_v59 = vld [vmem:[%s6838_s11 + $0x64] sm:$0xf] }
  0x55   : > { %v2186_v10 = vrot.slane %v2185_v0, 4  ;;  %v407_v18 = vrot.slane %v405_v7, 5  ;;  %v2195_v19 = vrot.slane %v2193_v9, 4  ;;  %v2202_v21 = vshll.u32 %v7022_v4, 16  ;;  %v7059_v9 = vld [vmem:[%s6838_s11 + $0x68] sm:$0x1] }
  0x56   : > { %v402_v14 = vor.u32 %v401_v6, %v397_v5  ;;  %v393_v29 = vrot.slane %v392_v11, 4  ;;  %v2198_v31 = vrot.slane %v2196_v13, 5  ;;  %v2206_v35 = vshrl.u32 %v7022_v4, 16 }
  0x57   : > { %v2191_v25 = vsel %vm6864_vm4, %v2186_v10, %v2190_v56  ;;  %v2204_v42 = vrot.slane %v2202_v21, 5  ;;  %v2212_v43 = vshll.u32 %v7028_v12, 16  ;;  %v410_v48 = vshrl.u32 %v7032_v24, 16 }
  0x58   : > { %v5390_v38 = vcombine.low %v2181_v17, %v2191_v25  ;;  %v403_v39 = vrot.slane %v402_v14, 4  ;;  %v398_v44 = vsel %vm6864_vm4, %v393_v29, %v397_v5  ;;  %v2199_v45 = vor.u32 %v2198_v31, %v2195_v19  ;;  %v7063_v19 = vld [vmem:[%s6838_s11 + $0x60] sm:$0xf] }
  0x59   : > { %v2208_v47 = vrot.slane %v2206_v35, 4  ;;  %v2214_v50 = vrot.slane %v2212_v43, 5  ;;  %v413_v51 = vshll.u32 %v7032_v24, 16  ;;  %v419_v52 = vshll.u32 %v7038_v37, 16  ;;  %v7069_v35 = vld [vmem:[%s6838_s11 + $0x64] sm:$0xf] }
  0x5a   : > { %6064 = vmatmul.mubr.msk.bf16.gmra.mrb[8].mxu0 %vm675_vm3, %v5390_v38  ;;  %v408_v49 = vsel %vm6864_vm4, %v403_v39, %v407_v18  ;;  %v2200_v56 = vrot.slane %v2199_v45, 4  ;;  %v412_v58 = vrot.slane %v410_v48, 4  ;;  %v423_v2 = vshrl.u32 %v7038_v37, 16 }
  0x5b   : > { %v5164_v55 = vcombine.low %v398_v44, %v408_v49  ;;  %v2209_v57 = vor.u32 %v2208_v47, %v2204_v42  ;;  %v415_v61 = vrot.slane %v413_v51, 5  ;;  %v421_v0 = vrot.slane %v419_v52, 5 }
  0x5c   : > { %v429_v5 = vshll.u32 %v229_v26, 16  ;;  %v2205_v6 = vsel %vm6864_vm4, %v2200_v56, %v2204_v42  ;;  %v2217_v17 = vshrl.u32 %v5357_v53, 16  ;;  %v2220_v10 = vshll.u32 %v5357_v53, 16 }
  0x5d   : > { %5931 = vmatprep.mubr.msk.bf16.mxu1 %vm675_vm3, %v5164_v55  ;;  %v2210_v7 = vrot.slane %v2209_v57, 4  ;;  %v416_v11 = vor.u32 %v415_v61, %v412_v58  ;;  %v425_v13 = vrot.slane %v423_v2, 4  ;;  %v2226_v18 = vshll.u32 %v7052_v59, 16  ;;  %v5417_v58 = vld [vmem:[%s6838_s11 + $0xc] sm:$0xe] }
  0x5e   : > { %v431_v14 = vrot.slane %v429_v5, 5  ;;  %v2219_v25 = vrot.slane %v2217_v17, 4  ;;  %v2222_v29 = vrot.slane %v2220_v10, 5  ;;  %v2230_v31 = vshrl.u32 %v7052_v59, 16 }
  0x5f   : > { %v2215_v21 = vsel %vm6864_vm4, %v2210_v7, %v2214_v50  ;;  %v417_v39 = vrot.slane %v416_v11, 4  ;;  %v426_v42 = vor.u32 %v425_v13, %v421_v0  ;;  %v2228_v43 = vrot.slane %v2226_v18, 5  ;;  %v230_v50 = vld [vmem:[%s6838_s11 + $0x68] sm:$0x1] }
  0x60   : > { %v5391_v38 = vcombine.low %v2205_v6, %v2215_v21  ;;  %v2223_v44 = vor.u32 %v2222_v29, %v2219_v25  ;;  %v2232_v45 = vrot.slane %v2230_v31, 4  ;;  %v2236_v47 = vshll.u32 %v7059_v9, 16  ;;  %v7097_v29 = vld [vmem:[%s6838_s11 + $0x70] sm:$0xf] }
  0x61   : > { %v434_v26 = vshrl.u32 %v7063_v19, 16  ;;  %v422_v48 = vsel %vm6864_vm4, %v417_v39, %v421_v0  ;;  %v427_v49 = vrot.slane %v426_v42, 4  ;;  %v437_v51 = vshll.u32 %v7063_v19, 16  ;;  %v7084_v0 = vld [vmem:[%s6838_s11 + $0x6c] sm:$0xf] }
  0x62   : > { %6067 = vmatprep.mubr.msk.bf16.mxu0 %vm675_vm3, %v5391_v38  ;;  %v443_v52 = vshll.u32 %v7069_v35, 16  ;;  %v2224_v53 = vrot.slane %v2223_v44, 4  ;;  %v2233_v55 = vor.u32 %v2232_v45, %v2228_v43  ;;  %v2238_v56 = vrot.slane %v2236_v47, 5 }
  0x63   : > { %v436_v57 = vrot.slane %v434_v26, 4  ;;  %v432_v61 = vsel %vm6864_vm4, %v427_v49, %v431_v14  ;;  %v439_v2 = vrot.slane %v437_v51, 5  ;;  %v447_v6 = vshrl.u32 %v7069_v35, 16  ;;  %v231_v26 = vld [vmem:[%s6838_s11 + $0x74] sm:$0x1] }
  0x64   : > { %v445_v5 = vrot.slane %v443_v52, 5  ;;  %v5165_v7 = vcombine.low %v422_v48, %v432_v61  ;;  %v2229_v17 = vsel %vm6864_vm4, %v2224_v53, %v2228_v43  ;;  %v2234_v10 = vrot.slane %v2233_v55, 4  ;;  %v5418_v48 = vld [vmem:[%s6838_s11 + $0x18] sm:$0xe] }
  0x65   : > { %v453_v11 = vshll.u32 %v230_v50, 16  ;;  %v440_v14 = vor.u32 %v439_v2, %v436_v57  ;;  %v449_v18 = vrot.slane %v447_v6, 4  ;;  %v5433_v21 = vrot.slane %v5417_v58, 9  ;;  %v7116_v53 = vld [vmem:[%s6838_s11 + $0x78] sm:$0xf] }
  0x66   : > { %v2794_v25 = vrot.slane %v2792_v62, 4  ;;  %5932 = vmatmul.mubr.msk.bf16.gmra.mrb[12].mxu1 %vm675_vm3, %v5165_v7  ;;  %v2239_v31 = vsel %vm6864_vm4, %v2234_v10, %v2238_v56  ;;  %v458_v39 = vshrl.u32 %v7084_v0, 16  ;;  %v461_v42 = vshll.u32 %v7084_v0, 16  ;;  %v232_v57 = vld [vmem:[%s6838_s11 + $0x80] sm:$0x1] }
  0x67   : > { %v455_v38 = vrot.slane %v453_v11, 5  ;;  %v5392_v43 = vcombine.low %v2229_v17, %v2239_v31  ;;  %v441_v44 = vrot.slane %v440_v14, 4  ;;  %v450_v45 = vor.u32 %v449_v18, %v445_v5  ;;  %v5419_v10 = vld [vmem:[%s6838_s11 + $0x24] sm:$0xe] }
  0x68   : > { %v2793_v47 = vsel %vm7090_vm7, %v5433_v21, %v2792_v62  ;;  %v2796_v49 = vsel %vm7090_vm7, %v2794_v25, %v2795_v63  ;;  %v460_v50 = vrot.slane %v458_v39, 4  ;;  %v463_v51 = vrot.slane %v461_v42, 5  ;;  %v7142_v39 = vld [vmem:[%s6838_s11 + $0x84] sm:$0xf] }
  0x69   : > { %v467_v52 = vshll.u32 %v7097_v29, 16  ;;  %6068 = vmatmul.mubr.msk.bf16.gmra.mrb[12].mxu0 %vm675_vm3, %v5392_v43  ;;  %v446_v15 = vsel %vm6864_vm4, %v441_v44, %v445_v5  ;;  %v451_v62 = vrot.slane %v450_v45, 4  ;;  %v5450_v55 = vcombine.low %v2793_v47, %v2796_v49  ;;  %v7150_v43 = vld [vmem:[%s6838_s11 + $0x88] sm:$0xf] }
  0x6a   : > { %v471_v56 = vshrl.u32 %v7097_v29, 16  ;;  %v464_v63 = vor.u32 %v463_v51, %v460_v50  ;;  %v477_v61 = vshll.u32 %v231_v26, 16  ;;  %v5434_v2 = vrot.slane %v5418_v48, 9 }
  0x6b   : > { %v469_v58 = vrot.slane %v467_v52, 5  ;;  %v456_v6 = vsel %vm6864_vm4, %v451_v62, %v455_v38  ;;  %6089 = vmatprep.mubr.msk.bf16.mxu0 %vm675_vm3, %v5450_v55  ;;  %v2803_v5 = vsel %vm7090_vm7, %v6907_v30, %v2802_v28  ;;  %v482_v17 = vshrl.u32 %v7116_v53, 16  ;;  %v233_v52 = vld [vmem:[%s6838_s11 + $0x8c] sm:$0x1] }
  0x6c   : > { %v473_v7 = vrot.slane %v471_v56, 4  ;;  %v5166_v11 = vcombine.low %v446_v15, %v456_v6  ;;  %v465_v14 = vrot.slane %v464_v63, 4  ;;  %v479_v18 = vrot.slane %v477_v61, 5 }
  0x6d   : > { %v2800_v21 = vsel %vm7090_vm7, %v5434_v2, %v2799_v22  ;;  %v484_v38 = vrot.slane %v482_v17, 4  ;;  %v485_v1 = vshll.u32 %v7116_v53, 16  ;;  %v491_v30 = vshll.u32 %v7123_v16, 16  ;;  %v7155_v22 = vld [vmem:[%s8702_s1 + $0x1c] sm:$0xf] }
  0x6e   : > { %v474_v25 = vor.u32 %v473_v7, %v469_v58  ;;  %v5451_v31 = vcombine.low %v2800_v21, %v2803_v5  ;;  %5935 = vmatprep.mubr.msk.bf16.mxu1 %vm675_vm3, %v5166_v11  ;;  %v470_v28 = vsel %vm6864_vm4, %v465_v14, %v469_v58  ;;  %v495_v60 = vshrl.u32 %v7123_v16, 16  ;;  %v7174_v5 = vld [vmem:[%s6838_s11 + $0x90] sm:$0xf] }
  0x6f   : > { %v501_v42 = vshll.u32 %v232_v57, 16  ;;  %v487_v45 = vrot.slane %v485_v1, 5  ;;  %v5435_v47 = vrot.slane %v5419_v10, 9  ;;  %v2806_v26 = vrot.slane %v6914_v46, 5  ;;  %v5420_v57 = vld [vmem:[%s6838_s11 + $0x30] sm:$0xe] }
  0x70   : > { %v475_v44 = vrot.slane %v474_v25, 4  ;;  %v493_v48 = vrot.slane %v491_v30, 5  ;;  %v497_v49 = vrot.slane %v495_v60, 4  ;;  %v2809_v51 = vrot.slane %v6923_v54, 5  ;;  %v7186_v30 = vld [vmem:[%s6838_s11 + $0x94] sm:$0xf] }
  0x71   : > { %v503_v50 = vrot.slane %v501_v42, 5  ;;  %6090 = vmatmul.mubr.msk.bf16.vlgmr.msra.gmra.mrb[0].mxu0 %vm675_vm3, %v5451_v31  ;;  %v488_v62 = vor.u32 %v487_v45, %v484_v38  ;;  %v2807_v55 = vsel %vm7090_vm7, %v5435_v47, %v2806_v26  ;;  %v2808_v56 = vrot.slane %v2806_v26, 4  ;;  %v234_v60 = vld [vmem:[%s6838_s11 + $0x98] sm:$0x1]  ;;  %v5421_v26 = vld [vmem:[%s6838_s11 + $0x3c] sm:$0xe] }
  0x72   : > { %v480_v15 = vsel %vm6864_vm4, %v475_v44, %v479_v18  ;;  %6122 = vmatpush3.bf16.msra.mxu0 %v6874_v41  ;;  %v498_v46 = vor.u32 %v497_v49, %v493_v48  ;;  %v506_v58 = vshrl.u32 %v7142_v39, 16  ;;  %v509_v54 = vshll.u32 %v7142_v39, 16 }
  0x73   : > { %v5167_v63 = vcombine.low %v470_v28, %v480_v15  ;;  %v489_v61 = vrot.slane %v488_v62, 4  ;;  %v2810_v2 = vsel %vm7090_vm7, %v2808_v56, %v2809_v51  ;;  %v515_v6 = vshll.u32 %v7150_v43, 16  ;;  %6489 = vmatprep.subr.msk.bf16.mxu0 %vm724_vm0, %v7155_v22 }
  0x74   : > { %v519_v7 = vshrl.u32 %v7150_v43, 16  ;;  %v499_v41 = vrot.slane %v498_v46, 4  ;;  %v5452_v17 = vcombine.low %v2807_v55, %v2810_v2  ;;  %v508_v10 = vrot.slane %v506_v58, 4  ;;  %v7206_v46 = vld [vmem:[%s6838_s11 + $0xa0] sm:$0xf] }
  0x75   : > { %5936 = vmatmul.mubr.msk.bf16.gmra.mrb[16].mxu1 %vm675_vm3, %v5167_v63  ;;  %v511_v11 = vrot.slane %v509_v54, 5  ;;  %v494_v14 = vsel %vm6864_vm4, %v489_v61, %v493_v48  ;;  %v517_v18 = vrot.slane %v515_v6, 5  ;;  %v525_v25 = vshll.u32 %v233_v52, 16  ;;  %v7195_v52 = vld [vmem:[%s6838_s11 + $0x9c] sm:$0xf] }
  0x76   : > { %v521_v21 = vrot.slane %v519_v7, 4  ;;  %v504_v31 = vsel %vm6864_vm4, %v499_v41, %v503_v50  ;;  %6093 = vmatprep.mubr.msk.bf16.mxu0 %vm675_vm3, %v5452_v17  ;;  %v5436_v1 = vrot.slane %v5420_v57, 9  ;;  %v2813_v28 = vrot.slane %v6943_v33, 5 }
  0x77   : > { %v512_v38 = vor.u32 %v511_v11, %v508_v10  ;;  %v5168_v42 = vcombine.low %v494_v14, %v504_v31  ;;  %v527_v45 = vrot.slane %v525_v25, 5  ;;  %v2816_v47 = vrot.slane %v6951_v40, 5  ;;  %v235_v10 = vld [vmem:[%s6838_s11 + $0xa4] sm:$0x1]  ;;  %v5422_v11 = vld [vmem:[%s6838_s11 + $0x48] sm:$0xe] }
  0x78   : > { %v522_v44 = vor.u32 %v521_v21, %v517_v18  ;;  %v2814_v49 = vsel %vm7090_vm7, %v5436_v1, %v2813_v28  ;;  %v2815_v50 = vrot.slane %v2813_v28, 4  ;;  %v530_v51 = vshrl.u32 %v7174_v5, 16 }
  0x79   : > { %v513_v48 = vrot.slane %v512_v38, 4  ;;  %5939 = vmatprep.mubr.msk.bf16.mxu1 %vm675_vm3, %v5168_v42  ;;  %v533_v15 = vshll.u32 %v7174_v5, 16  ;;  %v539_v62 = vshll.u32 %v7186_v30, 16  ;;  %v543_v40 = vshrl.u32 %v7186_v30, 16 }
  0x7a   : > { %v523_v33 = vrot.slane %v522_v44, 4  ;;  %v2817_v56 = vsel %vm7090_vm7, %v2815_v50, %v2816_v47  ;;  %v532_v57 = vrot.slane %v530_v51, 4  ;;  %v549_v63 = vshll.u32 %v234_v60, 16 }
  0x7b   : > { %v518_v55 = vsel %vm6864_vm4, %v513_v48, %v517_v18  ;;  %v5453_v54 = vcombine.low %v2814_v49, %v2817_v56  ;;  %v535_v61 = vrot.slane %v533_v15, 5  ;;  %v541_v2 = vrot.slane %v539_v62, 5  ;;  %v7232_v56 = vld [vmem:[%s6838_s11 + $0xac] sm:$0xf] }
  0x7c   : > { %v528_v58 = vsel %vm6864_vm4, %v523_v33, %v527_v45  ;;  %v545_v7 = vrot.slane %v543_v40, 4  ;;  %v551_v41 = vrot.slane %v549_v63, 5  ;;  %v5437_v17 = vrot.slane %v5421_v26, 9  ;;  %v7227_v33 = vld [vmem:[%s6838_s11 + $0xa8] sm:$0xf] }
  0x7d   : > { %v5169_v6 = vcombine.low %v518_v55, %v528_v58  ;;  %6094 = vmatmul.mubr.msk.bf16.gmra.mrb[4].mxu0 %vm675_vm3, %v5453_v54  ;;  %v536_v14 = vor.u32 %v535_v61, %v532_v57  ;;  %v2820_v18 = vrot.slane %v6968_v20, 5  ;;  %v2823_v21 = vrot.slane %v6973_v34, 5  ;;  %v236_v61 = vld [vmem:[%s6838_s11 + $0xb0] sm:$0x1] }
  0x7e   : > { %v554_v25 = vshrl.u32 %v7195_v52, 16  ;;  %v546_v31 = vor.u32 %v545_v7, %v541_v2  ;;  %v557_v38 = vshll.u32 %v7195_v52, 16  ;;  %v563_v1 = vshll.u32 %v7206_v46, 16 }
  0x7f   : > { %5940 = vmatmul.mubr.msk.bf16.gmra.mrb[20].mxu1 %vm675_vm3, %v5169_v6  ;;  %v567_v28 = vshrl.u32 %v7206_v46, 16  ;;  %v537_v60 = vrot.slane %v536_v14, 4  ;;  %v2821_v42 = vsel %vm7090_vm7, %v5437_v17, %v2820_v18  ;;  %v2822_v20 = vrot.slane %v2820_v18, 4  ;;  %v7247_v14 = vld [vmem:[%s6838_s11 + $0xb4] sm:$0xf] }
  0x80   : > { %v556_v44 = vrot.slane %v554_v25, 4  ;;  %v547_v34 = vrot.slane %v546_v31, 4  ;;  %v559_v45 = vrot.slane %v557_v38, 5  ;;  %v565_v47 = vrot.slane %v563_v1, 5 }
  0x81   : > { %v569_v26 = vrot.slane %v567_v28, 4  ;;  %v542_v48 = vsel %vm6864_vm4, %v537_v60, %v541_v2  ;;  %v2824_v49 = vsel %vm7090_vm7, %v2822_v20, %v2823_v21  ;;  %v573_v50 = vshll.u32 %v235_v10, 16  ;;  %v5423_v2 = vld [vmem:[%s6838_s11 + $0x54] sm:$0xe] }
  0x82   : > { %v5438_v51 = vrot.slane %v5422_v11, 9  ;;  %v552_v15 = vsel %vm6864_vm4, %v547_v34, %v551_v41  ;;  %v5454_v62 = vcombine.low %v2821_v42, %v2824_v49  ;;  %v560_v40 = vor.u32 %v559_v45, %v556_v44  ;;  %v7256_v42 = vld [vmem:[%s6838_s11 + $0xb8] sm:$0xf]  ;;  %v237_v49 = vld [vmem:[%s6838_s11 + $0xbc] sm:$0x1] }
  0x83   : > { %v570_v55 = vor.u32 %v569_v26, %v565_v47  ;;  %v5170_v57 = vcombine.low %v542_v48, %v552_v15  ;;  %v575_v63 = vrot.slane %v573_v50, 5  ;;  %v2827_v58 = vrot.slane %v6991_v8, 5 }
  0x84   : > { %v2830_v54 = vrot.slane %v6999_v23, 5  ;;  %6097 = vmatprep.mubr.msk.bf16.mxu0 %vm675_vm3, %v5454_v62  ;;  %v561_v6 = vrot.slane %v560_v40, 4  ;;  %v578_v41 = vshrl.u32 %v7227_v33, 16  ;;  %v581_v17 = vshll.u32 %v7227_v33, 16 }
  0x85   : > { %v571_v7 = vrot.slane %v570_v55, 4  ;;  %5943 = vmatprep.mubr.msk.bf16.mxu1 %vm675_vm3, %v5170_v57  ;;  %v2828_v10 = vsel %vm7090_vm7, %v5438_v51, %v2827_v58  ;;  %v2829_v11 = vrot.slane %v2827_v58, 4  ;;  %v587_v8 = vshll.u32 %v7232_v56, 16  ;;  %v5424_v55 = vld [vmem:[%s6838_s11 + $0x60] sm:$0xe] }
  0x86   : > { %v591_v23 = vshrl.u32 %v7232_v56, 16  ;;  %v566_v18 = vsel %vm6864_vm4, %v561_v6, %v565_v47  ;;  %v580_v25 = vrot.slane %v578_v41, 4  ;;  %v583_v31 = vrot.slane %v581_v17, 5  ;;  %v5425_v6 = vld [vmem:[%s6838_s11 + $0x6c] sm:$0xe] }
  0x87   : > { %v576_v21 = vsel %vm6864_vm4, %v571_v7, %v575_v63  ;;  %v2831_v1 = vsel %vm7090_vm7, %v2829_v11, %v2830_v54  ;;  %v589_v28 = vrot.slane %v587_v8, 5  ;;  %v597_v34 = vshll.u32 %v236_v61, 16  ;;  %v5361_v11 = vld [vmem:[%s6838_s11 + $0x70] sm:$0xf]  ;;  %v5362_v8 = vld [vmem:[%s6838_s11 + $0x74] sm:$0x1] }
  0x88   : > { %v5171_v38 = vcombine.low %v566_v18, %v576_v21  ;;  %v593_v60 = vrot.slane %v591_v23, 4  ;;  %v5455_v20 = vcombine.low %v2828_v10, %v2831_v1  ;;  %v584_v44 = vor.u32 %v583_v31, %v580_v25 }
  0x89   : > { %v5439_v45 = vrot.slane %v5423_v2, 9  ;;  %v2834_v26 = vrot.slane %v7022_v4, 5  ;;  %v2837_v48 = vrot.slane %v7028_v12, 5  ;;  %v602_v50 = vshrl.u32 %v7247_v14, 16 }
  0x8a   : > { %5944 = vmatmul.mubr.msk.bf16.gmra.mrb[24].mxu1 %vm675_vm3, %v5171_v38  ;;  %v594_v47 = vor.u32 %v593_v60, %v589_v28  ;;  %6098 = vmatmul.mubr.msk.bf16.gmra.mrb[8].mxu0 %vm675_vm3, %v5455_v20  ;;  %v585_v51 = vrot.slane %v584_v44, 4  ;;  %v599_v15 = vrot.slane %v597_v34, 5  ;;  %v605_v62 = vshll.u32 %v7247_v14, 16 }
  0x8b   : > { %v611_v40 = vshll.u32 %v7256_v42, 16  ;;  %v2835_v4 = vsel %vm7090_vm7, %v5439_v45, %v2834_v26  ;;  %v2836_v12 = vrot.slane %v2834_v26, 4  ;;  %v604_v63 = vrot.slane %v602_v50, 4 }
  0x8c   : > { %v595_v57 = vrot.slane %v594_v47, 4  ;;  %v590_v58 = vsel %vm6864_vm4, %v585_v51, %v589_v28  ;;  %v607_v54 = vrot.slane %v605_v62, 5  ;;  %v615_v2 = vshrl.u32 %v7256_v42, 16  ;;  %v5426_v47 = vld [vmem:[%s6838_s11 + $0x78] sm:$0xe] }
  0x8d   : > { %v613_v61 = vrot.slane %v611_v40, 5  ;;  %v2838_v41 = vsel %vm7090_vm7, %v2836_v12, %v2837_v48  ;;  %v621_v17 = vshll.u32 %v237_v49, 16  ;;  %v5440_v10 = vrot.slane %v5424_v55, 9  ;;  %v6597_v51 = vld [vmem:[%s6838_s11] sm:$0xf] }
  0x8e   : > { %v600_v7 = vsel %vm6864_vm4, %v595_v57, %v599_v15  ;;  %v5456_v18 = vcombine.low %v2835_v4, %v2838_v41  ;;  %v608_v21 = vor.u32 %v607_v54, %v604_v63  ;;  %v617_v25 = vrot.slane %v615_v2, 4  ;;  %v7294_v15 = vld [vmem:[%s6838_s11 + $0x4] sm:$0xf]  ;;  %v7298_v40 = vld [vmem:[%s6838_s11 + $0x7c] sm:$0xf] }
  0x8f   : > { %v5172_v23 = vcombine.low %v590_v58, %v600_v7  ;;  %v623_v31 = vrot.slane %v621_v17, 5  ;;  %v2841_v38 = vrot.slane %v7052_v59, 5  ;;  %v2844_v1 = vrot.slane %v7059_v9, 5  ;;  %v7301_v55 = vld [vmem:[%s6838_s11 + $0x80] sm:$0x1] }
  0x90   : > { %v5441_v28 = vrot.slane %v5425_v6, 9  ;;  %6101 = vmatprep.mubr.msk.bf16.mxu0 %vm675_vm3, %v5456_v18  ;;  %v609_v60 = vrot.slane %v608_v21, 4  ;;  %v618_v20 = vor.u32 %v617_v25, %v613_v61  ;;  %v2848_v44 = vrot.slane %v5361_v11, 5  ;;  %v5367_v57 = vld [vmem:[%s6838_s11 + $0x88] sm:$0xf] }
  0x91   : > { %5947 = vmatprep.mubr.msk.bf16.mxu1 %vm675_vm3, %v5172_v23  ;;  %v2851_v34 = vrot.slane %v5362_v8, 5  ;;  %v2842_v45 = vsel %vm7090_vm7, %v5440_v10, %v2841_v38  ;;  %v2843_v59 = vrot.slane %v2841_v38, 4  ;;  %v5190_v62 = vcombine.low %v6597_v51, %v7294_v15  ;;  %v5368_v54 = vld [vmem:[%s6838_s11 + $0x8c] sm:$0x1]  ;;  %v5370_v17 = vld [vmem:[%s6838_s11 + $0x94] sm:$0xf] }
  0x92   : > { %v614_v9 = vsel %vm6864_vm4, %v609_v60, %v613_v61  ;;  %v619_v26 = vrot.slane %v618_v20, 4  ;;  %v2849_v48 = vsel %vm7090_vm7, %v5441_v28, %v2848_v44  ;;  %v2850_v49 = vrot.slane %v2848_v44, 4  ;;  %v5427_v61 = vld [vmem:[%s6838_s11 + $0x84] sm:$0xe]  ;;  %v5428_v23 = vld [vmem:[%s6838_s11 + $0x90] sm:$0xe] }
  0x93   : > { %v2845_v50 = vsel %vm7090_vm7, %v2843_v59, %v2844_v1  ;;  %v5442_v58 = vrot.slane %v5426_v47, 9  ;;  %v2855_v7 = vrot.slane %v7298_v40, 5  ;;  %v2858_v41 = vrot.slane %v7301_v55, 5  ;;  %v5371_v25 = vld [vmem:[%s6838_s11 + $0x98] sm:$0x1] }
  0x94   : > { %v624_v4 = vsel %vm6864_vm4, %v619_v26, %v623_v31  ;;  %v5457_v12 = vcombine.low %v2842_v45, %v2845_v50  ;;  %v2852_v63 = vsel %vm7090_vm7, %v2850_v49, %v2851_v34  ;;  %v5443_v10 = vrot.slane %v5427_v61, 9  ;;  %v5373_v31 = vld [vmem:[%s6838_s11 + $0xa0] sm:$0xf]  ;;  %v5374_v60 = vld [vmem:[%s6838_s11 + $0xa4] sm:$0x1] }
  0x95   : > { %v5173_v2 = vcombine.low %v614_v9, %v624_v4  ;;  %v5458_v6 = vcombine.low %v2849_v48, %v2852_v63  ;;  %v2862_v11 = vrot.slane %v5367_v57, 5  ;;  %v2865_v8 = vrot.slane %v5368_v54, 5  ;;  %v5429_v20 = vld [vmem:[%s6838_s11 + $0x9c] sm:$0xe]  ;;  %v6599_v44 = vld [vmem:[%s6838_s11 + $0xc] sm:$0xf] }
  0x96   : > { %6102 = vmatmul.mubr.msk.bf16.gmra.mrb[12].mxu0 %vm675_vm3, %v5457_v12  ;;  %v2856_v18 = vsel %vm7090_vm7, %v5442_v58, %v2855_v7  ;;  %v2857_v21 = vrot.slane %v2855_v7, 4  ;;  %v2869_v28 = vrot.slane %v5370_v17, 5  ;;  %v7328_v34 = vld [vmem:[%s6838_s11 + $0x10] sm:$0xf]  ;;  %v6601_v47 = vld [vmem:[%s6838_s11 + $0x18] sm:$0xf] }
  0x97   : > { %5948 = vmatmul.mubr.msk.bf16.gmra.mrb[28].mxu1 %vm675_vm3, %v5173_v2  ;;  %6105 = vmatprep.mubr.msk.bf16.mxu0 %vm675_vm3, %v5458_v6  ;;  %v2863_v38 = vsel %vm7090_vm7, %v5443_v10, %v2862_v11  ;;  %v2864_v1 = vrot.slane %v2862_v11, 4  ;;  %v5191_v45 = vcombine.low %v6599_v44, %v7328_v34  ;;  %v7335_v9 = vld [vmem:[%s6838_s11 + $0x1c] sm:$0xf]  ;;  %v5444_v48 = vrot.slane %v5428_v23, 9  ;;  %v5376_v57 = vld [vmem:[%s6838_s11 + $0xac] sm:$0xf] }
  0x98   : > { %5953 = vmatprep.mubr.msk.bf16.mxu1 %vm675_vm3, %v5190_v62  ;;  %v2859_v59 = vsel %vm7090_vm7, %v2857_v21, %v2858_v41  ;;  %v5192_v26 = vcombine.low %v6601_v47, %v7335_v9  ;;  %v2871_v51 = vrot.slane %v2869_v28, 4  ;;  %v2872_v62 = vrot.slane %v5371_v25, 5  ;;  %v6603_v54 = vld [vmem:[%s8702_s1 + $0x8] sm:$0xf]  ;;  %v5379_v2 = vld [vmem:[%s6838_s11 + $0xb8] sm:$0xf] }
  0x99   : > { %v5459_v49 = vcombine.low %v2856_v18, %v2859_v59  ;;  %v2866_v50 = vsel %vm7090_vm7, %v2864_v1, %v2865_v8  ;;  %v5445_v12 = vrot.slane %v5429_v20, 9  ;;  %v2876_v63 = vrot.slane %v5373_v31, 5  ;;  %v7350_v7 = vld [vmem:[%s8702_s1 + $0xc] sm:$0xf]  ;;  %v5377_v10 = vld [vmem:[%s6838_s11 + $0xb0] sm:$0x1] }
  0x9a   : > { %v5460_v4 = vcombine.low %v2863_v38, %v2866_v50  ;;  %v2879_v58 = vrot.slane %v5374_v60, 5  ;;  %v1443_v61 = vsel %vm724_vm0, %v6603_v54, 0  ;;  %v2870_v41 = vsel %vm7090_vm7, %v5444_v48, %v2869_v28  ;;  %v5430_v11 = vld [vmem:[%s6838_s11 + $0xa8] sm:$0xe]  ;;  %v5380_v25 = vld [vmem:[%s6838_s11 + $0xbc] sm:$0x1] }
  0x9b   : > { %v2878_v6 = vrot.slane %v2876_v63, 4  ;;  %v2873_v17 = vsel %vm7090_vm7, %v2871_v51, %v2872_v62  ;;  %v2883_v8 = vrot.slane %v5376_v57, 5  ;;  %v2877_v23 = vsel %vm7090_vm7, %v5445_v12, %v2876_v63  ;;  %v5431_v31 = vld [vmem:[%s6838_s11 + $0xb4] sm:$0xe]  ;;  %v6604_v38 = vld [vmem:[%s6838_s11 + $0x24] sm:$0xf] }
  0x9c   : > { %v2890_v21 = vrot.slane %v5379_v2, 5  ;;  %v7371_v1 = vld [vmem:[%s6838_s11 + $0x28] sm:$0xf]  ;;  %v5461_v60 = vcombine.low %v2870_v41, %v2873_v17  ;;  %v5446_v44 = vrot.slane %v5430_v11, 9  ;;  %v2886_v59 = vrot.slane %v5377_v10, 5 }
  0x9d   : > { %v2880_v18 = vsel %vm7090_vm7, %v2878_v6, %v2879_v58  ;;  %v5193_v28 = vcombine.low %v6604_v38, %v7371_v1  ;;  %v6606_v47 = vld [vmem:[%s6838_s11 + $0x30] sm:$0xf]  ;;  %v2893_v51 = vrot.slane %v5380_v25, 5  ;;  %v5382_v62 = vld [vmem:[%s6838_s11 + $0xc4] sm:$0xf]  ;;  %v2278_v25 = vshrl.u32 %v7298_v40, 16 }
  0x9e   : > { %6106 = vmatmul.mubr.msk.bf16.gmra.mrb[16].mxu0 %vm675_vm3, %v5459_v49  ;;  %v5462_v20 = vcombine.low %v2877_v23, %v2880_v18  ;;  %v5447_v49 = vrot.slane %v5431_v31, 9  ;;  %v2892_v50 = vrot.slane %v2890_v21, 4  ;;  %v2884_v57 = vsel %vm7090_vm7, %v5446_v44, %v2883_v8  ;;  %v5432_v12 = vld [vmem:[%s6838_s11 + $0xc0] sm:$0xe]  ;;  %v6608_v41 = vld [vmem:[%s6838_s11 + $0x3c] sm:$0xf] }
  0x9f   : > { %5954 = vmatmul.mubr.msk.bf16.vlgmr.msra.gmra.mrb[0].mxu1 %vm675_vm3, %v5191_v45  ;;  %6109 = vmatprep.mubr.msk.bf16.mxu0 %vm675_vm3, %v5460_v4  ;;  %v2885_v45 = vrot.slane %v2883_v8, 4  ;;  %v2897_v63 = vrot.slane %v5382_v62, 5  ;;  %v5448_v6 = vrot.slane %v5432_v12, 9  ;;  %v7396_v17 = vld [vmem:[%s6838_s11 + $0x40] sm:$0xf]  ;;  %v5196_v18 = vcombine.low %v7003_v27, %v7006_v36  ;;  %v6560_v62 = vld [vmem:[%s6838_s11 + $0x24] sm:$0xff]  }
  0xa0   : > { %5986 = vmatpush3.bf16.msra.mxu1 %v1443_v61  ;;  %5957 = vmatprep.mubr.msk.bf16.mxu1 %vm675_vm3, %v5192_v26  ;;  %v7376_v26 = vld [vmem:[%s6838_s11 + $0x34] sm:$0xf]  ;;  %v2891_v58 = vsel %vm7090_vm7, %v5447_v49, %v2890_v21  ;;  %v2894_v54 = vsel %vm7090_vm7, %v2892_v50, %v2893_v51  ;;  %v5383_v61 = vld [vmem:[%s6838_s11 + $0xc8] sm:$0x1]  ;;  %v5195_v10 = vcombine.low %v6608_v41, %v7396_v17  ;;  %v2274_v21 = vshll.u32 %v7298_v40, 16 }
  0xa1   : > { %6484 = vmatprep.subr.msk.bf16.mxu1 %vm724_vm0, %v7350_v7  ;;  %v5194_v48 = vcombine.low %v6606_v47, %v7376_v26  ;;  %v2887_v4 = vsel %vm7090_vm7, %v2885_v45, %v2886_v59  ;;  %v5464_v11 = vcombine.low %v2891_v58, %v2894_v54  ;;  %v2899_v8 = vrot.slane %v2897_v63, 4  ;;  %v1181_v45 = vld [vmem:[%s6838_s11] sm:$0xe]  ;;  %v1182_v59 = vld [vmem:[%s6838_s11 + $0xc] sm:$0xe] }
  0xa2   : > { %v5463_v2 = vcombine.low %v2884_v57, %v2887_v4  ;;  %v2900_v23 = vrot.slane %v5383_v61, 5  ;;  %v2898_v31 = vsel %vm7090_vm7, %v5448_v6, %v2897_v63  ;;  %v7411_v27 = vrot.slane %v2274_v21, 5  ;;  %v1185_v41 = vld [vmem:[%s6838_s11 + $0x30] sm:$0xe] }
  0xa3   : > { %v2280_v36 = vrot.slane %v2278_v25, 4  ;;  %v5198_v44 = vcombine.low %v7063_v19, %v7069_v35  ;;  %v2284_v47 = vshll.u32 %v7301_v55, 16  ;;  %v5222_v19 = vrot.slane %v1181_v45, 9 }
  0xa4   : > { %v2901_v38 = vsel %vm7090_vm7, %v2899_v8, %v2900_v23  ;;  %8725 = vst [vmem:[#allocation6_spill] sm:$0xff] %v7411_v27  ;;  %v5223_v35 = vrot.slane %v1182_v59, 9  ;;  %v1248_v4 = vrot.slane %v7335_v9, 5  ;;  %v1255_v12 = vrot.slane %v7371_v1, 5  ;;  %v1186_v8 = vld [vmem:[%s6838_s11 + $0x3c] sm:$0xe] }
  0xa5   : > { %v5465_v40 = vcombine.low %v2898_v31, %v2901_v38  ;;  %v2281_v49 = vor.u32 %v2280_v36, %v7411_v27  ;;  %v7431_v51 = vrot.slane %v2284_v47, 5  ;;  %v5199_v58 = vcombine.low %v7084_v0, %v7097_v29  ;;  %v1187_v31 = vld [vmem:[%s6838_s11 + $0x48] sm:$0xe]  ;;  %v6614_v59 = vld [vmem:[%s6838_s11 + $0x38] sm:$0x1] }
  0xa6   : > { %6110 = vmatmul.mubr.msk.bf16.gmra.mrb[20].mxu0 %vm675_vm3, %v5461_v60  ;;  %v5197_v60 = vcombine.low %v7032_v24, %v7038_v37  ;;  %v6611_v24 = vld [vmem:[%s6838_s11 + $0x14] sm:$0x1]  ;;  %v4089_v54 = vsel %vm724_vm0, %v7155_v22, 0  ;;  %v5200_v61 = vcombine.low %v7116_v53, %v7123_v16  ;;  %v5201_v6 = vcombine.low %v7142_v39, %v7150_v43  ;;  %v6612_v16 = vld [vmem:[%s6838_s11 + $0x20] sm:$0x1] }
  0xa7   : > { %5958 = vmatmul.mubr.msk.bf16.gmra.mrb[4].mxu1 %vm675_vm3, %v5193_v28  ;;  %6113 = vmatprep.mubr.msk.bf16.mxu0 %vm675_vm3, %v5462_v20  ;;  %v1241_v28 = vrot.slane %v7328_v34, 5  ;;  %v6558_v20 = vld [vmem:[%s6838_s11 + $0x18] sm:$0xff]   ;;  %v6610_v34 = vld [vmem:[%s6838_s11 + $0x8] sm:$0x1]  ;;  %v1244_v37 = vrot.slane %v6611_v24, 5  ;;  %8726 = vst [vmem:[#allocation7_spill] sm:$0xff] %v7431_v51  ;;  %v5202_v9 = vcombine.low %v7174_v5, %v7186_v30 }
  0xa8   : > { %5961 = vmatprep.mubr.msk.bf16.mxu1 %vm675_vm3, %v5194_v48  ;;  %v1234_v48 = vrot.slane %v7294_v15, 5  ;;  %v1237_v50 = vrot.slane %v6610_v34, 5  ;;  %v1183_v15 = vld [vmem:[%s6838_s11 + $0x18] sm:$0xe]  ;;  %v7436_v63 = vrot.slane %v2281_v49, 4  ;;  %v1251_v22 = vrot.slane %v6612_v16, 5 }
  0xa9   : > { %v1243_v55 = vrot.slane %v1241_v28, 4  ;;  %v5224_v1 = vrot.slane %v1183_v15, 9  ;;  %v7458_v29 = vsel %vm7090_vm7, %v5223_v35, %v1241_v28  ;;  %v1257_v25 = vrot.slane %v1255_v12, 4  ;;  %v5547_v24 = vld [vmem:[%s6838_s11 + $0x18] sm:$0xf] }
  0xaa   : > { %v1236_v57 = vrot.slane %v1234_v48, 4  ;;  %8727 = vst [vmem:[#allocation8_spill] sm:$0xff] %v7436_v63  ;;  %v7454_v0 = vsel %vm7090_vm7, %v5222_v19, %v1234_v48  ;;  %v1265_v47 = vrot.slane %v6614_v59, 5  ;;  %v7495_v49 = vsel %vm724_vm0, %v7350_v7, 0  ;;  %v5548_v7 = vld [vmem:[%s6838_s11 + $0x1c] sm:$0xf] }
  0xab   : > { %v7462_v53 = vsel %vm7090_vm7, %v1243_v55, %v1244_v37  ;;  %v7499_v34 = vsel %vm7090_vm7, %v5224_v1, %v1248_v4  ;;  %v6564_v37 = vld [vmem:[%s6838_s11 + $0x3c] sm:$0xff]   ;;  %v5227_v35 = vrot.slane %v1186_v8, 9  ;;  %v6615_v55 = vld [vmem:[%s6838_s11 + $0x44] sm:$0x1]  ;;  %v3610_v8 = vshll.u32 %v5547_v24, 16 }
  0xac   : > { %v7473_v23 = vsel %vm7090_vm7, %v1236_v57, %v1237_v50  ;;  %v1188_v50 = vld [vmem:[%s6838_s11 + $0x54] sm:$0xe]  ;;  %v1272_v15 = vrot.slane %v6615_v55, 5  ;;  %v5551_v39 = vld [vmem:[%s6838_s11 + $0x28] sm:$0xf] }
  0xad   : > { %v6622_v5 = vld [vmem:[%s6838_s11 + $0x70] sm:$0xf] }
  0xae   : > { %6114 = vmatmul.mubr.msk.bf16.gmra.mrb[24].mxu0 %vm675_vm3, %v5463_v2  ;;  %v1184_v2 = vld [vmem:[%s6838_s11 + $0x24] sm:$0xe]  ;;  %v1297_v30 = vrot.slane %v6622_v5, 5 }
  0xaf   : > { %5962 = vmatmul.mubr.msk.bf16.gmra.mrb[8].mxu1 %vm675_vm3, %v5195_v10  ;;  %6117 = vmatprep.mubr.msk.bf16.mxu0 %vm675_vm3, %v5464_v11  ;;  %v1262_v10 = vrot.slane %v7376_v26, 5  ;;  %v6562_v11 = vld [vmem:[%s6838_s11 + $0x30] sm:$0xff]   ;;  %v7469_v26 = vld [vmem:[%s8702_s1 + $0x20] sm:$0xf]  ;;  %v5225_v21 = vrot.slane %v1184_v2, 9 }
  0xb0   : > { %5965 = vmatprep.mubr.msk.bf16.mxu1 %vm675_vm3, %v5196_v18  ;;  %v1250_v18 = vrot.slane %v1248_v4, 4  ;;  %v1299_v48 = vrot.slane %v1297_v30, 4 }
  0xb1   : > { %v1264_v45 = vrot.slane %v1262_v10, 4  ;;  %v7506_v19 = vsel %vm7090_vm7, %v5225_v21, %v1255_v12  ;;  %v3620_v21 = vshrl.u32 %v5548_v7, 16 }
  0xb2   : > { %v7515_v4 = vsel %vm7090_vm7, %v1250_v18, %v1251_v22  ;;  %v3607_v22 = vshrl.u32 %v5547_v24, 16  ;;  %v3616_v18 = vshll.u32 %v5548_v7, 16  ;;  %v5550_v24 = vld [vmem:[%s6838_s11 + $0x24] sm:$0xf] }
  0xb3   : > { %v7528_v1 = vsel %vm7090_vm7, %v1264_v45, %v1265_v47 }
  0xb4   : > { %v3609_v43 = vrot.slane %v3607_v22, 4  ;;  %v7570_v7 = vrot.slane %v3616_v18, 5  ;;  %v3634_v22 = vshll.u32 %v5550_v24, 16  ;;  %v3644_v18 = vshrl.u32 %v5551_v39, 16 }
  0xb6   : > { %6118 = vmatmul.mubr.msk.bf16.gmra.mrb[28].mxu0 %vm675_vm3, %v5465_v40  ;;  %v6613_v40 = vld [vmem:[%s6838_s11 + $0x2c] sm:$0x1]  ;;  %v3636_v27 = vrot.slane %v3634_v22, 5 }
  0xb7   : > { %5966 = vmatmul.mubr.msk.bf16.gmra.mrb[12].mxu1 %vm675_vm3, %v5197_v60  ;;  %6123 = vmatprep.mubr.msk.bf16.mxu0 %vm675_vm3, %v6558_v20  ;;  %v1258_v28 = vrot.slane %v6613_v40, 5  ;;  %v1269_v60 = vrot.slane %v7396_v17, 5  ;;  %v6618_v40 = vld [vmem:[%s6838_s11 + $0x50] sm:$0x1]  ;;  %v6623_v17 = vld [vmem:[%s6838_s11 + $0x74] sm:$0x1] }
  0xb8   : > { %5969 = vmatprep.mubr.msk.bf16.mxu1 %vm675_vm3, %v5198_v44  ;;  %v5226_v44 = vrot.slane %v1185_v41, 9  ;;  %v5229_v41 = vrot.slane %v1188_v50, 9  ;;  %v1189_v50 = vld [vmem:[%s6838_s11 + $0x60] sm:$0xe]  ;;  %v5552_v20 = vld [vmem:[%s6838_s11 + $0x2c] sm:$0x1] }
  0xb9   : > { %v1271_v12 = vrot.slane %v1269_v60, 4  ;;  %v7541_v45 = vsel %vm7090_vm7, %v5227_v35, %v1269_v60  ;;  %v6619_v35 = vld [vmem:[%s6838_s11 + $0x5c] sm:$0x1] }
  0xba   : > { %v7524_v2 = vsel %vm7090_vm7, %v5226_v44, %v1262_v10  ;;  %v1286_v55 = vrot.slane %v6619_v35, 5  ;;  %v1190_v35 = vld [vmem:[%s6838_s11 + $0x6c] sm:$0xe] }
  0xbb   : > { %v7545_v59 = vsel %vm7090_vm7, %v1271_v12, %v1272_v15  ;;  %v6620_v15 = vld [vmem:[%s6838_s11 + $0x64] sm:$0xf]  ;;  %v3622_v12 = vrot.slane %v3620_v21, 4  ;;  %v5231_v5 = vrot.slane %v1190_v35, 9 }
  0xbc   : > { %v6570_v21 = vld [vmem:[%s6838_s11 + $0x60] sm:$0xff]  }
  0xbe   : > { %6124 = vmatmul.mubr.msk.bf16.vlgmr.msra.gmra.mrb[0].mxu0 %vm675_vm3, %v6560_v62  ;;  %v6616_v62 = vld [vmem:[%s6838_s11 + $0x4c] sm:$0xf] }
  0xbf   : > { %5970 = vmatmul.mubr.msk.bf16.gmra.mrb[16].mxu1 %vm675_vm3, %v5199_v58  ;;  %6156 = vmatpush3.bf16.msra.mxu0 %v4089_v54  ;;  %v1276_v57 = vrot.slane %v6616_v62, 5  ;;  %v7519_v58 = vsel %vm7090_vm7, %v1257_v25, %v1258_v28  ;;  %v5228_v54 = vrot.slane %v1187_v31, 9  ;;  %v1279_v28 = vrot.slane %v6618_v40, 5 }
  0xc0   : > { %5973 = vmatprep.mubr.msk.bf16.mxu1 %vm675_vm3, %v5200_v61  ;;  %6127 = vmatprep.mubr.msk.bf16.mxu0 %vm675_vm3, %v6562_v11  ;;  %v6566_v61 = vld [vmem:[%s6838_s11 + $0x48] sm:$0xff]   ;;  %v6617_v11 = vld [vmem:[%s6838_s11 + $0x58] sm:$0xf]  ;;  %v1290_v62 = vrot.slane %v6620_v15, 5  ;;  %v5554_v15 = vld [vmem:[%s6838_s11 + $0x34] sm:$0xf] }
  0xc1   : > { %6490 = vmatprep.subr.msk.bf16.mxu0 %vm724_vm0, %v7469_v26  ;;  %v1283_v16 = vrot.slane %v6617_v11, 5  ;;  %v1278_v31 = vrot.slane %v1276_v57, 4  ;;  %v7549_v47 = vsel %vm7090_vm7, %v5228_v54, %v1276_v57  ;;  %v5549_v57 = vld [vmem:[%s6838_s11 + $0x20] sm:$0x1]  ;;  %v5553_v54 = vld [vmem:[%s6838_s11 + $0x30] sm:$0xf] }
  0xc2   : > { %v5230_v11 = vrot.slane %v1189_v50, 9  ;;  %v3658_v50 = vshll.u32 %v5553_v54, 16  ;;  %v3626_v25 = vshll.u32 %v5549_v57, 16  ;;  %v3664_v36 = vshll.u32 %v5554_v15, 16 }
  0xc3   : > { %v7560_v60 = vsel %vm7090_vm7, %v5229_v41, %v1283_v16  ;;  %v7576_v41 = vsel %vm7090_vm7, %v1278_v31, %v1279_v28  ;;  %v1292_v31 = vrot.slane %v1290_v62, 4  ;;  %v3655_v28 = vshrl.u32 %v5553_v54, 16 }
  0xc4   : > { %v7618_v35 = vrot.slane %v3664_v36, 5 }
  0xc6   : > { %6128 = vmatmul.mubr.msk.bf16.gmra.mrb[4].mxu0 %vm675_vm3, %v6564_v37  ;;  %v1285_v37 = vrot.slane %v1283_v16, 4  ;;  %v6621_v16 = vld [vmem:[%s6838_s11 + $0x68] sm:$0x1] }
  0xc7   : > { %5974 = vmatmul.mubr.msk.bf16.gmra.mrb[20].mxu1 %vm675_vm3, %v5201_v6  ;;  %6131 = vmatprep.mubr.msk.bf16.mxu0 %vm675_vm3, %v6566_v61  ;;  %v3612_v6 = vrot.slane %v3610_v8, 5  ;;  %v6568_v61 = vld [vmem:[%s6838_s11 + $0x54] sm:$0xff]   ;;  %v1293_v40 = vrot.slane %v6621_v16, 5  ;;  %v3640_v8 = vshll.u32 %v5551_v39, 16  ;;  %v3623_v16 = vor.u32 %v3622_v12, %v7570_v7 }
  0xc8   : > { %5977 = vmatprep.mubr.msk.bf16.mxu1 %vm675_vm3, %v5202_v9  ;;  %v3631_v9 = vshrl.u32 %v5550_v24, 16  ;;  %v7585_v44 = vsel %vm7090_vm7, %v1285_v37, %v1286_v55  ;;  %v1300_v24 = vrot.slane %v6623_v17, 5  ;;  %v3668_v39 = vshrl.u32 %v5554_v15, 16 }
  0xc9   : > { %v3613_v10 = vor.u32 %v3612_v6, %v3609_v43  ;;  %v7591_v37 = vrot.slane %v3640_v8, 5  ;;  %v3646_v55 = vrot.slane %v3644_v18, 4  ;;  %v8728_v43 = vcombine.low %v7195_v52, %v7206_v46  ;;  %v6624_v8 = vld [vmem:[%s6838_s11 + $0x7c] sm:$0xf]  ;;  %v7627_v18 = vld [vmem:[%s6838_s11 + $0x38] sm:$0x1] }
  0xca   : > { %v3633_v38 = vrot.slane %v3631_v9, 4  ;;  %v7600_v17 = vsel %vm7090_vm7, %v5230_v11, %v1290_v62  ;;  %v7604_v57 = vsel %vm7090_vm7, %v1292_v31, %v1293_v40  ;;  %v3657_v6 = vrot.slane %v3655_v28, 4  ;;  %8730 = vst [vmem:[#allocation9_spill] sm:$0xff] %v7627_v18 }
  0xcb   : > { %v3660_v12 = vrot.slane %v3658_v50, 5  ;;  %v8729_v52 = vcombine.low %v7227_v33, %v7232_v56  ;;  %v3614_v46 = vrot.slane %v3613_v10, 4  ;;  %v3624_v54 = vrot.slane %v3623_v16, 4  ;;  %v6572_v33 = vld [vmem:[%s6838_s11 + $0x6c] sm:$0xff]   ;;  %v1192_v16 = vld [vmem:[%s6838_s11 + $0x84] sm:$0xe] }
  0xcc   : > { %v3650_v62 = vshll.u32 %v5552_v20, 16  ;;  %v7612_v11 = vsel %vm7090_vm7, %v5231_v5, %v1297_v30  ;;  %v7616_v40 = vsel %vm7090_vm7, %v1299_v48, %v1300_v24  ;;  %v3670_v9 = vrot.slane %v3668_v39, 4  ;;  %v6573_v48 = vld [vmem:[%s6838_s11 + $0x78] sm:$0xff]  }
  0xcd   : > { %v3637_v10 = vor.u32 %v3636_v27, %v3633_v38  ;;  %v3647_v20 = vor.u32 %v3646_v55, %v7591_v37  ;;  %v1304_v30 = vrot.slane %v6624_v8, 5  ;;  %v3661_v38 = vor.u32 %v3660_v12, %v3657_v6  ;;  %v5556_v5 = vld [vmem:[%s6838_s11 + $0x3c] sm:$0xf] }
  0xce   : > { %6132 = vmatmul.mubr.msk.bf16.gmra.mrb[8].mxu0 %vm675_vm3, %v6568_v61  ;;  %v3628_v61 = vrot.slane %v3626_v25, 5  ;;  %v1191_v25 = vld [vmem:[%s6838_s11 + $0x78] sm:$0xe]  ;;  %v7643_v50 = vrot.slane %v3650_v62, 5  ;;  %v3671_v39 = vor.u32 %v3670_v9, %v7618_v35  ;;  %v3674_v55 = vshll.u32 %v7627_v18, 16 }
  0xcf   : > { %5978 = vmatmul.mubr.msk.bf16.gmra.mrb[24].mxu1 %vm675_vm3, %v8728_v43  ;;  %6135 = vmatprep.mubr.msk.bf16.mxu0 %vm675_vm3, %v6570_v21  ;;  %v3619_v21 = vsel %vm6864_vm4, %v3614_v46, %v7570_v7  ;;  %v5232_v24 = vrot.slane %v1191_v25, 9  ;;  %v6625_v43 = vld [vmem:[%s6838_s11 + $0x88] sm:$0xf]  ;;  %v7651_v7 = vld [vmem:[%s6838_s11 + $0x40] sm:$0xf]  ;;  %v3638_v12 = vrot.slane %v3637_v10, 4  ;;  %v8732_v62 = vcombine.low %v7247_v14, %v7256_v42 }
  0xd0   : > { %5981 = vmatprep.mubr.msk.bf16.mxu1 %vm675_vm3, %v8729_v52  ;;  %v3629_v31 = vsel %vm6864_vm4, %v3624_v54, %v3628_v61  ;;  %v1311_v6 = vrot.slane %v6625_v43, 5  ;;  %8731 = vst [vmem:[#allocation10_spill] sm:$0xff] %v7651_v7  ;;  %v3648_v52 = vrot.slane %v3647_v20, 4  ;;  %v1306_v46 = vrot.slane %v1304_v30, 4  ;;  %v6626_v54 = vld [vmem:[%s6838_s11 + $0x80] sm:$0x1] }
  0xd1   : > { %v1307_v61 = vrot.slane %v6626_v54, 5  ;;  %v3662_v9 = vrot.slane %v3661_v38, 4  ;;  %v5233_v25 = vrot.slane %v1192_v16, 9  ;;  %v3679_v8 = vshrl.u32 %v5556_v5, 16  ;;  %v6574_v10 = vld [vmem:[%s6838_s11 + $0x84] sm:$0xff]  }
  0xd2   : > { %v3682_v43 = vshll.u32 %v5556_v5, 16  ;;  %v7665_v20 = vcombine.low %v3619_v21, %v3629_v31  ;;  %v7669_v14 = vsel %vm724_vm0, %v7469_v26, 0  ;;  %v3692_v38 = vshrl.u32 %v7651_v7, 16  ;;  %v6575_v21 = vld [vmem:[%s6838_s11 + $0x90] sm:$0xff]   ;;  %v6631_v18 = vld [vmem:[%s6838_s11 + $0xa0] sm:$0xf] }
  0xd3   : > { %v3672_v16 = vrot.slane %v3671_v39, 4  ;;  %v3676_v5 = vrot.slane %v3674_v55, 5  ;;  %v1313_v54 = vrot.slane %v1311_v6, 4  ;;  %v3643_v31 = vsel %vm6864_vm4, %v3638_v12, %v7591_v37 }
  0xd4   : > { %v3653_v26 = vsel %vm6864_vm4, %v3648_v52, %v7643_v50  ;;  %v7684_v39 = vsel %vm7090_vm7, %v5232_v24, %v1304_v30  ;;  %v7688_v55 = vsel %vm7090_vm7, %v1306_v46, %v1307_v61  ;;  %v3667_v37 = vsel %vm6864_vm4, %v3662_v9, %v7618_v35  ;;  %v5562_v30 = vld [vmem:[%s6838_s11 + $0x54] sm:$0xf]  ;;  %v7705_v24 = vld [vmem:[%s6838_s11 + $0x58] sm:$0xf]  ;;  %v7710_v61 = vld [vmem:[%s6838_s11 + $0x90] sm:$0xe] }
  0xd5   : > { %v7701_v12 = vsel %vm7090_vm7, %v5233_v25, %v1311_v6  ;;  %v3681_v50 = vrot.slane %v3679_v8, 4  ;;  %v3684_v52 = vrot.slane %v3682_v43, 5  ;;  %v3694_v46 = vrot.slane %v3692_v38, 4 }
  0xd6   : > { %6136 = vmatmul.mubr.msk.bf16.gmra.mrb[12].mxu0 %vm675_vm3, %v6572_v33  ;;  %v8733_v33 = vcombine.low %v7454_v0, %v7473_v23  ;;  %v6627_v0 = vld [vmem:[%s6838_s11 + $0x8c] sm:$0x1]  ;;  %v3677_v36 = vsel %vm6864_vm4, %v3672_v16, %v3676_v5  ;;  %v3727_v25 = vshrl.u32 %v5562_v30, 16  ;;  %v3730_v8 = vshll.u32 %v5562_v30, 16 }
  0xd7   : > { %5982 = vmatmul.mubr.msk.bf16.gmra.mrb[28].mxu1 %vm675_vm3, %v8732_v62  ;;  %6139 = vmatprep.mubr.msk.bf16.mxu0 %vm675_vm3, %v6573_v48  ;;  %v3688_v48 = vshll.u32 %v7651_v7, 16  ;;  %v1314_v23 = vrot.slane %v6627_v0, 5  ;;  %v5559_v62 = vld [vmem:[%s6838_s11 + $0x48] sm:$0xf]  ;;  %v7694_v0 = vld [vmem:[%s6838_s11 + $0x4c] sm:$0xf]  ;;  %v8735_v38 = vcombine.low %v7458_v29, %v7462_v53  ;;  %v7728_v16 = vcombine.low %v3643_v31, %v3653_v26 }
  0xd8   : > { %5987 = vmatprep.mubr.msk.bf16.mxu1 %vm675_vm3, %v8733_v33  ;;  %v7691_v33 = vld [vmem:[%s6838_s11 + $0x44] sm:$0x1]  ;;  %v3703_v27 = vshrl.u32 %v5559_v62, 16  ;;  %v3706_v15 = vshll.u32 %v5559_v62, 16  ;;  %v3712_v6 = vshll.u32 %v7694_v0, 16  ;;  %v3716_v9 = vshrl.u32 %v7694_v0, 16 }
  0xd9   : > { %8734 = vst [vmem:[#allocation11_spill] sm:$0xff] %v7691_v33  ;;  %v7707_v28 = vrot.slane %v3688_v48, 5  ;;  %v7716_v35 = vsel %vm7090_vm7, %v1313_v54, %v1314_v23  ;;  %v3736_v43 = vshll.u32 %v7705_v24, 16  ;;  %v3740_v48 = vshrl.u32 %v7705_v24, 16  ;;  %v5565_v31 = vld [vmem:[%s6838_s11 + $0x60] sm:$0xf] }
  0xda   : > { %v3698_v5 = vshll.u32 %v7691_v33, 16  ;;  %v5234_v54 = vrot.slane %v7710_v61, 9  ;;  %v8736_v23 = vcombine.low %v7499_v34, %v7515_v4  ;;  %v7739_v29 = vcombine.low %v3667_v37, %v3677_v36  ;;  %v6576_v26 = vld [vmem:[%s6838_s11 + $0x9c] sm:$0xff]   ;;  %v6577_v30 = vld [vmem:[%s6838_s11 + $0xa8] sm:$0xff]   ;;  %v6628_v36 = vld [vmem:[%s8702_s1 + $0x10] sm:$0xf] }
  0xdb   : > { %v3685_v53 = vor.u32 %v3684_v52, %v3681_v50  ;;  %v3705_v62 = vrot.slane %v3703_v27, 4  ;;  %v7750_v34 = vrot.slane %v3712_v6, 5  ;;  %v3718_v4 = vrot.slane %v3716_v9, 4  ;;  %v6629_v6 = vld [vmem:[%s6838_s11 + $0x94] sm:$0xf] }
  0xdc   : > { %v3729_v27 = vrot.slane %v3727_v25, 4  ;;  %v3732_v37 = vrot.slane %v3730_v8, 5  ;;  %v7759_v50 = vrot.slane %v3736_v43, 5  ;;  %v3742_v52 = vrot.slane %v3740_v48, 4  ;;  %v7765_v9 = vld [vmem:[%s6838_s11 + $0x64] sm:$0xf] }
  0xdd   : > { %8737 = vst [vmem:[#allocation12_spill] sm:$0xff] %v7765_v9  ;;  %v3751_v61 = vshrl.u32 %v5565_v31, 16  ;;  %v7767_v22 = vrot.slane %v3685_v53, 4  ;;  %v1325_v25 = vrot.slane %v6631_v18, 5  ;;  %v3719_v43 = vor.u32 %v3718_v4, %v7750_v34 }
  0xde   : > { %6140 = vmatmul.mubr.msk.bf16.gmra.mrb[16].mxu0 %vm675_vm3, %v6574_v10  ;;  %v3754_v10 = vshll.u32 %v5565_v31, 16  ;;  %v3733_v31 = vor.u32 %v3732_v37, %v3729_v27  ;;  %v3743_v53 = vor.u32 %v3742_v52, %v7759_v50  ;;  %v8738_v18 = vcombine.low %v7506_v19, %v7519_v58  ;;  %v6578_v37 = vld [vmem:[%s6838_s11 + $0xb4] sm:$0xff]  }
  0xdf   : > { %5988 = vmatmul.mubr.msk.bf16.vlgmr.msra.gmra.mrb[0].mxu1 %vm675_vm3, %v8735_v38  ;;  %6143 = vmatprep.mubr.msk.bf16.mxu0 %vm675_vm3, %v6575_v21  ;;  %v3708_v21 = vrot.slane %v3706_v15, 5  ;;  %v7748_v38 = vld [vmem:[%s6838_s11 + $0x50] sm:$0x1]  ;;  %v7757_v15 = vld [vmem:[%s6838_s11 + $0x5c] sm:$0x1]  ;;  %v8739_v27 = vcombine.low %v7524_v2, %v7528_v1  ;;  %v1327_v52 = vrot.slane %v1325_v25, 4 }
  0xe0   : > { %6020 = vmatpush3.bf16.msra.mxu1 %v7495_v49  ;;  %5991 = vmatprep.mubr.msk.bf16.mxu1 %vm675_vm3, %v8736_v23  ;;  %v3695_v49 = vor.u32 %v3694_v46, %v7707_v28  ;;  %v7761_v46 = vrot.slane %v3698_v5, 5  ;;  %v1318_v23 = vrot.slane %v6629_v6, 5  ;;  %v3722_v48 = vshll.u32 %v7748_v38, 16  ;;  %v1194_v5 = vld [vmem:[%s6838_s11 + $0x9c] sm:$0xe] }
  0xe1   : > { %6486 = vmatprep.subr.msk.bf16.mxu1 %vm724_vm0, %v6628_v36  ;;  %v6630_v36 = vld [vmem:[%s6838_s11 + $0x98] sm:$0x1]  ;;  %v3709_v7 = vor.u32 %v3708_v21, %v3705_v62  ;;  %v3746_v6 = vshll.u32 %v7757_v15, 16  ;;  %v3764_v62 = vshrl.u32 %v7765_v9, 16  ;;  %v3756_v4 = vrot.slane %v3754_v10, 5 }
  0xe2   : > { %v1321_v33 = vrot.slane %v6630_v36, 5  ;;  %v3696_v8 = vrot.slane %v3695_v49, 4  ;;  %v3760_v36 = vshll.u32 %v7765_v9, 16  ;;  %v7786_v21 = vsel %vm7090_vm7, %v5234_v54, %v1318_v23  ;;  %v7797_v2 = vld [vmem:[%s6838_s11 + $0x68] sm:$0x1] }
  0xe3   : > { %v3753_v49 = vrot.slane %v3751_v61, 4  ;;  %v3710_v19 = vrot.slane %v3709_v7, 4  ;;  %v5235_v58 = vrot.slane %v1194_v5, 9  ;;  %v3720_v3 = vrot.slane %v3719_v43, 4  ;;  %8740 = vst [vmem:[#allocation13_spill] sm:$0xff] %v7797_v2  ;;  %v6579_v5 = vld [vmem:[%s6838_s11 + $0xc0] sm:$0xff]  }
  0xe4   : > { %v3724_v54 = vrot.slane %v3722_v48, 5  ;;  %v3748_v63 = vrot.slane %v3746_v6, 5  ;;  %v1332_v61 = vrot.slane %v7232_v56, 5  ;;  %v3734_v10 = vrot.slane %v3733_v31, 4  ;;  %v1196_v31 = vld [vmem:[%s6838_s11 + $0xb4] sm:$0xe] }
  0xe5   : > { %v3744_v51 = vrot.slane %v3743_v53, 4  ;;  %v7799_v1 = vrot.slane %v3760_v36, 5  ;;  %v3766_v7 = vrot.slane %v3764_v62, 4  ;;  %v3691_v43 = vsel %vm6864_vm4, %v7767_v22, %v7707_v28  ;;  %v6633_v62 = vld [vmem:[%s6838_s11 + $0xb0] sm:$0x1] }
  0xe6   : > { %6144 = vmatmul.mubr.msk.bf16.gmra.mrb[20].mxu0 %vm675_vm3, %v6576_v26  ;;  %v1320_v26 = vrot.slane %v1318_v23, 4  ;;  %v1195_v23 = vld [vmem:[%s6838_s11 + $0xa8] sm:$0xe]  ;;  %v3701_v48 = vsel %vm6864_vm4, %v3696_v8, %v7761_v46  ;;  %v3757_v6 = vor.u32 %v3756_v4, %v3753_v49  ;;  %v3715_v53 = vsel %vm6864_vm4, %v3710_v19, %v7750_v34  ;;  %v5568_v46 = vld [vmem:[%s6838_s11 + $0x6c] sm:$0xf] }
  0xe7   : > { %5992 = vmatmul.mubr.msk.bf16.gmra.mrb[4].mxu1 %vm675_vm3, %v8738_v18  ;;  %6147 = vmatprep.mubr.msk.bf16.mxu0 %vm675_vm3, %v6577_v30  ;;  %v6632_v18 = vld [vmem:[%s6838_s11 + $0xa4] sm:$0x1]  ;;  %v7819_v36 = vsel %vm7090_vm7, %v5235_v58, %v1325_v25  ;;  %v5236_v28 = vrot.slane %v1195_v23, 9  ;;  %v1334_v8 = vrot.slane %v1332_v61, 4  ;;  %v3770_v49 = vshll.u32 %v7797_v2, 16 }
  0xe8   : > { %5995 = vmatprep.mubr.msk.bf16.mxu1 %vm675_vm3, %v8739_v27  ;;  %v1328_v30 = vrot.slane %v6632_v18, 5  ;;  %v7811_v56 = vsel %vm7090_vm7, %v1320_v26, %v1321_v33  ;;  %v3725_v33 = vsel %vm6864_vm4, %v3720_v3, %v3724_v54  ;;  %v1335_v26 = vrot.slane %v6633_v62, 5  ;;  %v5571_v18 = vld [vmem:[%s6838_s11 + $0x78] sm:$0xf]  ;;  %v7874_v54 = vld [vmem:[%s6838_s11 + $0xbc] sm:$0x1] }
  0xe9   : > { %v3739_v34 = vsel %vm6864_vm4, %v3734_v10, %v7759_v50  ;;  %v3749_v25 = vsel %vm6864_vm4, %v3744_v51, %v3748_v63  ;;  %v3767_v4 = vor.u32 %v3766_v7, %v7799_v1  ;;  %v5237_v27 = vrot.slane %v1196_v31, 9  ;;  %v7848_v51 = vld [vmem:[%s6838_s11 + $0x70] sm:$0xf]  ;;  %v7878_v10 = vld [vmem:[%s6838_s11 + $0x7c] sm:$0xf] }
  0xea   : > { %v7823_v22 = vsel %vm7090_vm7, %v1327_v52, %v1328_v30  ;;  %v8742_v3 = vcombine.low %v7541_v45, %v7545_v59  ;;  %v7844_v19 = vrot.slane %v3757_v6, 4  ;;  %v1339_v50 = vrot.slane %v7256_v42, 5  ;;  %8743 = vst [vmem:[#allocation15_spill] sm:$0xff] %v7848_v51  ;;  %8745 = vst [vmem:[#allocation16_spill] sm:$0xff] %v7878_v10  ;;  %v5574_v7 = vld [vmem:[%s6838_s11 + $0x84] sm:$0xf] }
  0xeb   : > { %8741 = vst [vmem:[#allocation14_spill] sm:$0xff] %v7823_v22  ;;  %v3775_v63 = vshrl.u32 %v5568_v46, 16  ;;  %v8744_v45 = vcombine.low %v7549_v47, %v7576_v41  ;;  %v7856_v58 = vcombine.low %v3715_v53, %v3725_v33  ;;  %v7862_v42 = vsel %vm7090_vm7, %v5236_v28, %v1332_v61  ;;  %v6580_v61 = vld [vmem:[%s6838_s11 + $0xcc] sm:$0xff]   ;;  %v7890_v31 = vld [vmem:[%s6838_s11 + $0x88] sm:$0xf] }
  0xec   : > { %v7865_v30 = vcombine.low %v3739_v34, %v3749_v25  ;;  %v7869_v47 = vsel %vm7090_vm7, %v1334_v8, %v1335_v26  ;;  %v7871_v41 = vrot.slane %v3770_v49, 5  ;;  %v3784_v6 = vshll.u32 %v7848_v51, 16  ;;  %8746 = vst [vmem:[#allocation17_spill] sm:$0xff] %v7890_v31  ;;  %v5577_v62 = vld [vmem:[%s6838_s11 + $0x90] sm:$0xf] }
  0xed   : > { %v7896_v28 = vrot.slane %v1339_v50, 4  ;;  %v7898_v33 = vrot.slane %v3775_v63, 4  ;;  %v3788_v8 = vshrl.u32 %v7848_v51, 16  ;;  %v3799_v26 = vshrl.u32 %v5571_v18, 16  ;;  %v7905_v25 = vld [vmem:[%s6838_s11 + $0x94] sm:$0xf] }
  0xee   : > { %6148 = vmatmul.mubr.msk.bf16.gmra.mrb[24].mxu0 %vm675_vm3, %v6578_v37  ;;  %v7842_v37 = vcombine.low %v3691_v43, %v3701_v48  ;;  %v7886_v43 = vsel %vm7090_vm7, %v5237_v27, %v1339_v50  ;;  %v3778_v48 = vshll.u32 %v5568_v46, 16  ;;  %v3802_v49 = vshll.u32 %v5571_v18, 16  ;;  %8747 = vst [vmem:[#allocation18_spill] sm:$0xff] %v7905_v25  ;;  %v7943_v2 = vld [vmem:[%s6838_s11 + $0x8c] sm:$0x1] }
  0xef   : > { %5996 = vmatmul.mubr.msk.bf16.gmra.mrb[8].mxu1 %vm675_vm3, %v8742_v3  ;;  %6151 = vmatprep.mubr.msk.bf16.mxu0 %vm675_vm3, %v6579_v5  ;;  %v7882_v5 = vrot.slane %v3767_v4, 4  ;;  %v3808_v46 = vshll.u32 %v7878_v10, 16  ;;  %v3812_v34 = vshrl.u32 %v7878_v10, 16  ;;  %v3823_v4 = vshrl.u32 %v5574_v7, 16 }
  0xf0   : > { %5999 = vmatprep.mubr.msk.bf16.mxu1 %vm675_vm3, %v8744_v45  ;;  %v3826_v27 = vshll.u32 %v5574_v7, 16  ;;  %v3832_v3 = vshll.u32 %v7890_v31, 16  ;;  %v3836_v50 = vshrl.u32 %v7890_v31, 16  ;;  %v7915_v45 = vld [vmem:[%s6838_s11 + $0x74] sm:$0x1]  ;;  %v3780_v18 = vrot.slane %v3778_v48, 5 }
  0xf1   : > { %v3847_v52 = vshrl.u32 %v5577_v62, 16  ;;  %v3850_v53 = vshll.u32 %v5577_v62, 16  ;;  %v8748_v7 = vcombine.low %v7560_v60, %v7585_v44  ;;  %v3790_v59 = vrot.slane %v3788_v8, 4  ;;  %v5580_v48 = vld [vmem:[%s6838_s11 + $0x9c] sm:$0xf] }
  0xf2   : > { %v3856_v63 = vshll.u32 %v7905_v25, 16  ;;  %v3860_v23 = vshrl.u32 %v7905_v25, 16  ;;  %v8749_v62 = vcombine.low %v7600_v17, %v7604_v57  ;;  %v7933_v44 = vld [vmem:[%s6838_s11 + $0x80] sm:$0x1]  ;;  %v3801_v60 = vrot.slane %v3799_v26, 4 }
  0xf3   : > { %8750 = vst [vmem:[#allocation19_spill] sm:$0xff] %v7933_v44  ;;  %v3825_v31 = vrot.slane %v3823_v4, 4  ;;  %v3828_v8 = vrot.slane %v3826_v27, 5  ;;  %v7937_v10 = vrot.slane %v3832_v3, 5  ;;  %v3838_v51 = vrot.slane %v3836_v50, 4 }
  0xf4   : > { %v7940_v25 = vld [vmem:[%s6838_s11 + $0xa0] sm:$0xf]  ;;  %v3849_v17 = vrot.slane %v3847_v52, 4  ;;  %v3852_v57 = vrot.slane %v3850_v53, 5  ;;  %v3874_v9 = vshll.u32 %v5580_v48, 16  ;;  %v3781_v26 = vor.u32 %v3780_v18, %v7898_v33 }
  0xf5   : > { %v3818_v27 = vshll.u32 %v7933_v44, 16  ;;  %v7952_v3 = vld [vmem:[%s6838_s11 + $0x98] sm:$0x1]  ;;  %v3880_v50 = vshll.u32 %v7940_v25, 16  ;;  %v3884_v52 = vshrl.u32 %v7940_v25, 16  ;;  %v3829_v22 = vor.u32 %v3828_v8, %v3825_v31 }
  0xf6   : > { %6152 = vmatmul.mubr.msk.bf16.gmra.mrb[28].mxu0 %vm675_vm3, %v6580_v61  ;;  %v7923_v61 = vrot.slane %v3784_v6, 5  ;;  %v3814_v6 = vrot.slane %v3812_v34, 4  ;;  %v3862_v34 = vrot.slane %v3860_v23, 4  ;;  %v3842_v33 = vshll.u32 %v7943_v2, 16 }
  0xf7   : > { %6000 = vmatmul.mubr.msk.bf16.gmra.mrb[12].mxu1 %vm675_vm3, %v8748_v7  ;;  %6157 = vmatprep.mubr.msk.bf16.mxu0 %vm675_vm3, %v7665_v20  ;;  %v3804_v7 = vrot.slane %v3802_v49, 5  ;;  %v7935_v20 = vrot.slane %v3808_v46, 5  ;;  %v3794_v49 = vshll.u32 %v7915_v45, 16  ;;  %v7947_v46 = vrot.slane %v3856_v63, 5 }
  0xf8   : > { %6003 = vmatprep.mubr.msk.bf16.mxu1 %vm675_vm3, %v8749_v62  ;;  %v3871_v62 = vshrl.u32 %v5580_v48, 16  ;;  %v3791_v4 = vor.u32 %v3790_v59, %v7923_v61  ;;  %v3839_v23 = vor.u32 %v3838_v51, %v7937_v10  ;;  %v3853_v59 = vor.u32 %v3852_v57, %v3849_v17  ;;  %v7985_v57 = vld [vmem:[%s6838_s11 + $0xa4] sm:$0x1] }
  0xf9   : > { %v3805_v53 = vor.u32 %v3804_v7, %v3801_v60  ;;  %v3815_v48 = vor.u32 %v3814_v6, %v7935_v20  ;;  %v3876_v18 = vrot.slane %v3874_v9, 5  ;;  %v8751_v44 = vcombine.low %v7612_v11, %v7616_v40 }
  0xfa   : > { %v3873_v63 = vrot.slane %v3871_v62, 4  ;;  %v8752_v31 = vrot.slane %v7874_v54, 5  ;;  %v3796_v51 = vrot.slane %v3794_v49, 5  ;;  %v3863_v60 = vor.u32 %v3862_v34, %v7947_v46  ;;  %v7988_v34 = vld [vmem:[%s6838_s11 + $0xac] sm:$0xf] }
  0xfb   : > { %v3866_v9 = vshll.u32 %v7952_v3, 16  ;;  %v8753_v11 = vcombine.low %v7684_v39, %v7688_v55  ;;  %v3782_v40 = vrot.slane %v3781_v26, 4  ;;  %v7981_v54 = vrot.slane %v3880_v50, 5 }
  0xfc   : > { %v3806_v7 = vrot.slane %v3805_v53, 4  ;;  %v3816_v6 = vrot.slane %v3815_v48, 4  ;;  %v3820_v8 = vrot.slane %v3818_v27, 5  ;;  %v3844_v17 = vrot.slane %v3842_v33, 5  ;;  %v7998_v48 = vld [vmem:[%s6838_s11 + $0xb0] sm:$0x1] }
  0xfd   : > { %v3830_v39 = vrot.slane %v3829_v22, 4  ;;  %v3840_v55 = vrot.slane %v3839_v23, 4  ;;  %v3854_v62 = vrot.slane %v3853_v59, 4  ;;  %v3877_v49 = vor.u32 %v3876_v18, %v3873_v63 }
  0xfe   : > { %6158 = vmatmul.mubr.msk.bf16.vlgmr.msra.gmra.mrb[0].mxu0 %vm675_vm3, %v7728_v16  ;;  %v7971_v16 = vsel %vm7090_vm7, %v7896_v28, %v8752_v31  ;;  %v3886_v28 = vrot.slane %v3884_v52, 4  ;;  %v3868_v26 = vrot.slane %v3866_v9, 5  ;;  %v3787_v52 = vsel %vm6864_vm4, %v3782_v40, %v7923_v61 }
  0xff   : > { %6004 = vmatmul.mubr.msk.bf16.gmra.mrb[16].mxu1 %vm675_vm3, %v8751_v44  ;;  %6190 = vmatpush3.bf16.msra.mxu0 %v7669_v14  ;;  %v3792_v14 = vrot.slane %v3791_v4, 4  ;;  %v5583_v44 = vld [vmem:[%s6838_s11 + $0xa8] sm:$0xf]  ;;  %v3890_v22 = vshll.u32 %v7985_v57, 16  ;;  %v3811_v33 = vsel %vm6864_vm4, %v3806_v7, %v7935_v20  ;;  %v3821_v23 = vsel %vm6864_vm4, %v3816_v6, %v3820_v8 }
 0x100   : > { %6007 = vmatprep.mubr.msk.bf16.mxu1 %vm675_vm3, %v8753_v11  ;;  %6161 = vmatprep.mubr.msk.bf16.mxu0 %vm675_vm3, %v7739_v29  ;;  %v3864_v29 = vrot.slane %v3863_v60, 4  ;;  %v3895_v4 = vshrl.u32 %v5583_v44, 16  ;;  %v3898_v50 = vshll.u32 %v5583_v44, 16  ;;  %v3887_v53 = vor.u32 %v3886_v28, %v7981_v54  ;;  %v5632_v11 = vld [vmem:[%s6838_s11 + $0x48] sm:$0xe] }
 0x101   : > { %v3797_v27 = vsel %vm6864_vm4, %v3792_v14, %v3796_v51  ;;  %v3904_v59 = vshll.u32 %v7988_v34, 16  ;;  %v3908_v61 = vshrl.u32 %v7988_v34, 16  ;;  %v3835_v63 = vsel %vm6864_vm4, %v3830_v39, %v7937_v10  ;;  %v8063_v39 = vld [vmem:[%s6838_s11 + $0xb8] sm:$0xf] }
 0x102   : > { %v3845_v18 = vsel %vm6864_vm4, %v3840_v55, %v3844_v17  ;;  %v3859_v20 = vsel %vm6864_vm4, %v3854_v62, %v7947_v46  ;;  %v3878_v31 = vrot.slane %v3877_v49, 4  ;;  %v8754_v51 = vcombine.low %v7701_v12, %v7716_v35 }
 0x103   : > { %v3897_v10 = vrot.slane %v3895_v4, 4  ;;  %v3900_v60 = vrot.slane %v3898_v50, 5  ;;  %v3914_v9 = vshll.u32 %v7998_v48, 16  ;;  %v8755_v46 = vcombine.low %v7786_v21, %v7811_v56  ;;  %v5586_v21 = vld [vmem:[%s6838_s11 + $0xb4] sm:$0xf] }
 0x104   : > { %v5253_v12 = vcombine.low %v7862_v42, %v7869_v47  ;;  %v8756_v35 = vsel %vm6864_vm4, %v7882_v5, %v7871_v41  ;;  %v3888_v14 = vrot.slane %v3887_v53, 4  ;;  %v3892_v28 = vrot.slane %v3890_v22, 5  ;;  %v5634_v4 = vld [vmem:[%s6838_s11 + $0x60] sm:$0xe]  ;;  %v5635_v53 = vld [vmem:[%s6838_s11 + $0x6c] sm:$0xe] }
 0x105   : > { %v5254_v56 = vcombine.low %v7886_v43, %v7971_v16  ;;  %v8046_v44 = vcombine.low %v3787_v52, %v3797_v27  ;;  %v8048_v42 = vrot.slane %v3904_v59, 5  ;;  %v3910_v47 = vrot.slane %v3908_v61, 4  ;;  %v8765_v16 = vld [vmem:[#allocation7_spill] sm:$0xff] }
 0x106   : > { %6162 = vmatmul.mubr.msk.bf16.gmra.mrb[4].mxu0 %vm675_vm3, %v7842_v37  ;;  %v3869_v37 = vsel %vm6864_vm4, %v3864_v29, %v3868_v26  ;;  %v8050_v41 = vcombine.low %v3811_v33, %v3821_v23  ;;  %v8052_v5 = vcombine.low %v3835_v63, %v3845_v18  ;;  %v3883_v6 = vsel %vm6864_vm4, %v3878_v31, %v7981_v54  ;;  %v8758_v23 = vld [vmem:[#allocation14_spill] sm:$0xff]  ;;  %v5589_v63 = vld [vmem:[%s6838_s11 + $0xc0] sm:$0xf]  ;;  %v8760_v18 = vld [vmem:[#allocation12_spill] sm:$0xff] }
 0x107   : > { %6008 = vmatmul.mubr.msk.bf16.gmra.mrb[20].mxu1 %vm675_vm3, %v8754_v51  ;;  %6165 = vmatprep.mubr.msk.bf16.mxu0 %vm675_vm3, %v7856_v58  ;;  %v8757_v58 = vsel %vm6864_vm4, %v7844_v19, %v7799_v1  ;;  %v8054_v7 = vcombine.low %v3859_v20, %v3869_v37  ;;  %v5648_v1 = vrot.slane %v5632_v11, 9  ;;  %v5633_v19 = vld [vmem:[%s6838_s11 + $0x54] sm:$0xe]  ;;  %v3901_v8 = vor.u32 %v3900_v60, %v3897_v10 }
 0x108   : > { %6011 = vmatprep.mubr.msk.bf16.mxu1 %vm675_vm3, %v8755_v46  ;;  %v5602_v40 = vcombine.low %v8757_v58, %v8756_v35  ;;  %v8060_v17 = vrot.slane %v3914_v9, 5  ;;  %v3919_v55 = vshrl.u32 %v5586_v21, 16  ;;  %v3893_v62 = vsel %vm6864_vm4, %v3888_v14, %v3892_v28  ;;  %v8761_v31 = vld [vmem:[#allocation13_spill] sm:$0xff]  ;;  %v8762_v9 = vld [vmem:[#allocation15_spill] sm:$0xff]  ;;  %v8112_v35 = vld [vmem:[%s6838_s11 + $0xbc] sm:$0x1] }
 0x109   : > { %v3922_v49 = vshll.u32 %v5586_v21, 16  ;;  %v4378_v29 = vrot.slane %v7694_v0, 5  ;;  %v4381_v26 = vrot.slane %v7748_v38, 5  ;;  %v3911_v50 = vor.u32 %v3910_v47, %v8048_v42  ;;  %v8115_v58 = vld [vmem:[%s6838_s11 + $0xc4] sm:$0xf] }
 0x10a   : > { %v5649_v52 = vrot.slane %v5633_v19, 9  ;;  %v4385_v54 = vrot.slane %v7705_v24, 5  ;;  %v4388_v27 = vrot.slane %v7757_v15, 5  ;;  %v3928_v22 = vshll.u32 %v8063_v39, 16  ;;  %v5636_v19 = vld [vmem:[%s6838_s11 + $0x78] sm:$0xe] }
 0x10b   : > { %v3932_v33 = vshrl.u32 %v8063_v39, 16  ;;  %v8080_v0 = vsel %vm7090_vm7, %v5648_v1, %v4378_v29  ;;  %v4380_v38 = vrot.slane %v4378_v29, 4  ;;  %v8759_v59 = vcombine.low %v7819_v36, %v8758_v23  ;;  %v8763_v23 = vld [vmem:[#allocation16_spill] sm:$0xff] }
 0x10c   : > { %v8087_v24 = vcombine.low %v3883_v6, %v3893_v62  ;;  %v8091_v15 = vsel %vm7090_vm7, %v5649_v52, %v4385_v54  ;;  %v5650_v61 = vrot.slane %v5634_v4, 9  ;;  %v4392_v20 = vrot.slane %v8760_v18, 5  ;;  %v6581_v6 = vld [vmem:[%s6838_s11 + $0xc] sm:$0xff]  }
 0x10d   : > { %v8097_v36 = vsel %vm7090_vm7, %v4380_v38, %v4381_v26  ;;  %v4395_v51 = vrot.slane %v8761_v31, 5  ;;  %v5651_v37 = vrot.slane %v5635_v53, 9  ;;  %v4399_v11 = vrot.slane %v8762_v9, 5 }
 0x10e   : > { %6166 = vmatmul.mubr.msk.bf16.gmra.mrb[8].mxu0 %vm675_vm3, %v7865_v30  ;;  %v4387_v30 = vrot.slane %v4385_v54, 4  ;;  %v5665_v10 = vcombine.low %v8080_v0, %v8097_v36  ;;  %v4402_v46 = vrot.slane %v7915_v45, 5  ;;  %v8121_v14 = vsel %vm7090_vm7, %v5650_v61, %v4392_v20 }
 0x10f   : > { %6012 = vmatmul.mubr.msk.bf16.gmra.mrb[24].mxu1 %vm675_vm3, %v8759_v59  ;;  %6169 = vmatprep.mubr.msk.bf16.mxu0 %vm675_vm3, %v5602_v40  ;;  %v4394_v28 = vrot.slane %v4392_v20, 4  ;;  %v8123_v21 = vrot.slane %v3919_v55, 4  ;;  %v3943_v47 = vshrl.u32 %v5589_v63, 16  ;;  %v8127_v45 = vsel %vm7090_vm7, %v5651_v37, %v4399_v11  ;;  %v5363_v55 = vld [vmem:[%s6838_s11 + $0x78] sm:$0xf]  ;;  %v8764_v59 = vld [vmem:[#allocation19_spill] sm:$0xff] }
 0x110   : > { %6015 = vmatprep.mubr.msk.bf16.mxu1 %vm675_vm3, %v5253_v12  ;;  %v8105_v60 = vsel %vm7090_vm7, %v4387_v30, %v4388_v27  ;;  %v8109_v12 = vrot.slane %v3901_v8, 4  ;;  %v4401_v1 = vrot.slane %v4399_v11, 4  ;;  %v8131_v8 = vrot.slane %v3911_v50, 4 }
 0x111   : > { %v5666_v40 = vcombine.low %v8091_v15, %v8105_v60  ;;  %v8133_v62 = vrot.slane %v3922_v49, 5  ;;  %v3946_v29 = vshll.u32 %v5589_v63, 16  ;;  %v8137_v26 = vsel %vm7090_vm7, %v4394_v28, %v4395_v51  ;;  %v8767_v28 = vld [vmem:[#allocation17_spill] sm:$0xff]  ;;  %v6644_v60 = vld [vmem:[%s6838_s11 + $0xa0] sm:$0xf] }
 0x112   : > { %v8140_v4 = vrot.slane %v3928_v22, 5  ;;  %v8142_v52 = vrot.slane %v3932_v33, 4  ;;  %v5667_v54 = vcombine.low %v8121_v14, %v8137_v26  ;;  %v8148_v27 = vsel %vm7090_vm7, %v4401_v1, %v4402_v46  ;;  %v5637_v33 = vld [vmem:[%s6838_s11 + $0x84] sm:$0xe]  ;;  %v6582_v1 = vld [vmem:[%s6838_s11 + $0x18] sm:$0xff]  }
 0x113   : > { %v3938_v49 = vshll.u32 %v8112_v35, 16  ;;  %v3952_v50 = vshll.u32 %v8115_v58, 16  ;;  %v5668_v53 = vcombine.low %v8127_v45, %v8148_v27  ;;  %v5652_v22 = vrot.slane %v5636_v19, 9  ;;  %v6648_v27 = vld [vmem:[%s6838_s11 + $0xac] sm:$0xf] }
 0x114   : > { %v3945_v38 = vrot.slane %v3943_v47, 4  ;;  %v4409_v30 = vrot.slane %v8764_v59, 5  ;;  %v2265_v61 = vshrl.u32 %v5363_v55, 16  ;;  %v3948_v63 = vrot.slane %v3946_v29, 5  ;;  %v5592_v29 = vld [vmem:[%s6838_s11 + $0xcc] sm:$0xf] }
 0x115   : > { %v3956_v18 = vshrl.u32 %v8115_v58, 16  ;;  %v2268_v43 = vshll.u32 %v5363_v55, 16  ;;  %v5653_v37 = vrot.slane %v5637_v33, 9  ;;  %v3907_v9 = vsel %vm6864_vm4, %v8109_v12, %v8048_v42  ;;  %v8191_v55 = vld [vmem:[%s6838_s11 + $0xd0] sm:$0xf] }
 0x116   : > { %6170 = vmatmul.mubr.msk.bf16.gmra.mrb[12].mxu0 %vm675_vm3, %v8046_v44  ;;  %v4406_v44 = vrot.slane %v8763_v23, 5  ;;  %v2267_v51 = vrot.slane %v2265_v61, 4  ;;  %v3925_v11 = vor.u32 %v8133_v62, %v8123_v21  ;;  %v4413_v47 = vrot.slane %v8767_v28, 5  ;;  %v6583_v21 = vld [vmem:[%s6838_s11 + $0x24] sm:$0xff]  }
 0x117   : > { %6016 = vmatmul.mubr.msk.bf16.gmra.mrb[28].mxu1 %vm675_vm3, %v5254_v56  ;;  %6173 = vmatprep.mubr.msk.bf16.mxu0 %vm675_vm3, %v8050_v41  ;;  %v8766_v56 = vld [vmem:[#allocation8_spill] sm:$0xff]  ;;  %v2270_v46 = vrot.slane %v2268_v43, 5  ;;  %v3917_v19 = vsel %vm6864_vm4, %v8131_v8, %v8060_v17  ;;  %v4416_v12 = vrot.slane %v7943_v2, 5  ;;  %v8199_v62 = vrot.slane %v3952_v50, 5  ;;  %v5638_v8 = vld [vmem:[%s6838_s11 + $0x90] sm:$0xe] }
 0x118   : > { %6021 = vmatprep.mubr.msk.bf16.mxu1 %vm675_vm3, %v6581_v6  ;;  %v2287_v41 = vsel %vm6864_vm4, %v8766_v56, %v8765_v16  ;;  %v8173_v20 = vsel %vm7090_vm7, %v5652_v22, %v4406_v44  ;;  %v4408_v31 = vrot.slane %v4406_v44, 4  ;;  %v3935_v6 = vor.u32 %v8142_v52, %v8140_v4  ;;  %v8205_v52 = vld [vmem:[%s6838_s11 + $0xc8] sm:$0x1]  ;;  %v8769_v16 = vld [vmem:[#allocation5_spill] sm:$0xff] }
 0x119   : > { %v3958_v22 = vrot.slane %v3956_v18, 4  ;;  %v2271_v17 = vor.u32 %v2270_v46, %v2267_v51  ;;  %v3940_v23 = vrot.slane %v3938_v49, 5  ;;  %v3949_v44 = vor.u32 %v3948_v63, %v3945_v38  ;;  %v8770_v51 = vld [vmem:[#allocation6_spill] sm:$0xff] }
 0x11a   : > { %v8195_v42 = vsel %vm7090_vm7, %v4408_v31, %v4409_v30  ;;  %v8209_v59 = vsel %vm7090_vm7, %v5653_v37, %v4413_v47  ;;  %v4415_v30 = vrot.slane %v4413_v47, 4  ;;  %v3967_v2 = vshrl.u32 %v5592_v29, 16 }
 0x11b   : > { %v5669_v33 = vcombine.low %v8173_v20, %v8195_v42  ;;  %v3970_v50 = vshll.u32 %v5592_v29, 16  ;;  %v3976_v61 = vshll.u32 %v8191_v55, 16  ;;  %v2272_v18 = vrot.slane %v2271_v17, 4  ;;  %v6584_v29 = vld [vmem:[%s6838_s11 + $0x30] sm:$0xff]  }
 0x11c   : > { %v3980_v49 = vshrl.u32 %v8191_v55, 16  ;;  %v8220_v38 = vsel %vm7090_vm7, %v4415_v30, %v4416_v12  ;;  %v5654_v63 = vrot.slane %v5638_v8, 9  ;;  %v3959_v56 = vor.u32 %v3958_v22, %v8199_v62 }
 0x11d   : > { %v3962_v31 = vshll.u32 %v8205_v52, 16  ;;  %v5670_v37 = vcombine.low %v8209_v59, %v8220_v38  ;;  %v5608_v46 = vcombine.low %v3907_v9, %v3917_v19  ;;  %v3926_v28 = vrot.slane %v3925_v11, 4  ;;  %v5639_v11 = vld [vmem:[%s6838_s11 + $0x9c] sm:$0xe] }
 0x11e   : > { %6174 = vmatmul.mubr.msk.bf16.gmra.mrb[16].mxu0 %vm675_vm3, %v8052_v5  ;;  %v8768_v5 = vld [vmem:[#allocation18_spill] sm:$0xff]  ;;  %v3936_v47 = vrot.slane %v3935_v6, 4  ;;  %v3950_v12 = vrot.slane %v3949_v44, 4  ;;  %v4423_v8 = vrot.slane %v7952_v3, 5  ;;  %v3969_v30 = vrot.slane %v3967_v2, 4 }
 0x11f   : > { %6022 = vmatmul.mubr.msk.bf16.vlgmr.msra.gmra.mrb[0].mxu1 %vm675_vm3, %v6582_v1  ;;  %6177 = vmatprep.mubr.msk.bf16.mxu0 %vm675_vm3, %v8054_v7  ;;  %v4420_v43 = vrot.slane %v8768_v5, 5  ;;  %v2277_v7 = vsel %vm6864_vm4, %v2272_v18, %v8770_v51  ;;  %v3972_v18 = vrot.slane %v3970_v50, 5  ;;  %v8243_v5 = vrot.slane %v3976_v61, 5  ;;  %v6585_v19 = vld [vmem:[%s6838_s11 + $0x3c] sm:$0xff]  }
 0x120   : > { %6224 = vmatpush3.bf16.msra.mxu1 %v8769_v16  ;;  %6025 = vmatprep.mubr.msk.bf16.mxu1 %vm675_vm3, %v6583_v21  ;;  %v8232_v1 = vcombine.low %v2277_v7, %v2287_v41  ;;  %v8236_v21 = vld [vmem:[%s6838_s11 + $0xd4] sm:$0x1]  ;;  %v3982_v9 = vrot.slane %v3980_v49, 4  ;;  %v3960_v41 = vrot.slane %v3959_v56, 4  ;;  %v3964_v6 = vrot.slane %v3962_v31, 5 }
 0x121   : > { %v8240_v22 = vsel %vm7090_vm7, %v5654_v63, %v4420_v43  ;;  %v4422_v17 = vrot.slane %v4420_v43, 4  ;;  %v3931_v63 = vsel %vm6864_vm4, %v3926_v28, %v8140_v4  ;;  %v3941_v2 = vsel %vm6864_vm4, %v3936_v47, %v3940_v23  ;;  %v6635_v16 = vld [vmem:[%s6838_s11 + $0x1c] sm:$0xf]  ;;  %v5640_v28 = vld [vmem:[%s6838_s11 + $0xa8] sm:$0xe] }
 0x122   : > { %v3986_v50 = vshll.u32 %v8236_v21, 16  ;;  %v5655_v61 = vrot.slane %v5639_v11, 9  ;;  %v4427_v49 = vrot.slane %v7940_v25, 5  ;;  %v3955_v4 = vsel %vm6864_vm4, %v3950_v12, %v8199_v62  ;;  %v5628_v62 = vld [vmem:[%s6838_s11 + $0x18] sm:$0xe]  ;;  %v6586_v47 = vld [vmem:[%s6838_s11 + $0x48] sm:$0xff]  }
 0x123   : > { %v8249_v44 = vsel %vm7090_vm7, %v4422_v17, %v4423_v8  ;;  %v3983_v43 = vor.u32 %v3982_v9, %v8243_v5  ;;  %v4430_v23 = vrot.slane %v7985_v57, 5  ;;  %v3965_v25 = vsel %vm6864_vm4, %v3960_v41, %v3964_v6  ;;  %v6636_v11 = vld [vmem:[%s6838_s11 + $0x20] sm:$0x1] }
 0x124   : > { %v5671_v3 = vcombine.low %v8240_v22, %v8249_v44  ;;  %v4350_v56 = vrot.slane %v6635_v16, 5  ;;  %v8275_v31 = vsel %vm7090_vm7, %v5655_v61, %v4427_v49  ;;  %v4429_v51 = vrot.slane %v4427_v49, 4  ;;  %v5641_v49 = vld [vmem:[%s6838_s11 + $0xb4] sm:$0xe] }
 0x125   : > { %v5609_v7 = vcombine.low %v3931_v63, %v3941_v2  ;;  %v3984_v17 = vrot.slane %v3983_v43, 4  ;;  %v5656_v41 = vrot.slane %v5640_v28, 9  ;;  %v4434_v6 = vrot.slane %v7988_v34, 5  ;;  %v5629_v2 = vld [vmem:[%s6838_s11 + $0x24] sm:$0xe] }
 0x126   : > { %6178 = vmatmul.mubr.msk.bf16.gmra.mrb[20].mxu0 %vm675_vm3, %v8087_v24  ;;  %v3973_v24 = vor.u32 %v3972_v18, %v3969_v30  ;;  %v8280_v57 = vsel %vm7090_vm7, %v4429_v51, %v4430_v23  ;;  %v6587_v30 = vld [vmem:[%s6838_s11 + $0x54] sm:$0xff]   ;;  %v5644_v18 = vrot.slane %v5628_v62, 9  ;;  %v4352_v9 = vrot.slane %v4350_v56, 4  ;;  %v6639_v28 = vld [vmem:[%s6838_s11 + $0x2c] sm:$0x1] }
 0x127   : > { %6026 = vmatmul.mubr.msk.bf16.gmra.mrb[4].mxu1 %vm675_vm3, %v6584_v29  ;;  %6181 = vmatprep.mubr.msk.bf16.mxu0 %vm675_vm3, %v5608_v46  ;;  %v3988_v46 = vrot.slane %v3986_v50, 5  ;;  %v5610_v29 = vcombine.low %v3955_v4, %v3965_v25  ;;  %v5672_v8 = vcombine.low %v8275_v31, %v8280_v57  ;;  %v4437_v63 = vrot.slane %v7998_v48, 5  ;;  %v6637_v50 = vld [vmem:[%s6838_s11 + $0x28] sm:$0xf]  ;;  %v5630_v25 = vld [vmem:[%s6838_s11 + $0x30] sm:$0xe] }
 0x128   : > { %6029 = vmatprep.mubr.msk.bf16.mxu1 %vm675_vm3, %v6585_v19  ;;  %v3974_v12 = vrot.slane %v3973_v24, 4  ;;  %v4353_v19 = vrot.slane %v6636_v11, 5  ;;  %v4357_v61 = vrot.slane %v6637_v50, 5  ;;  %v8303_v48 = vsel %vm7090_vm7, %v5656_v41, %v4434_v6  ;;  %v6589_v11 = vld [vmem:[%s6838_s11 + $0x6c] sm:$0xff]   ;;  %v5642_v50 = vld [vmem:[%s6838_s11 + $0xc0] sm:$0xe] }
 0x129   : > { %v3989_v34 = vsel %vm6864_vm4, %v3984_v17, %v3988_v46  ;;  %v4436_v24 = vrot.slane %v4434_v6, 4  ;;  %v4351_v43 = vsel %vm7090_vm7, %v5644_v18, %v4350_v56  ;;  %v5645_v51 = vrot.slane %v5629_v2, 9  ;;  %v8771_v41 = vld [vmem:[#allocation9_spill] sm:$0xff]  ;;  %v6653_v31 = vld [vmem:[%s6838_s11 + $0xc8] sm:$0x1] }
 0x12a   : > { %v3979_v4 = vsel %vm6864_vm4, %v3974_v12, %v8243_v5  ;;  %v4354_v23 = vsel %vm7090_vm7, %v4352_v9, %v4353_v19  ;;  %v6638_v5 = vld [vmem:[%s6838_s11 + $0x34] sm:$0xf]  ;;  %v6588_v12 = vld [vmem:[%s6838_s11 + $0x60] sm:$0xff]   ;;  %v5646_v18 = vrot.slane %v5630_v25, 9  ;;  %v4444_v9 = vrot.slane %v8112_v35, 5 }
 0x12b   : > { %v4364_v16 = vrot.slane %v6638_v5, 5  ;;  %v8314_v62 = vsel %vm7090_vm7, %v4436_v24, %v4437_v63  ;;  %v5611_v46 = vcombine.low %v3979_v4, %v3989_v34  ;;  %v5661_v17 = vcombine.low %v4351_v43, %v4354_v23  ;;  %v5631_v24 = vld [vmem:[%s6838_s11 + $0x3c] sm:$0xe] }
 0x12c   : > { %v5673_v56 = vcombine.low %v8303_v48, %v8314_v62  ;;  %v4367_v6 = vrot.slane %v8771_v41, 5  ;;  %v4358_v35 = vsel %vm7090_vm7, %v5645_v51, %v4357_v61  ;;  %v5658_v5 = vrot.slane %v5642_v50, 9 }
 0x12d   : > { %v4366_v19 = vrot.slane %v4364_v16, 4  ;;  %v4365_v23 = vsel %vm7090_vm7, %v5646_v18, %v4364_v16  ;;  %v4451_v51 = vrot.slane %v8205_v52, 5  ;;  %v2428_v57 = vshll.u32 %v6653_v31, 16 }
 0x12e   : > { %6182 = vmatmul.mubr.msk.bf16.gmra.mrb[24].mxu0 %vm675_vm3, %v5609_v7  ;;  %v5657_v7 = vrot.slane %v5641_v49, 9 }
 0x12f   : > { %6030 = vmatmul.mubr.msk.bf16.gmra.mrb[8].mxu1 %vm675_vm3, %v6586_v47  ;;  %6185 = vmatprep.mubr.msk.bf16.mxu0 %vm675_vm3, %v5610_v29  ;;  %v4360_v47 = vrot.slane %v6639_v28, 5  ;;  %v4441_v29 = vrot.slane %v8063_v39, 5  ;;  %v8772_v39 = vld [vmem:[#allocation10_spill] sm:$0xff]  ;;  %v4368_v25 = vsel %vm7090_vm7, %v4366_v19, %v4367_v6  ;;  %v5647_v28 = vrot.slane %v5631_v24, 9 }
 0x130   : > { %6033 = vmatprep.mubr.msk.bf16.mxu1 %vm675_vm3, %v6587_v30  ;;  %v4359_v30 = vrot.slane %v4357_v61, 4  ;;  %v4371_v49 = vrot.slane %v8772_v39, 5  ;;  %v4448_v61 = vrot.slane %v8115_v58, 5  ;;  %v6640_v39 = vld [vmem:[%s6838_s11 + $0x70] sm:$0xf]  ;;  %v4455_v24 = vrot.slane %v8191_v55, 5 }
 0x131   : > { %v8326_v63 = vsel %vm7090_vm7, %v5657_v7, %v4441_v29  ;;  %v4443_v2 = vrot.slane %v4441_v29, 4  ;;  %v5360_v7 = vld [vmem:[%s6838_s11 + $0x6c] sm:$0xf]  ;;  %v8773_v29 = vld [vmem:[#allocation11_spill] sm:$0xff] }
 0x132   : > { %v4361_v34 = vsel %vm7090_vm7, %v4359_v30, %v4360_v47  ;;  %v4373_v47 = vrot.slane %v4371_v49, 4  ;;  %v6590_v30 = vld [vmem:[%s6838_s11 + $0x78] sm:$0xff]   ;;  %v8357_v16 = vsel %vm7090_vm7, %v5658_v5, %v4448_v61  ;;  %v4450_v18 = vrot.slane %v4448_v61, 4 }
 0x133   : > { %v8333_v4 = vsel %vm7090_vm7, %v4443_v2, %v4444_v9  ;;  %v5663_v9 = vcombine.low %v4365_v23, %v4368_v25  ;;  %v2241_v19 = vshrl.u32 %v5360_v7, 16  ;;  %v2244_v41 = vshll.u32 %v5360_v7, 16 }
 0x134   : > { %v5674_v43 = vcombine.low %v8326_v63, %v8333_v4  ;;  %v8362_v58 = vsel %vm7090_vm7, %v4450_v18, %v4451_v51  ;;  %v4372_v6 = vsel %vm7090_vm7, %v5647_v28, %v4371_v49  ;;  %v4458_v49 = vrot.slane %v8236_v21, 5  ;;  %v6592_v51 = vld [vmem:[%s6838_s11 + $0x90] sm:$0xff]   ;;  %v6593_v21 = vld [vmem:[%s6838_s11 + $0x9c] sm:$0xff]  }
 0x135   : > { %v5675_v50 = vcombine.low %v8357_v16, %v8362_v58  ;;  %v2243_v23 = vrot.slane %v2241_v19, 4  ;;  %v2246_v25 = vrot.slane %v2244_v41, 5  ;;  %v4457_v7 = vrot.slane %v4455_v24, 4 }
 0x136   : > { %6186 = vmatmul.mubr.msk.bf16.gmra.mrb[28].mxu0 %vm675_vm3, %v5611_v46  ;;  %v5662_v46 = vcombine.low %v4358_v35, %v4361_v34  ;;  %v2250_v35 = vshll.u32 %v6640_v39, 16  ;;  %v2254_v34 = vshrl.u32 %v6640_v39, 16 }
 0x137   : > { %6034 = vmatmul.mubr.msk.bf16.gmra.mrb[12].mxu1 %vm675_vm3, %v6588_v12  ;;  %6191 = vmatprep.mubr.msk.bf16.mxu0 %vm675_vm3, %v5661_v17  ;;  %v4374_v12 = vrot.slane %v8773_v29, 5  ;;  %v5643_v17 = vld [vmem:[%s6838_s11 + $0xcc] sm:$0xe]  ;;  %v8384_v55 = vsel %vm7090_vm7, %v4457_v7, %v4458_v49 }
 0x138   : > { %6037 = vmatprep.mubr.msk.bf16.mxu1 %vm675_vm3, %v6589_v11  ;;  %v6591_v11 = vld [vmem:[%s6838_s11 + $0x84] sm:$0xff]   ;;  %v5659_v52 = vrot.slane %v5643_v17, 9  ;;  %v2256_v28 = vrot.slane %v2254_v34, 4  ;;  %v6641_v17 = vld [vmem:[%s6838_s11 + $0x74] sm:$0x1] }
 0x139   : > { %v4375_v2 = vsel %vm7090_vm7, %v4373_v47, %v4374_v12  ;;  %v5366_v47 = vld [vmem:[%s6838_s11 + $0x84] sm:$0xf]  ;;  %v2247_v12 = vor.u32 %v2246_v25, %v2243_v23  ;;  %v6595_v34 = vld [vmem:[%s6838_s11 + $0xb4] sm:$0xff]  }
 0x13a   : > { %v8379_v5 = vsel %vm7090_vm7, %v5659_v52, %v4455_v24  ;;  %v5664_v61 = vcombine.low %v4372_v6, %v4375_v2  ;;  %v2292_v18 = vshll.u32 %v5366_v47, 16  ;;  %v5369_v6 = vld [vmem:[%s6838_s11 + $0x90] sm:$0xf]  ;;  %v6594_v2 = vld [vmem:[%s6838_s11 + $0xa8] sm:$0xff]  }
 0x13b   : > { %v5676_v29 = vcombine.low %v8379_v5, %v8384_v55  ;;  %v2248_v52 = vrot.slane %v2247_v12, 4  ;;  %v2313_v23 = vshrl.u32 %v5369_v6, 16  ;;  %v2316_v25 = vshll.u32 %v5369_v6, 16 }
 0x13c   : > { %v2346_v12 = vshll.u32 %v6644_v60, 16 }
 0x13d   : > { %v2318_v14 = vrot.slane %v2316_v25, 5  ;;  %v6647_v25 = vld [vmem:[%s6838_s11 + $0xa4] sm:$0x1] }
 0x13e   : > { %6192 = vmatmul.mubr.msk.bf16.vlgmr.msra.gmra.mrb[0].mxu0 %vm675_vm3, %v5662_v46  ;;  %v2252_v46 = vrot.slane %v2250_v35, 5  ;;  %v5372_v35 = vld [vmem:[%s6838_s11 + $0x9c] sm:$0xf]  ;;  %v8426_v6 = vrot.slane %v2346_v12, 5 }
 0x13f   : > { %6038 = vmatmul.mubr.msk.bf16.gmra.mrb[16].mxu1 %vm675_vm3, %v6590_v30  ;;  %6195 = vmatprep.mubr.msk.bf16.mxu0 %vm675_vm3, %v5663_v9  ;;  %v2260_v30 = vshll.u32 %v6641_v17, 16  ;;  %v2289_v9 = vshrl.u32 %v5366_v47, 16  ;;  %v2340_v47 = vshll.u32 %v5372_v35, 16  ;;  %v6645_v17 = vld [vmem:[%s6838_s11 + $0x8c] sm:$0x1] }
 0x140   : > { %6041 = vmatprep.mubr.msk.bf16.mxu1 %vm675_vm3, %v6591_v11  ;;  %v2257_v13 = vor.u32 %v2256_v28, %v2252_v46  ;;  %v6642_v11 = vld [vmem:[%s6838_s11 + $0x88] sm:$0xf]  ;;  %v2253_v7 = vsel %vm6864_vm4, %v2248_v52, %v2252_v46 }
 0x141   : > { %v2298_v19 = vshll.u32 %v6642_v11, 16  ;;  %v2302_v41 = vshrl.u32 %v6642_v11, 16  ;;  %v2262_v0 = vrot.slane %v2260_v30, 5  ;;  %v2291_v36 = vrot.slane %v2289_v9, 4 }
 0x142   : > { %v2258_v39 = vrot.slane %v2257_v13, 4  ;;  %v2308_v30 = vshll.u32 %v6645_v17, 16  ;;  %v2315_v9 = vrot.slane %v2313_v23, 4  ;;  %v2342_v11 = vrot.slane %v2340_v47, 5 }
 0x143   : > { %v8403_v24 = vrot.slane %v2298_v19, 5  ;;  %v2304_v49 = vrot.slane %v2302_v41, 4  ;;  %v6596_v19 = vld [vmem:[%s6838_s11 + $0xc0] sm:$0xff]  }
 0x144   : > { %v2263_v46 = vsel %vm6864_vm4, %v2258_v39, %v2262_v0  ;;  %v5375_v39 = vld [vmem:[%s6838_s11 + $0xa8] sm:$0xf] }
 0x145   : > { %v2305_v13 = vor.u32 %v2304_v49, %v8403_v24  ;;  %v5393_v41 = vcombine.low %v2253_v7, %v2263_v46  ;;  %v2356_v7 = vshll.u32 %v6647_v25, 16  ;;  %v2364_v45 = vshll.u32 %v5375_v39, 16 }
 0x146   : > { %6196 = vmatmul.mubr.msk.bf16.gmra.mrb[4].mxu0 %vm675_vm3, %v5664_v61  ;;  %v6643_v61 = vld [vmem:[%s6838_s11 + $0x94] sm:$0xf] }
 0x147   : > { %6042 = vmatmul.mubr.msk.bf16.gmra.mrb[20].mxu1 %vm675_vm3, %v6592_v51  ;;  %6199 = vmatprep.mubr.msk.bf16.mxu0 %vm675_vm3, %v5665_v10  ;;  %v2294_v10 = vrot.slane %v2292_v18, 5  ;;  %v2322_v51 = vshll.u32 %v6643_v61, 16  ;;  %v2326_v28 = vshrl.u32 %v6643_v61, 16  ;;  %v2306_v0 = vrot.slane %v2305_v13, 4 }
 0x148   : > { %6045 = vmatprep.mubr.msk.bf16.mxu1 %vm675_vm3, %v6593_v21  ;;  %v2337_v21 = vshrl.u32 %v5372_v35, 16  ;;  %v6646_v35 = vld [vmem:[%s6838_s11 + $0x98] sm:$0x1]  ;;  %v2361_v61 = vshrl.u32 %v5375_v39, 16  ;;  %v5381_v39 = vld [vmem:[%s6838_s11 + $0xc0] sm:$0xf] }
 0x149   : > { %v2295_v15 = vor.u32 %v2294_v10, %v2291_v36  ;;  %v8423_v26 = vrot.slane %v2322_v51, 5  ;;  %v2310_v36 = vrot.slane %v2308_v30, 5  ;;  %v2319_v10 = vor.u32 %v2318_v14, %v2315_v9  ;;  %v5378_v51 = vld [vmem:[%s6838_s11 + $0xb4] sm:$0xf] }
 0x14a   : > { %v2339_v18 = vrot.slane %v2337_v21, 4  ;;  %v2374_v21 = vshrl.u32 %v6648_v27, 16  ;;  %v2385_v20 = vshrl.u32 %v5378_v51, 16  ;;  %v2388_v42 = vshll.u32 %v5378_v51, 16 }
 0x14b   : > { %v2296_v52 = vrot.slane %v2295_v15, 4  ;;  %v2311_v46 = vsel %vm6864_vm4, %v2306_v0, %v2310_v36  ;;  %v2320_v15 = vrot.slane %v2319_v10, 4  ;;  %v2358_v30 = vrot.slane %v2356_v7, 5 }
 0x14c   : > { %v2343_v23 = vor.u32 %v2342_v11, %v2339_v18  ;;  %v2363_v9 = vrot.slane %v2361_v61, 4  ;;  %v2376_v11 = vrot.slane %v2374_v21, 4  ;;  %v6652_v61 = vld [vmem:[%s6838_s11 + $0xbc] sm:$0x1] }
 0x14d   : > { %v2301_v47 = vsel %vm6864_vm4, %v2296_v52, %v8403_v24  ;;  %v2325_v0 = vsel %vm6864_vm4, %v2320_v15, %v8423_v26  ;;  %v2404_v22 = vshll.u32 %v6652_v61, 16 }
 0x14e   : > { %6200 = vmatmul.mubr.msk.bf16.gmra.mrb[8].mxu0 %vm675_vm3, %v5666_v40  ;;  %v2350_v40 = vshrl.u32 %v6644_v60, 16  ;;  %v2344_v17 = vrot.slane %v2343_v23, 4  ;;  %v5395_v24 = vcombine.low %v2301_v47, %v2311_v46 }
 0x14f   : > { %6046 = vmatmul.mubr.msk.bf16.gmra.mrb[24].mxu1 %vm675_vm3, %v6594_v2  ;;  %6203 = vmatprep.mubr.msk.bf16.mxu0 %vm675_vm3, %v5667_v54  ;;  %v2328_v54 = vrot.slane %v2326_v28, 4 }
 0x150   : > { %6049 = vmatprep.mubr.msk.bf16.mxu1 %vm675_vm3, %v6595_v34  ;;  %v2352_v2 = vrot.slane %v2350_v40, 4  ;;  %v2332_v34 = vshll.u32 %v6646_v35, 16  ;;  %v2349_v10 = vsel %vm6864_vm4, %v2344_v17, %v8426_v6  ;;  %v2430_v17 = vrot.slane %v2428_v57, 5 }
 0x151   : > { %v2329_v49 = vor.u32 %v2328_v54, %v8423_v26  ;;  %v2366_v54 = vrot.slane %v2364_v45, 5  ;;  %v6650_v26 = vld [vmem:[%s6838_s11 + $0xb0] sm:$0x1] }
 0x152   : > { %v2353_v28 = vor.u32 %v2352_v2, %v8426_v6  ;;  %v2334_v60 = vrot.slane %v2332_v34, 5  ;;  %v2380_v35 = vshll.u32 %v6650_v26, 16  ;;  %v2409_v34 = vshrl.u32 %v5381_v39, 16 }
 0x153   : > { %v2330_v13 = vrot.slane %v2329_v49, 4  ;;  %v2367_v38 = vor.u32 %v2366_v54, %v2363_v9  ;;  %v2412_v6 = vshll.u32 %v5381_v39, 16  ;;  %v6651_v49 = vld [vmem:[%s6838_s11 + $0xc4] sm:$0xf] }
 0x154   : > { %v2354_v14 = vrot.slane %v2353_v28, 4  ;;  %v2418_v23 = vshll.u32 %v6651_v49, 16  ;;  %v2422_v25 = vshrl.u32 %v6651_v49, 16  ;;  %v2382_v45 = vrot.slane %v2380_v35, 5 }
 0x155   : > { %v2335_v36 = vsel %vm6864_vm4, %v2330_v13, %v2334_v60  ;;  %v2368_v51 = vrot.slane %v2367_v38, 4  ;;  %v2406_v60 = vrot.slane %v2404_v22, 5 }
 0x156   : > { %6204 = vmatmul.mubr.msk.bf16.gmra.mrb[12].mxu0 %vm675_vm3, %v5668_v53  ;;  %v2370_v53 = vshll.u32 %v6648_v27, 16  ;;  %v2359_v59 = vsel %vm6864_vm4, %v2354_v14, %v2358_v30  ;;  %v5396_v44 = vcombine.low %v2325_v0, %v2335_v36  ;;  %v2411_v27 = vrot.slane %v2409_v34, 4 }
 0x157   : > { %6050 = vmatmul.mubr.msk.bf16.gmra.mrb[28].mxu1 %vm675_vm3, %v6596_v19  ;;  %6207 = vmatprep.mubr.msk.bf16.mxu0 %vm675_vm3, %v5669_v33  ;;  %v6649_v33 = vld [vmem:[%s6838_s11 + $0xb8] sm:$0xf]  ;;  %v2387_v19 = vrot.slane %v2385_v20, 4  ;;  %v2420_v21 = vrot.slane %v2418_v23, 5  ;;  %v2424_v47 = vrot.slane %v2422_v25, 4  ;;  %s175_s11 = sand.u32 1, %s6716_s13  }
 0x158   : > { %6071 = vmatprep.mubr.msk.bf16.mxu1 %vm675_vm3, %v5393_v41  ;;  %v2394_v12 = vshll.u32 %v6649_v33, 16  ;;  %v2398_v40 = vshrl.u32 %v6649_v33, 16  ;;  %v2372_v18 = vrot.slane %v2370_v53, 5  ;;  %v2390_v41 = vrot.slane %v2388_v42, 5  ;;  %s5155_s18 = sshll.u32 %s175_s11, 7  ;;  %s8655_s15 = scalar_lea.sflag [#allocation3], %s175_s11 }
 0x159   : > { %v2414_v53 = vrot.slane %v2412_v6, 5  ;;  %s8542_s19 = scalar_lea.vmem [#allocation2], %s5155_s18 }
 0x15a   : > { %v2396_v52 = vrot.slane %v2394_v12, 5  ;;  %v2400_v2 = vrot.slane %v2398_v40, 4  ;;  %v2373_v20 = vsel %vm6864_vm4, %v2368_v51, %v2372_v18  ;;  %v2425_v12 = vor.u32 %v2424_v47, %v2420_v21  ;;  %s5067_s23 = sshll.u32 %s8542_s19, 4  ;;  %s8645_s23 = int_to_ptr.vmem [resolvable:$true] %s5067_s23 }
 0x15b   : > { %v2415_v33 = vor.u32 %v2414_v53, %v2411_v27  ;;  %s6654_s29 = scalar_lea.vmem %s8645_s23, 2048  ;;  %p6661_p1 = scmp.lt.s32.totalorder %s8645_s23, %s6659_s4 }
 0x15c   : > { %v2401_v7 = vor.u32 %v2400_v2, %v2396_v52  ;;  %v2426_v13 = vrot.slane %v2425_v12, 4  ;;  %v8533_v2 = vld [vmem:[%s8703_s2] ss:$0 sm:$0xff]  ;;  %p6655_p12 = scmp.ne.s32.totalorder %s8645_s23, %s6654_s29  ;;  %p6662_p2 = scmp.lt.s32.totalorder %s6660_s5, %s6654_s29 }
 0x15d   : > { %v2416_v40 = vrot.slane %v2415_v33, 4 }
 0x15e   : > { %6208 = vmatmul.mubr.msk.bf16.gmra.mrb[16].mxu0 %vm675_vm3, %v5670_v37  ;;  %v2377_v37 = vor.u32 %v2376_v11, %v2372_v18  ;;  %v2402_v15 = vrot.slane %v2401_v7, 4  ;;  %v2431_v9 = vsel %vm6864_vm4, %v2426_v13, %v2430_v17  ;;  %p6656_p13 = pnand %p6655_p12, %p6797_p4  ;;  %p6663_p3 = por %p6662_p2, %p6661_p1 }
 0x15f   : > { %6072 = vmatmul.mubr.msk.bf16.vlgmr.msra.gmra.mrb[16].mxu1 %vm675_vm3, %v8232_v1  ;;  %6211 = vmatprep.mubr.msk.bf16.mxu0 %vm675_vm3, %v5671_v3  ;;  %v2391_v1 = vor.u32 %v2390_v41, %v2387_v19  ;;  %v5397_v3 = vcombine.low %v2349_v10, %v2359_v59  ;;  %v2421_v30 = vsel %vm6864_vm4, %v2416_v40, %v2420_v21 }
 0x160   : > { %6075 = vmatprep.mubr.msk.bf16.mxu1 %vm675_vm3, %v5395_v24  ;;  %v2378_v28 = vrot.slane %v2377_v37, 4  ;;  %v2407_v48 = vsel %vm6864_vm4, %v2402_v15, %v2406_v60  ;;  %v5400_v14 = vcombine.low %v2421_v30, %v2431_v9  ;;  %p6657_p0 = pneg %p6656_p13 }
 0x161   : > { %v2392_v46 = vrot.slane %v2391_v1, 4 }
 0x162   : > { %v2383_v42 = vsel %vm6864_vm4, %v2378_v28, %v2382_v45  ;;  %p6664_p5 = pnand %p6663_p3, %p6657_p0 }
 0x163   : > { %v5398_v62 = vcombine.low %v2373_v20, %v2383_v42 }
 0x166   : > { %6212 = vmatmul.mubr.msk.bf16.gmra.mrb[20].mxu0 %vm675_vm3, %v5672_v8  ;;  %v2397_v8 = vsel %vm6864_vm4, %v2392_v46, %v2396_v52 }
 0x167   : > { %6076 = vmatmul.mubr.msk.bf16.gmra.mrb[20].mxu1 %vm675_vm3, %v5396_v44  ;;  %6215 = vmatprep.mubr.msk.bf16.mxu0 %vm675_vm3, %v5673_v56  ;;  %v5399_v56 = vcombine.low %v2397_v8, %v2407_v48 }
 0x168   : > { %6079 = vmatprep.mubr.msk.bf16.mxu1 %vm675_vm3, %v5397_v3 }
 0x16e   : > { %6216 = vmatmul.mubr.msk.bf16.gmra.mrb[24].mxu0 %vm675_vm3, %v5674_v43 }
 0x16f   : > { %6080 = vmatmul.mubr.msk.bf16.gmra.mrb[24].mxu1 %vm675_vm3, %v5398_v62  ;;  %6219 = vmatprep.mubr.msk.bf16.mxu0 %vm675_vm3, %v5675_v50 }
 0x170   : > { %6083 = vmatprep.mubr.msk.bf16.mxu1 %vm675_vm3, %v5399_v56 }
 0x176   : > { %6220 = vmatmul.mubr.msk.bf16.gmra.mrb[28].mxu0 %vm675_vm3, %v5676_v29 }
 0x177   : > { %6084 = vmatmul.mubr.msk.bf16.gmra.mrb[28].mxu1 %vm675_vm3, %v5400_v14 }
 0x1f2   : > { %v6023_v63 = vpop.f32.mrb[0].mxu1 }
 0x1f3   : > { %v1841_v4 = vpop.f32.mrb[1].mxu1 }
 0x1f4   : > { %v6024_v43 = vpop.f32.mrb[2].mxu1 }
 0x1f5   : > { %v1844_v16 = vpop.f32.mrb[3].mxu1 }
 0x1fa   : > { %v6027_v58 = vpop.f32.mrb[4].mxu1 }
 0x1fb   : > { %v1857_v50 = vpop.f32.mrb[5].mxu1 }
 0x1fc   : > { %v6028_v54 = vpop.f32.mrb[6].mxu1 }
 0x1fd   : > { %v1860_v18 = vpop.f32.mrb[7].mxu1 }
 0x202   : > { %v8514_v11 = vpop.f32.mrb[8].mxu1 }
 0x203   : > { %v8516_v32 = vpop.f32.mrb[9].mxu1 }
 0x204   : > { %v8518_v24 = vpop.f32.mrb[10].mxu1 }
 0x205   : > { %v8520_v5 = vpop.f32.mrb[11].mxu1 }
 0x20a   : > { %v8522_v55 = vpop.f32.mrb[12].mxu1 }
 0x20b   : > { %v8524_v29 = vpop.f32.mrb[13].mxu1 }
 0x20c   : > { %v8526_v19 = vpop.f32.mrb[14].mxu1 }
 0x20d   : > { %v8528_v41 = vpop.f32.mrb[15].mxu1 }
 0x211   : > { %v6193_v52 = vpop.f32.mrb[0].mxu0 }
 0x212   : > { %v6225_v39 = vadd.f32 %v6193_v52, %v6023_v63  ;;  %v4595_v0 = vpop.f32.mrb[1].mxu0 }
 0x213   : > { %v6226_v36 = vadd.f32 %v4595_v0, %v1841_v4  ;;  %v6194_v10 = vpop.f32.mrb[2].mxu0 }
 0x214   : > { %v4763_v59 = vadd.f32 %v6225_v39, %v8533_v2  ;;  %v6227_v38 = vadd.f32 %v6194_v10, %v6024_v43  ;;  %v4598_v37 = vpop.f32.mrb[3].mxu0 }
 0x215   : > { %v4761_v26 = vadd.f32 %v6226_v36, %v8533_v2  ;;  %v6228_v35 = vadd.f32 %v4598_v37, %v1844_v16 }
 0x216   : > { %vm4795_vm8 = vcmp.ge.f32.partialorder %v4763_v59, 0.0  ;;  %v4827_v34 = vmul.f32 0.2, %v4763_v59  ;;  %v4764_v6 = vadd.f32 %v6227_v38, %v8533_v2 }
 0x217   : > { %vm4793_vm9 = vcmp.ge.f32.partialorder %v4761_v26, 0.0  ;;  %v4825_v49 = vmul.f32 0.2, %v4761_v26  ;;  %v4762_v23 = vadd.f32 %v6228_v35, %v8533_v2 }
 0x218   : > { %v4859_v25 = vsel %vm4795_vm8, %v4763_v59, %v4827_v34  ;;  %vm4796_vm11 = vcmp.ge.f32.partialorder %v4764_v6, 0.0  ;;  %v4828_v1 = vmul.f32 0.2, %v4764_v6 }
 0x219   : > { %v5733_v7 = vpack.c.bf16 %v4859_v25, %v4859_v25  ;;  %v4857_v61 = vsel %vm4793_vm9, %v4761_v26, %v4825_v49  ;;  %vm4794_vm12 = vcmp.ge.f32.partialorder %v4762_v23, 0.0  ;;  %v4826_v22 = vmul.f32 0.2, %v4762_v23  ;;  %v6197_v44 = vpop.f32.mrb[4].mxu0 }
 0x21a   : > { %v5731_v3 = vpack.c.bf16 %v4857_v61, %v4857_v61  ;;  %v4860_v51 = vsel %vm4796_vm11, %v4764_v6, %v4828_v1  ;;  %v6229_v28 = vadd.f32 %v6197_v44, %v6027_v58  ;;  %v4611_v45 = vpop.f32.mrb[5].mxu0 }
 0x21b   : > { %5020 = vst.msk [vmem:[%s8542_s19 + $0x8] sm:$0xf] %vm5017_vm10, %v5733_v7  ;;  %v5734_v27 = vpack.c.bf16 %v4860_v51, %v4860_v51  ;;  %v4858_v53 = vsel %vm4794_vm12, %v4762_v23, %v4826_v22  ;;  %v6230_v21 = vadd.f32 %v4611_v45, %v1857_v50  ;;  %v6198_v47 = vpop.f32.mrb[6].mxu0 }
 0x21c   : > { %5018 = vst.msk [vmem:[%s8542_s19] sm:$0xf] %vm5017_vm10, %v5731_v3  ;;  %v5732_v46 = vpack.c.bf16 %v4858_v53, %v4858_v53  ;;  %v4767_v15 = vadd.f32 %v6229_v28, %v8533_v2  ;;  %v6231_v60 = vadd.f32 %v6198_v47, %v6028_v54  ;;  %v4614_v20 = vpop.f32.mrb[7].mxu0 }
 0x21d   : > { %5021 = vst.msk [vmem:[%s8542_s19 + $0xc] sm:$0xf] %vm5017_vm10, %v5734_v27  ;;  %v4765_v42 = vadd.f32 %v6230_v21, %v8533_v2  ;;  %v6232_v33 = vadd.f32 %v4614_v20, %v1860_v18 }
 0x21e   : > { %5019 = vst.msk [vmem:[%s8542_s19 + $0x4] sm:$0xf] %vm5017_vm10, %v5732_v46  ;;  %vm4799_vm13 = vcmp.ge.f32.partialorder %v4767_v15, 0.0  ;;  %v4831_v12 = vmul.f32 0.2, %v4767_v15  ;;  %v4768_v31 = vadd.f32 %v6231_v60, %v8533_v2 }
 0x21f   : > { %vm4797_vm14 = vcmp.ge.f32.partialorder %v4765_v42, 0.0  ;;  %v4829_v57 = vmul.f32 0.2, %v4765_v42  ;;  %v4766_v8 = vadd.f32 %v6232_v33, %v8533_v2 }
 0x220   : > { %v4863_v48 = vsel %vm4799_vm13, %v4767_v15, %v4831_v12  ;;  %vm4800_vm15 = vcmp.ge.f32.partialorder %v4768_v31, 0.0  ;;  %v4832_v62 = vmul.f32 0.2, %v4768_v31 }
 0x221   : > { %v5737_v56 = vpack.c.bf16 %v4863_v48, %v4863_v48  ;;  %v4861_v40 = vsel %vm4797_vm14, %v4765_v42, %v4829_v57  ;;  %vm4798_vm0 = vcmp.ge.f32.partialorder %v4766_v8, 0.0  ;;  %v4830_v13 = vmul.f32 0.2, %v4766_v8  ;;  %v6201_v17 = vpop.f32.mrb[8].mxu0 }
 0x222   : > { %v5735_v30 = vpack.c.bf16 %v4861_v40, %v4861_v40  ;;  %v4864_v9 = vsel %vm4800_vm15, %v4768_v31, %v4832_v62  ;;  %v6233_v14 = vadd.f32 %v6201_v17, %v8514_v11  ;;  %v4627_v63 = vpop.f32.mrb[9].mxu0 }
 0x223   : > { %5024 = vst.msk [vmem:[%s8542_s19 + $0x18] sm:$0xf] %vm5017_vm10, %v5737_v56  ;;  %v5738_v4 = vpack.c.bf16 %v4864_v9, %v4864_v9  ;;  %v4862_v43 = vsel %vm4798_vm0, %v4766_v8, %v4830_v13  ;;  %v6234_v16 = vadd.f32 %v4627_v63, %v8516_v32  ;;  %v6202_v58 = vpop.f32.mrb[10].mxu0 }
 0x224   : > { %5022 = vst.msk [vmem:[%s8542_s19 + $0x10] sm:$0xf] %vm5017_vm10, %v5735_v30  ;;  %v5736_v50 = vpack.c.bf16 %v4862_v43, %v4862_v43  ;;  %v4771_v54 = vadd.f32 %v6233_v14, %v8533_v2  ;;  %v6235_v18 = vadd.f32 %v6202_v58, %v8518_v24  ;;  %v4630_v52 = vpop.f32.mrb[11].mxu0 }
 0x225   : > { %5025 = vst.msk [vmem:[%s8542_s19 + $0x1c] sm:$0xf] %vm5017_vm10, %v5738_v4  ;;  %v4769_v11 = vadd.f32 %v6234_v16, %v8533_v2  ;;  %v6236_v39 = vadd.f32 %v4630_v52, %v8520_v5 }
 0x226   : > { %5023 = vst.msk [vmem:[%s8542_s19 + $0x14] sm:$0xf] %vm5017_vm10, %v5736_v50  ;;  %vm4803_vm1 = vcmp.ge.f32.partialorder %v4771_v54, 0.0  ;;  %v4835_v0 = vmul.f32 0.2, %v4771_v54  ;;  %v4772_v32 = vadd.f32 %v6235_v18, %v8533_v2 }
 0x227   : > { %vm4801_vm2 = vcmp.ge.f32.partialorder %v4769_v11, 0.0  ;;  %v4833_v36 = vmul.f32 0.2, %v4769_v11  ;;  %v4770_v10 = vadd.f32 %v6236_v39, %v8533_v2 }
 0x228   : > { %v4867_v59 = vsel %vm4803_vm1, %v4771_v54, %v4835_v0  ;;  %vm4804_vm3 = vcmp.ge.f32.partialorder %v4772_v32, 0.0  ;;  %v4836_v24 = vmul.f32 0.2, %v4772_v32 }
 0x229   : > { %v5741_v38 = vpack.c.bf16 %v4867_v59, %v4867_v59  ;;  %v4865_v37 = vsel %vm4801_vm2, %v4769_v11, %v4833_v36  ;;  %vm4802_vm4 = vcmp.ge.f32.partialorder %v4770_v10, 0.0  ;;  %v4834_v26 = vmul.f32 0.2, %v4770_v10  ;;  %v6205_v5 = vpop.f32.mrb[12].mxu0 }
 0x22a   : > { %v5739_v35 = vpack.c.bf16 %v4865_v37, %v4865_v37  ;;  %v4868_v34 = vsel %vm4804_vm3, %v4772_v32, %v4836_v24  ;;  %v6237_v6 = vadd.f32 %v6205_v5, %v8522_v55  ;;  %v4643_v49 = vpop.f32.mrb[13].mxu0 }
 0x22b   : > { %5028 = vst.msk [vmem:[%s8542_s19 + $0x28] sm:$0xf] %vm5017_vm10, %v5741_v38  ;;  %v5742_v23 = vpack.c.bf16 %v4868_v34, %v4868_v34  ;;  %v4866_v25 = vsel %vm4802_vm4, %v4770_v10, %v4834_v26  ;;  %v6238_v1 = vadd.f32 %v4643_v49, %v8524_v29  ;;  %v6206_v7 = vpop.f32.mrb[14].mxu0 }
 0x22c   : > { %5026 = vst.msk [vmem:[%s8542_s19 + $0x20] sm:$0xf] %vm5017_vm10, %v5739_v35  ;;  %v5740_v61 = vpack.c.bf16 %v4866_v25, %v4866_v25  ;;  %v4775_v22 = vadd.f32 %v6237_v6, %v8533_v2  ;;  %v6239_v44 = vadd.f32 %v6206_v7, %v8526_v19  ;;  %v4646_v3 = vpop.f32.mrb[15].mxu0 }
 0x22d   : > { %5029 = vst.msk [vmem:[%s8542_s19 + $0x2c] sm:$0xf] %vm5017_vm10, %v5742_v23  ;;  %v4773_v55 = vadd.f32 %v6238_v1, %v8533_v2  ;;  %v6240_v51 = vadd.f32 %v4646_v3, %v8528_v41 }
 0x22e   : > { %5027 = vst.msk [vmem:[%s8542_s19 + $0x24] sm:$0xf] %vm5017_vm10, %v5740_v61  ;;  %vm4807_vm5 = vcmp.ge.f32.partialorder %v4775_v22, 0.0  ;;  %v4839_v28 = vmul.f32 0.2, %v4775_v22  ;;  %v4776_v29 = vadd.f32 %v6239_v44, %v8533_v2 }
 0x22f   : > { %vm4805_vm6 = vcmp.ge.f32.partialorder %v4773_v55, 0.0  ;;  %v4837_v45 = vmul.f32 0.2, %v4773_v55  ;;  %v4774_v27 = vadd.f32 %v6240_v51, %v8533_v2 }
 0x230   : > { %v4871_v53 = vsel %vm4807_vm5, %v4775_v22, %v4839_v28  ;;  %vm4808_vm7 = vcmp.ge.f32.partialorder %v4776_v29, 0.0  ;;  %v4840_v19 = vmul.f32 0.2, %v4776_v29 }
 0x231   : > { %v5745_v21 = vpack.c.bf16 %v4871_v53, %v4871_v53  ;;  %v4869_v47 = vsel %vm4805_vm6, %v4773_v55, %v4837_v45  ;;  %vm4806_vm8 = vcmp.ge.f32.partialorder %v4774_v27, 0.0  ;;  %v4838_v46 = vmul.f32 0.2, %v4774_v27  ;;  %v6209_v41 = vpop.f32.mrb[16].mxu0 }
 0x232   : > { %v5743_v15 = vpack.c.bf16 %v4869_v47, %v4869_v47  ;;  %v4872_v60 = vsel %vm4808_vm7, %v4776_v29, %v4840_v19  ;;  %v6073_v20 = vpop.f32.mrb[16].mxu1  ;;  %v4659_v42 = vpop.f32.mrb[17].mxu0 }
 0x233   : > { %5032 = vst.msk [vmem:[%s8542_s19 + $0x38] sm:$0xf] %vm5017_vm10, %v5745_v21  ;;  %v5746_v33 = vpack.c.bf16 %v4872_v60, %v4872_v60  ;;  %v4870_v12 = vsel %vm4806_vm8, %v4774_v27, %v4838_v46  ;;  %v6241_v31 = vadd.f32 %v6209_v41, %v6073_v20  ;;  %v2631_v57 = vpop.f32.mrb[17].mxu1  ;;  %v6210_v8 = vpop.f32.mrb[18].mxu0 }
 0x234   : > { %5030 = vst.msk [vmem:[%s8542_s19 + $0x30] sm:$0xf] %vm5017_vm10, %v5743_v15  ;;  %v5744_v48 = vpack.c.bf16 %v4870_v12, %v4870_v12  ;;  %v6242_v62 = vadd.f32 %v4659_v42, %v2631_v57  ;;  %v6074_v56 = vpop.f32.mrb[18].mxu1  ;;  %v4662_v40 = vpop.f32.mrb[19].mxu0 }
 0x235   : > { %5033 = vst.msk [vmem:[%s8542_s19 + $0x3c] sm:$0xf] %vm5017_vm10, %v5746_v33  ;;  %v4779_v13 = vadd.f32 %v6241_v31, %v8533_v2  ;;  %v6243_v17 = vadd.f32 %v6210_v8, %v6074_v56  ;;  %v2634_v30 = vpop.f32.mrb[19].mxu1 }
 0x236   : > { %5031 = vst.msk [vmem:[%s8542_s19 + $0x34] sm:$0xf] %vm5017_vm10, %v5744_v48  ;;  %v4777_v9 = vadd.f32 %v6242_v62, %v8533_v2  ;;  %v6244_v14 = vadd.f32 %v4662_v40, %v2634_v30 }
 0x237   : > { %vm4811_vm9 = vcmp.ge.f32.partialorder %v4779_v13, 0.0  ;;  %v4843_v63 = vmul.f32 0.2, %v4779_v13  ;;  %v4780_v4 = vadd.f32 %v6243_v17, %v8533_v2 }
 0x238   : > { %vm4809_vm11 = vcmp.ge.f32.partialorder %v4777_v9, 0.0  ;;  %v4841_v43 = vmul.f32 0.2, %v4777_v9  ;;  %v4778_v16 = vadd.f32 %v6244_v14, %v8533_v2 }
 0x239   : > { %v4875_v58 = vsel %vm4811_vm9, %v4779_v13, %v4843_v63  ;;  %vm4812_vm12 = vcmp.ge.f32.partialorder %v4780_v4, 0.0  ;;  %v4844_v50 = vmul.f32 0.2, %v4780_v4  ;;  %v6213_v54 = vpop.f32.mrb[20].mxu0 }
 0x23a   : > { %v5749_v18 = vpack.c.bf16 %v4875_v58, %v4875_v58  ;;  %v4873_v52 = vsel %vm4809_vm11, %v4777_v9, %v4841_v43  ;;  %vm4810_vm13 = vcmp.ge.f32.partialorder %v4778_v16, 0.0  ;;  %v4842_v11 = vmul.f32 0.2, %v4778_v16  ;;  %v6077_v39 = vpop.f32.mrb[20].mxu1  ;;  %v4675_v0 = vpop.f32.mrb[21].mxu0 }
 0x23b   : > { %v5747_v32 = vpack.c.bf16 %v4873_v52, %v4873_v52  ;;  %v4876_v36 = vsel %vm4812_vm12, %v4780_v4, %v4844_v50  ;;  %v6245_v10 = vadd.f32 %v6213_v54, %v6077_v39  ;;  %v2647_v59 = vpop.f32.mrb[21].mxu1  ;;  %v6214_v24 = vpop.f32.mrb[22].mxu0 }
 0x23c   : > { %5036 = vst.msk [vmem:[%s8542_s19 + $0x48] sm:$0xf] %vm5017_vm10, %v5749_v18  ;;  %v5750_v38 = vpack.c.bf16 %v4876_v36, %v4876_v36  ;;  %v4874_v37 = vsel %vm4810_vm13, %v4778_v16, %v4842_v11  ;;  %v6246_v26 = vadd.f32 %v4675_v0, %v2647_v59  ;;  %v6078_v5 = vpop.f32.mrb[22].mxu1  ;;  %v4678_v35 = vpop.f32.mrb[23].mxu0 }
 0x23d   : > { %5034 = vst.msk [vmem:[%s8542_s19 + $0x40] sm:$0xf] %vm5017_vm10, %v5747_v32  ;;  %v5748_v34 = vpack.c.bf16 %v4874_v37, %v4874_v37  ;;  %v4783_v6 = vadd.f32 %v6245_v10, %v8533_v2  ;;  %v6247_v49 = vadd.f32 %v6214_v24, %v6078_v5  ;;  %v2650_v23 = vpop.f32.mrb[23].mxu1 }
 0x23e   : > { %5037 = vst.msk [vmem:[%s8542_s19 + $0x4c] sm:$0xf] %vm5017_vm10, %v5750_v38  ;;  %v4781_v25 = vadd.f32 %v6246_v26, %v8533_v2  ;;  %v6248_v1 = vadd.f32 %v4678_v35, %v2650_v23 }
 0x23f   : > { %5035 = vst.msk [vmem:[%s8542_s19 + $0x44] sm:$0xf] %vm5017_vm10, %v5748_v34  ;;  %vm4815_vm14 = vcmp.ge.f32.partialorder %v4783_v6, 0.0  ;;  %v4847_v7 = vmul.f32 0.2, %v4783_v6  ;;  %v4784_v61 = vadd.f32 %v6247_v49, %v8533_v2 }
 0x240   : > { %vm4813_vm15 = vcmp.ge.f32.partialorder %v4781_v25, 0.0  ;;  %v4845_v22 = vmul.f32 0.2, %v4781_v25  ;;  %v4782_v44 = vadd.f32 %v6248_v1, %v8533_v2 }
 0x241   : > { %v4879_v3 = vsel %vm4815_vm14, %v4783_v6, %v4847_v7  ;;  %vm4816_vm0 = vcmp.ge.f32.partialorder %v4784_v61, 0.0  ;;  %v4848_v55 = vmul.f32 0.2, %v4784_v61  ;;  %v6217_v51 = vpop.f32.mrb[24].mxu0 }
 0x242   : > { %v5753_v28 = vpack.c.bf16 %v4879_v3, %v4879_v3  ;;  %v4877_v29 = vsel %vm4813_vm15, %v4781_v25, %v4845_v22  ;;  %vm4814_vm1 = vcmp.ge.f32.partialorder %v4782_v44, 0.0  ;;  %v4846_v45 = vmul.f32 0.2, %v4782_v44  ;;  %v6081_v27 = vpop.f32.mrb[24].mxu1  ;;  %v4691_v53 = vpop.f32.mrb[25].mxu0 }
 0x243   : > { %v5751_v19 = vpack.c.bf16 %v4877_v29, %v4877_v29  ;;  %v4880_v21 = vsel %vm4816_vm0, %v4784_v61, %v4848_v55  ;;  %v6249_v47 = vadd.f32 %v6217_v51, %v6081_v27  ;;  %v2663_v46 = vpop.f32.mrb[25].mxu1  ;;  %v6218_v41 = vpop.f32.mrb[26].mxu0 }
 0x244   : > { %5040 = vst.msk [vmem:[%s8542_s19 + $0x58] sm:$0xf] %vm5017_vm10, %v5753_v28  ;;  %v5754_v15 = vpack.c.bf16 %v4880_v21, %v4880_v21  ;;  %v4878_v60 = vsel %vm4814_vm1, %v4782_v44, %v4846_v45  ;;  %v6250_v20 = vadd.f32 %v4691_v53, %v2663_v46  ;;  %v6082_v42 = vpop.f32.mrb[26].mxu1  ;;  %v4694_v33 = vpop.f32.mrb[27].mxu0 }
 0x245   : > { %5038 = vst.msk [vmem:[%s8542_s19 + $0x50] sm:$0xf] %vm5017_vm10, %v5751_v19  ;;  %v5752_v12 = vpack.c.bf16 %v4878_v60, %v4878_v60  ;;  %v4787_v31 = vadd.f32 %v6249_v47, %v8533_v2  ;;  %v6251_v57 = vadd.f32 %v6218_v41, %v6082_v42  ;;  %v2666_v8 = vpop.f32.mrb[27].mxu1 }
 0x246   : > { %5041 = vst.msk [vmem:[%s8542_s19 + $0x5c] sm:$0xf] %vm5017_vm10, %v5754_v15  ;;  %v4785_v48 = vadd.f32 %v6250_v20, %v8533_v2  ;;  %v6252_v62 = vadd.f32 %v4694_v33, %v2666_v8 }
 0x247   : > { %5039 = vst.msk [vmem:[%s8542_s19 + $0x54] sm:$0xf] %vm5017_vm10, %v5752_v12  ;;  %vm4819_vm2 = vcmp.ge.f32.partialorder %v4787_v31, 0.0  ;;  %v4851_v56 = vmul.f32 0.2, %v4787_v31  ;;  %v4788_v40 = vadd.f32 %v6251_v57, %v8533_v2 }
 0x248   : > { %vm4817_vm3 = vcmp.ge.f32.partialorder %v4785_v48, 0.0  ;;  %v4849_v13 = vmul.f32 0.2, %v4785_v48  ;;  %v4786_v17 = vadd.f32 %v6252_v62, %v8533_v2 }
 0x249   : > { %v4883_v30 = vsel %vm4819_vm2, %v4787_v31, %v4851_v56  ;;  %vm4820_vm4 = vcmp.ge.f32.partialorder %v4788_v40, 0.0  ;;  %v4852_v9 = vmul.f32 0.2, %v4788_v40  ;;  %v6221_v14 = vpop.f32.mrb[28].mxu0 }
 0x24a   : > { %v5757_v63 = vpack.c.bf16 %v4883_v30, %v4883_v30  ;;  %v4881_v4 = vsel %vm4817_vm3, %v4785_v48, %v4849_v13  ;;  %vm4818_vm5 = vcmp.ge.f32.partialorder %v4786_v17, 0.0  ;;  %v4850_v43 = vmul.f32 0.2, %v4786_v17  ;;  %v6085_v16 = vpop.f32.mrb[28].mxu1  ;;  %v4707_v58 = vpop.f32.mrb[29].mxu0 }
 0x24b   : > { %v5755_v50 = vpack.c.bf16 %v4881_v4, %v4881_v4  ;;  %v4884_v54 = vsel %vm4820_vm4, %v4788_v40, %v4852_v9  ;;  %v6253_v18 = vadd.f32 %v6221_v14, %v6085_v16  ;;  %v2679_v52 = vpop.f32.mrb[29].mxu1  ;;  %v6222_v11 = vpop.f32.mrb[30].mxu0 }
 0x24c   : > { %5044 = vst.msk [vmem:[%s8542_s19 + $0x68] sm:$0xf] %vm5017_vm10, %v5757_v63  ;;  %v5758_v39 = vpack.c.bf16 %v4884_v54, %v4884_v54  ;;  %v4882_v0 = vsel %vm4818_vm5, %v4786_v17, %v4850_v43  ;;  %v6254_v32 = vadd.f32 %v4707_v58, %v2679_v52  ;;  %v6086_v36 = vpop.f32.mrb[30].mxu1  ;;  %v4710_v10 = vpop.f32.mrb[31].mxu0 }
 0x24d   : > { %5042 = vst.msk [vmem:[%s8542_s19 + $0x60] sm:$0xf] %vm5017_vm10, %v5755_v50  ;;  %v5756_v59 = vpack.c.bf16 %v4882_v0, %v4882_v0  ;;  %v4791_v24 = vadd.f32 %v6253_v18, %v8533_v2  ;;  %v6255_v38 = vadd.f32 %v6222_v11, %v6086_v36  ;;  %v2682_v37 = vpop.f32.mrb[31].mxu1 }
 0x24e   : > { %5045 = vst.msk [vmem:[%s8542_s19 + $0x6c] sm:$0xf] %vm5017_vm10, %v5758_v39  ;;  %v4789_v26 = vadd.f32 %v6254_v32, %v8533_v2  ;;  %v6256_v5 = vadd.f32 %v4710_v10, %v2682_v37 }
 0x24f   : > { %5043 = vst.msk [vmem:[%s8542_s19 + $0x64] sm:$0xf] %vm5017_vm10, %v5756_v59  ;;  %vm4823_vm6 = vcmp.ge.f32.partialorder %v4791_v24, 0.0  ;;  %v4855_v35 = vmul.f32 0.2, %v4791_v24  ;;  %v4792_v34 = vadd.f32 %v6255_v38, %v8533_v2 }
 0x250   : > { %vm4821_vm7 = vcmp.ge.f32.partialorder %v4789_v26, 0.0  ;;  %v4853_v6 = vmul.f32 0.2, %v4789_v26  ;;  %v4790_v49 = vadd.f32 %v6256_v5, %v8533_v2 }
 0x251   : > { %v4887_v23 = vsel %vm4823_vm6, %v4791_v24, %v4855_v35  ;;  %vm4824_vm8 = vcmp.ge.f32.partialorder %v4792_v34, 0.0  ;;  %v4856_v25 = vmul.f32 0.2, %v4792_v34 }
 0x252   : > { %v5761_v1 = vpack.c.bf16 %v4887_v23, %v4887_v23  ;;  %v4885_v7 = vsel %vm4821_vm7, %v4789_v26, %v4853_v6  ;;  %vm4822_vm9 = vcmp.ge.f32.partialorder %v4790_v49, 0.0  ;;  %v4854_v61 = vmul.f32 0.2, %v4790_v49 }
 0x253   : > { %v5759_v22 = vpack.c.bf16 %v4885_v7, %v4885_v7  ;;  %v4888_v44 = vsel %vm4824_vm8, %v4792_v34, %v4856_v25 }
 0x254   : > { %5048 = vst.msk [vmem:[%s8542_s19 + $0x78] sm:$0xf] %vm5017_vm10, %v5761_v1  ;;  %v5762_v3 = vpack.c.bf16 %v4888_v44, %v4888_v44  ;;  %v4886_v2 = vsel %vm4822_vm9, %v4790_v49, %v4854_v61 }
 0x255   : > { %5046 = vst.msk [vmem:[%s8542_s19 + $0x70] sm:$0xf] %vm5017_vm10, %v5759_v22  ;;  %v5760_v55 = vpack.c.bf16 %v4886_v2, %v4886_v2 }
 0x256   : > { %5049 = vst.msk [vmem:[%s8542_s19 + $0x7c] sm:$0xf] %vm5017_vm10, %v5762_v3 }
 0x257   : > { %5047 = vst.msk [vmem:[%s8542_s19 + $0x74] sm:$0xf] %vm5017_vm10, %v5760_v55 }
 0x258   : > { %6667 = shalt.err (!%p6664_p5)
}
 0x259   : > { %s6668_s6 = scalar_lea.hbm %s8643_s28, 2048  ;;  %s6672_s9 = scalar_lea.hbm %s8704_s3, 4096 }
 0x25a   : > { %p6669_p6 = scmp.ne.s32.totalorder %s8643_s28, %s6668_s6  ;;  %p6673_p10 = scmp.lt.u32.totalorder %s8643_s28, %s8704_s3 }
 0x25b   : > { %p6674_p11 = scmp.lt.u32.totalorder %s6672_s9, %s6668_s6  ;;  %p6676_p13 = scmp.lt.u32.totalorder %s6668_s6, %s8643_s28 }
 0x25c   : > { %p6670_p7 = pnand %p6669_p6, %p6797_p4 }
 0x25d   : > { %p6675_p12 = por %p6674_p11, %p6673_p10 }
 0x25e   : > { %p6671_p9 = pneg %p6670_p7 }
 0x25f   : > { %p6677_p0 = por %p6676_p13, %p6675_p12 }
 0x261   : > { %p6678_p1 = pnand %p6677_p0, %p6671_p9 }
 0x263   : > { %6681 = shalt.err (!%p6678_p1)
}
 0x264   : > { %s6735_s18 = smov 64   ;;  %s6736_s19 = smov 4  }
 0x265   : > { %6492 = dma.vmem_to_hbm [thread:$0]  (%p6797_p4), %s8645_s23, 2048, %s8643_s28, %s8655_s15, %s6735_s18, %s6735_s18, %s6736_s19  }
 0x266 PF: > { %p6498_p2 = scmp.ge.s32.totalorder %s6732_s17, 2  ;;  %s5082_s21 = sand.u32 1, %s6712_s12  }
 0x267   : > { %s5083_s26 = scalar_lea.sflag [#allocation3], %s5082_s21 }
 0x268   : > { %p6495_p3 = pnand %p6498_p2, %p6804_p8 }
 0x26a   : > { %6707 = dma.done.wait (!%p6495_p3), %s5083_s26, 2048  }
 0x26b   : > { %6709 = vsyncadd (!%p6495_p3), %s5083_s26, 4294965248  ;;  %s16_s17 = sadd.s32 1, %s6732_s17   ;;  %s8774_s12 = smov %s6716_s13 }
 0x26c   : > { %p13_p5 = scmp.ge.s32.totalorder %s16_s17, 4   ;;  %s8775_s13 = smov %s6720_s14 }
 0x26d   : > { %s8776_s14 = smov %s6810_s25  ;;  %s8777_s15 = smov %s6728_s16 }
 0x26e   : > { %s8778_s16 = smov %s8780_s20  ;;  %15 = sbr.rel (!%p13_p5) target bundleno = 4 (0x4), region = 78 }
 0x275   :  { %5088 = vsyncpa [#allocation3], 1 }
 0x276   :  { %5090 = vsyncpa [#allocation3 + $0x1], 1 }

</bundles_post_ra>
